<compile_context>
chip_gen: v7x
topology: tpu7x:2x2x1
jax: 0.10.0
libtpu: 0.0.40
codegen_flags: <defaults>
</compile_context>

<pallas_src>
import functools

import jax
import jax.numpy as jnp
from jax.experimental import pallas as pl
from jax.experimental.pallas import tpu as pltpu


# ----------------------------------------------------------------------------
# Synthetic BART-decoder config (deterministic init)
# ----------------------------------------------------------------------------
VOCAB = 128
D_MODEL = 32
N_HEADS = 4
HEAD_DIM = D_MODEL // N_HEADS
FFN = 64
N_LAYERS = 2
MAX_POS = 64
NEG_INF = -1e9


# ----------------------------------------------------------------------------
# Static slab layouts (shared between pack_params and the kernel)
# ----------------------------------------------------------------------------
# Per-layer bf16 weight slab row: (D_MODEL, PW_WIDTH), fields along lanes.
_PW_FIELDS = [
    ("self_qkv_w", 3 * D_MODEL),
    ("self_o_w", D_MODEL),
    ("cross_q_w", D_MODEL),
    ("cross_o_w", D_MODEL),
    ("fc1_w", FFN),
]
_PW_OFF = {}
_o = 0
for _n, _w in _PW_FIELDS:
    _PW_OFF[_n] = (_o, _w)
    _o += _w
PW_WIDTH = _o  # 256

# Per-layer f32 bias/LN slab row: (1, PL_WIDTH), fields along lanes.
_PL_FIELDS = [
    ("self_qkv_b", 3 * D_MODEL),
    ("self_o_b", D_MODEL),
    ("self_ln_g", D_MODEL),
    ("self_ln_b", D_MODEL),
    ("cross_q_b", D_MODEL),
    ("cross_o_b", D_MODEL),
    ("cross_ln_g", D_MODEL),
    ("cross_ln_b", D_MODEL),
    ("fc1_b", FFN),
    ("fc2_b", D_MODEL),
    ("ffn_ln_g", D_MODEL),
    ("ffn_ln_b", D_MODEL),
]
_PL_OFF = {}
_o = 0
for _n, _w in _PL_FIELDS:
    _PL_OFF[_n] = (_o, _w)
    _o += _w
PL_WIDTH = _o  # 480

# Extra row (index N_LAYERS) of the weight slab holds the layer-fused cross-KV
# projection weight and the tied LM head; extra bias row holds the embedding
# LN params and the fused cross-KV bias.
CKV_W_OFF = 0
LM_W_OFF = 2 * D_MODEL * N_LAYERS
EMB_G_OFF = 0
EMB_B_OFF = D_MODEL
CKV_B_OFF = 2 * D_MODEL


# ----------------------------------------------------------------------------
# In-kernel helpers (traced inside the single fused kernel body)
# ----------------------------------------------------------------------------
def _mm(x, w_bf16, b_f32):
    """bf16 MXU matmul with f32 accumulation + bias. x:(M,K) f32, w:(K,N) bf16."""
    return jnp.dot(x.astype(jnp.bfloat16), w_bf16,
                   preferred_element_type=jnp.float32) + b_f32


def _ln(x, g, b, eps=1e-5):
    mu = jnp.mean(x, axis=-1, keepdims=True)
    var = jnp.mean(jnp.square(x - mu), axis=-1, keepdims=True)
    return (x - mu) * jax.lax.rsqrt(var + eps) * g + b


def _attn(q2d, k2d, v2d, bias, B, Sq, Sk):
    """Head-batched attention.  q2d/k2d/v2d are (B*S, D_MODEL) f32; heads are
    collapsed into the batch dim (B*H) so a single 3-D batched einsum does the
    whole score / context computation (one bf16 cast per tensor).  The softmax
    scale is already folded into the Q projection weights.  `bias` broadcasts
    against (B*H, Sq, Sk)."""
    H, Dh = N_HEADS, HEAD_DIM

    def heads(x2d, S_):
        return (x2d.reshape(B, S_, H, Dh)
                .transpose(0, 2, 1, 3)
                .reshape(B * H, S_, Dh)
                .astype(jnp.bfloat16))

    q = heads(q2d, Sq)
    k = heads(k2d, Sk)
    v = heads(v2d, Sk)
    s = jnp.einsum("bqd,bkd->bqk", q, k,
                   preferred_element_type=jnp.float32) + bias
    m = jnp.max(s, axis=-1, keepdims=True)
    p = jnp.exp(s - m)
    # Softmax divide -> EUP approx reciprocal + VPU multiply (frees VALU slot).
    p = p * pl.reciprocal(jnp.sum(p, axis=-1, keepdims=True), approx=True)
    o = jnp.einsum("bqk,bkd->bqd", p.astype(jnp.bfloat16), v,
                   preferred_element_type=jnp.float32)
    return (o.reshape(B, H, Sq, Dh)
            .transpose(0, 2, 1, 3)
            .reshape(B * Sq, H * Dh))


# ----------------------------------------------------------------------------
# The fused decoder kernel (single program, everything in VMEM)
# ----------------------------------------------------------------------------
def _decoder_kernel(x0_ref, enc_ref, cross_mask_ref, w_ref, fc2_ref, bias_ref,
                    logits_ref, self_kv_ref, cross_kv_ref, *, B, S, Se):
    D, H, L = D_MODEL, N_HEADS, N_LAYERS

    # Load the packed slabs once; all further access is static slicing of
    # in-register/VMEM values (no per-parameter DMAs).
    w = w_ref[...]        # (L+1, D, PW_WIDTH)   bf16
    fc2 = fc2_ref[...]    # (L, FFN, D)          bf16
    bias = bias_ref[...]  # (L+1, 1, PL_WIDTH)   f32

    def pw(l, name):
        off, width = _PW_OFF[name]
        return w[l, :, off:off + width]          # (D, width) bf16

    def pb(l, name):
        off, width = _PL_OFF[name]
        return bias[l, :, off:off + width]       # (1, width) f32

    # Embedding layernorm (residual stream stays in VMEM for the whole forward).
    emb_g = bias[L, :, EMB_G_OFF:EMB_G_OFF + D]
    emb_b = bias[L, :, EMB_B_OFF:EMB_B_OFF + D]
    x = _ln(x0_ref[...], emb_g, emb_b)           # (B*S, D)

    # Causal self-attention bias generated on the VPU (no HBM bias tensor).
    row = jax.lax.broadcasted_iota(jnp.int32, (S, S), 0)
    col = jax.lax.broadcasted_iota(jnp.int32, (S, S), 1)
    self_bias = jnp.where(col <= row, 0.0, NEG_INF).astype(jnp.float32)[None]
    # Cross-attention additive bias, expanded once to the (B*H) batch layout.
    cross_bias = jnp.broadcast_to(
        cross_mask_ref[...][:, None, None, :], (B, H, 1, Se)).reshape(B * H, 1, Se)

    # Layer-invariant cross K/V projection, hoisted out of the layer loop and
    # fused across layers: one lane-dense (D x L*2*D) matmul, stored straight
    # to the lane-dense cross-KV output slab.
    ckv_w = w[L, :, CKV_W_OFF:CKV_W_OFF + 2 * D * L]           # (D, 2*D*L) bf16
    ckv_b = bias[L, :, CKV_B_OFF:CKV_B_OFF + 2 * D * L]        # (1, 2*D*L) f32
    kv_all = _mm(enc_ref[...], ckv_w, ckv_b)                   # (B*Se, 2*D*L)
    cross_kv_ref[...] = kv_all

    self_kv_parts = []
    for l in range(L):
        # ---------------- self attention (fused QKV projection) -----------
        residual = x
        qkv = _mm(x, pw(l, "self_qkv_w"), pb(l, "self_qkv_b"))    # (B*S, 3D)
        self_kv_parts.append(qkv[:, D:3 * D])                      # [K|V] lanes
        attn = _attn(qkv[:, 0:D], qkv[:, D:2 * D], qkv[:, 2 * D:3 * D],
                     self_bias, B, S, S)
        attn = _mm(attn, pw(l, "self_o_w"), pb(l, "self_o_b"))
        x = _ln(residual + attn, pb(l, "self_ln_g"), pb(l, "self_ln_b"))

        # ---------------- cross attention (K/V hoisted above) --------------
        residual = x
        q_c = _mm(x, pw(l, "cross_q_w"), pb(l, "cross_q_b"))        # (B*S, D)
        k_c = kv_all[:, 2 * D * l:2 * D * l + D]
        v_c = kv_all[:, 2 * D * l + D:2 * D * (l + 1)]
        attn = _attn(q_c, k_c, v_c, cross_bias, B, S, Se)
        attn = _mm(attn, pw(l, "cross_o_w"), pb(l, "cross_o_b"))
        x = _ln(residual + attn, pb(l, "cross_ln_g"), pb(l, "cross_ln_b"))

        # ---------------- feed-forward -------------------------------------
        residual = x
        h = _mm(x, pw(l, "fc1_w"), pb(l, "fc1_b"))
        # TODO(synk): real ONNX BART uses exact (erf) GELU; tanh approximation
        # kept to stay on the known-good Mosaic lowering path.
        h = jax.nn.gelu(h, approximate=True)
        h = _mm(h, fc2[l], pb(l, "fc2_b"))
        x = _ln(residual + h, pb(l, "ffn_ln_g"), pb(l, "ffn_ln_b"))

    # Single full-width lane-dense store of all self K/V (B*S, L*2*D).
    self_kv_ref[...] = jnp.concatenate(self_kv_parts, axis=-1)

    # LM head (tied embedding, pre-transposed at pack time; VOCAB=128 lanes).
    lm_w = w[L, :, LM_W_OFF:LM_W_OFF + VOCAB]                      # (D, V) bf16
    logits_ref[...] = jnp.dot(x.astype(jnp.bfloat16), lm_w,
                              preferred_element_type=jnp.float32)  # (B*S, V)


# ----------------------------------------------------------------------------
# Synthetic parameter init + one-time packing into slabs
# ----------------------------------------------------------------------------
def init_params(key):
    def nrm(k, shape):
        return 0.02 * jax.random.normal(k, shape, dtype=jnp.float32)

    keys = iter(jax.random.split(key, 256))
    params = {
        "tok_emb": nrm(next(keys), (VOCAB, D_MODEL)),
        "pos_emb": nrm(next(keys), (MAX_POS, D_MODEL)),
        "emb_ln_g": jnp.ones((D_MODEL,), jnp.float32),
        "emb_ln_b": jnp.zeros((D_MODEL,), jnp.float32),
        "layers": [],
    }
    for _ in range(N_LAYERS):
        layer = {}
        for prefix in ("self", "cross"):
            for name in ("q", "k", "v", "o"):
                layer[f"{prefix}_W{name}"] = nrm(next(keys), (D_MODEL, D_MODEL))
                layer[f"{prefix}_b{name}"] = jnp.zeros((D_MODEL,), jnp.float32)
            layer[f"{prefix}_ln_g"] = jnp.ones((D_MODEL,), jnp.float32)
            layer[f"{prefix}_ln_b"] = jnp.zeros((D_MODEL,), jnp.float32)
        layer["fc1_W"] = nrm(next(keys), (D_MODEL, FFN))
        layer["fc1_b"] = jnp.zeros((FFN,), jnp.float32)
        layer["fc2_W"] = nrm(next(keys), (FFN, D_MODEL))
        layer["fc2_b"] = jnp.zeros((D_MODEL,), jnp.float32)
        layer["ffn_ln_g"] = jnp.ones((D_MODEL,), jnp.float32)
        layer["ffn_ln_b"] = jnp.zeros((D_MODEL,), jnp.float32)
        params["layers"].append(layer)
    return params


def pack_params(params):
    """One-time packing outside the jitted forward: fuse QKV / per-layer
    cross-KV weights, fold the softmax scale into the Q projections, stack
    everything into 3 slabs (2 bf16 + 1 f32), pre-transpose the tied LM head."""
    D, L = D_MODEL, N_LAYERS
    scale = 1.0 / (HEAD_DIM ** 0.5)
    assert LM_W_OFF + VOCAB <= PW_WIDTH
    assert CKV_B_OFF + 2 * D * L <= PL_WIDTH

    w_slab = jnp.zeros((L + 1, D, PW_WIDTH), jnp.float32)
    fc2_slab = jnp.zeros((L, FFN, D), jnp.float32)
    bias_slab = jnp.zeros((L + 1, 1, PL_WIDTH), jnp.float32)

    def put_w(slab, l, name, mat):
        off, width = _PW_OFF[name]
        return slab.at[l, :, off:off + width].set(mat)

    def put_b(slab, l, name, vec):
        off, width = _PL_OFF[name]
        return slab.at[l, 0, off:off + width].set(vec)

    for l, layer in enumerate(params["layers"]):
        qkv_w = jnp.concatenate(
            [layer["self_Wq"] * scale, layer["self_Wk"], layer["self_Wv"]], axis=1)
        qkv_b = jnp.concatenate(
            [layer["self_bq"] * scale, layer["self_bk"], layer["self_bv"]])
        w_slab = put_w(w_slab, l, "self_qkv_w", qkv_w)
        w_slab = put_w(w_slab, l, "self_o_w", layer["self_Wo"])
        w_slab = put_w(w_slab, l, "cross_q_w", layer["cross_Wq"] * scale)
        w_slab = put_w(w_slab, l, "cross_o_w", layer["cross_Wo"])
        w_slab = put_w(w_slab, l, "fc1_w", layer["fc1_W"])
        fc2_slab = fc2_slab.at[l].set(layer["fc2_W"])

        bias_slab = put_b(bias_slab, l, "self_qkv_b", qkv_b)
        bias_slab = put_b(bias_slab, l, "self_o_b", layer["self_bo"])
        bias_slab = put_b(bias_slab, l, "self_ln_g", layer["self_ln_g"])
        bias_slab = put_b(bias_slab, l, "self_ln_b", layer["self_ln_b"])
        bias_slab = put_b(bias_slab, l, "cross_q_b", layer["cross_bq"] * scale)
        bias_slab = put_b(bias_slab, l, "cross_o_b", layer["cross_bo"])
        bias_slab = put_b(bias_slab, l, "cross_ln_g", layer["cross_ln_g"])
        bias_slab = put_b(bias_slab, l, "cross_ln_b", layer["cross_ln_b"])
        bias_slab = put_b(bias_slab, l, "fc1_b", layer["fc1_b"])
        bias_slab = put_b(bias_slab, l, "fc2_b", layer["fc2_b"])
        bias_slab = put_b(bias_slab, l, "ffn_ln_g", layer["ffn_ln_g"])
        bias_slab = put_b(bias_slab, l, "ffn_ln_b", layer["ffn_ln_b"])

    # Layer-fused cross K/V projection, lane layout [K_0 | V_0 | K_1 | V_1 ...]
    ckv_w = jnp.concatenate(
        [jnp.concatenate([layer["cross_Wk"], layer["cross_Wv"]], axis=1)
         for layer in params["layers"]], axis=1)                 # (D, 2*D*L)
    ckv_b = jnp.concatenate(
        [jnp.concatenate([layer["cross_bk"], layer["cross_bv"]])
         for layer in params["layers"]])                          # (2*D*L,)
    lm_w = params["tok_emb"].T                                    # (D, V)

    w_slab = w_slab.at[L, :, CKV_W_OFF:CKV_W_OFF + 2 * D * L].set(ckv_w)
    w_slab = w_slab.at[L, :, LM_W_OFF:LM_W_OFF + VOCAB].set(lm_w)
    bias_slab = bias_slab.at[L, 0, EMB_G_OFF:EMB_G_OFF + D].set(params["emb_ln_g"])
    bias_slab = bias_slab.at[L, 0, EMB_B_OFF:EMB_B_OFF + D].set(params["emb_ln_b"])
    bias_slab = bias_slab.at[L, 0, CKV_B_OFF:CKV_B_OFF + 2 * D * L].set(ckv_b)

    return {
        "tok_emb": params["tok_emb"],
        "pos_emb": params["pos_emb"],
        "w_slab": w_slab.astype(jnp.bfloat16),
        "fc2_slab": fc2_slab.astype(jnp.bfloat16),
        "bias_slab": bias_slab,
    }


# ----------------------------------------------------------------------------
# BartDecoderInit.forward equivalent
# ----------------------------------------------------------------------------
def bart_decoder_init(packed, input_ids, encoder_attention_mask,
                      encoder_hidden_states):
    B, S = input_ids.shape
    Se = encoder_hidden_states.shape[1]
    D, L, H, Dh = D_MODEL, N_LAYERS, N_HEADS, HEAD_DIM

    # Glue: embedding gather + learned positions (data-dependent gather kept in
    # XLA).  TODO(synk): real BART offsets learned positions by +2 and may
    # scale token embeddings by sqrt(d_model); irrelevant for synthetic weights.
    x0 = (packed["tok_emb"][input_ids]
          + packed["pos_emb"][:S][None, :, :]).reshape(B * S, D).astype(jnp.float32)
    enc2d = encoder_hidden_states.reshape(B * Se, D).astype(jnp.float32)
    cross_mask = (1.0 - encoder_attention_mask.astype(jnp.float32)) * NEG_INF

    kern = functools.partial(_decoder_kernel, B=B, S=S, Se=Se)
    vmem = pl.BlockSpec(memory_space=pltpu.MemorySpace.VMEM)

    out_shape = (
        jax.ShapeDtypeStruct((B * S, VOCAB), jnp.float32),        # logits (2-D)
        jax.ShapeDtypeStruct((B * S, 2 * D * L), jnp.float32),    # self K/V slab
        jax.ShapeDtypeStruct((B * Se, 2 * D * L), jnp.float32),   # cross K/V slab
    )

    # Single grid-less pallas_call: 6 input DMAs, 3 lane-dense output stores.
    logits2d, self_kv, cross_kv = pl.pallas_call(
        kern,
        out_shape=out_shape,
        in_specs=[vmem] * 6,
        out_specs=(vmem, vmem, vmem),
    )(x0, enc2d, cross_mask, packed["w_slab"], packed["fc2_slab"],
      packed["bias_slab"])

    logits = logits2d.reshape(B, S, VOCAB)
    # Lane layout of the KV slabs is [layer][k|v][head][dh]; do the
    # (L, B, H, S, Dh) permute here in the XLA wrapper (lane-dense kernel stores).
    skv = self_kv.reshape(B, S, L, 2, H, Dh).transpose(2, 3, 0, 4, 1, 5)
    ckv = cross_kv.reshape(B, Se, L, 2, H, Dh).transpose(2, 3, 0, 4, 1, 5)

    # PKV groups of 4 per layer, matching the ONNX output grouping.
    past_key_values = tuple(
        (skv[l, 0], skv[l, 1], ckv[l, 0], ckv[l, 1]) for l in range(L))
    return logits, past_key_values


# ----------------------------------------------------------------------------
if __name__ == "__main__":
    B, S, Se = 2, 8, 8

    key = jax.random.PRNGKey(0)
    k_ids, k_mask, k_enc, k_params = jax.random.split(key, 4)

    input_ids = jax.random.randint(k_ids, (B, S), 0, VOCAB, dtype=jnp.int32)
    encoder_attention_mask = (
        jax.random.uniform(k_mask, (B, Se)) > 0.2).astype(jnp.int32)
    encoder_hidden_states = jax.random.normal(k_enc, (B, Se, D_MODEL),
                                              dtype=jnp.float32)

    params = init_params(k_params)
    packed = pack_params(params)   # one-time weight fusion / slab packing / bf16

    fwd = jax.jit(bart_decoder_init)
    logits, pkv = fwd(packed, input_ids, encoder_attention_mask,
                      encoder_hidden_states)

    jax.block_until_ready(logits)
    jax.block_until_ready(pkv)

    assert logits.shape == (B, S, VOCAB)
    assert len(pkv) == N_LAYERS and all(len(g) == 4 for g in pkv)
    assert pkv[0][0].shape == (B, N_HEADS, S, HEAD_DIM)
    assert pkv[0][2].shape == (B, N_HEADS, Se, HEAD_DIM)

    print("KERNEL_OK")
</pallas_src>

<mosaic_0001>
module attributes {stable_mosaic.version = 11 : i64} {
  func.func @_decoder_kernel(%arg0: memref<16x32xf32, #tpu.memory_space<vmem>>, %arg1: memref<16x32xf32, #tpu.memory_space<vmem>>, %arg2: memref<2x8xf32, #tpu.memory_space<vmem>>, %arg3: memref<3x32x256xbf16, #tpu.memory_space<vmem>>, %arg4: memref<2x64x32xbf16, #tpu.memory_space<vmem>>, %arg5: memref<3x1x480xf32, #tpu.memory_space<vmem>>, %arg6: memref<16x128xf32, #tpu.memory_space<vmem>>, %arg7: memref<16x128xf32, #tpu.memory_space<vmem>>, %arg8: memref<16x128xf32, #tpu.memory_space<vmem>>) attributes {dimension_semantics = [], scalar_prefetch = 0 : i64, scratch_operands = 0 : i64, tpu.core_type = #tpu.core_type<tc>} {
    %c0 = arith.constant 0 : index
    %c0_0 = arith.constant 0 : index
    %c0_1 = arith.constant 0 : index
    %0 = vector.load %arg3[%c0, %c0_0, %c0_1] : memref<3x32x256xbf16, #tpu.memory_space<vmem>>, vector<3x32x256xbf16>
    %c0_2 = arith.constant 0 : index
    %c0_3 = arith.constant 0 : index
    %c0_4 = arith.constant 0 : index
    %1 = vector.load %arg4[%c0_2, %c0_3, %c0_4] : memref<2x64x32xbf16, #tpu.memory_space<vmem>>, vector<2x64x32xbf16>
    %c0_5 = arith.constant 0 : index
    %c0_6 = arith.constant 0 : index
    %c0_7 = arith.constant 0 : index
    %2 = vector.load %arg5[%c0_5, %c0_6, %c0_7] : memref<3x1x480xf32, #tpu.memory_space<vmem>>, vector<3x1x480xf32>
    %3 = vector.extract_strided_slice %2 {offsets = [2, 0, 0], sizes = [1, 1, 32], strides = [1, 1, 1]} : vector<3x1x480xf32> to vector<1x1x32xf32>
    %4 = vector.shape_cast %3 : vector<1x1x32xf32> to vector<1x32xf32>
    %5 = vector.extract_strided_slice %2 {offsets = [2, 0, 32], sizes = [1, 1, 32], strides = [1, 1, 1]} : vector<3x1x480xf32> to vector<1x1x32xf32>
    %6 = vector.shape_cast %5 : vector<1x1x32xf32> to vector<1x32xf32>
    %c0_8 = arith.constant 0 : index
    %c0_9 = arith.constant 0 : index
    %7 = vector.load %arg0[%c0_8, %c0_9] : memref<16x32xf32, #tpu.memory_space<vmem>>, vector<16x32xf32>
    %cst = arith.constant dense<0.000000e+00> : vector<16xf32>
    %8 = vector.multi_reduction <add>, %7, %cst [1] : vector<16x32xf32> to vector<16xf32>
    %9 = vector.shape_cast %8 : vector<16xf32> to vector<16x1xf32>
    %cst_10 = arith.constant 3.200000e+01 : f32
    %10 = vector.broadcast %cst_10 : f32 to vector<16x1xf32>
    %11 = arith.divf %9, %10 : vector<16x1xf32>
    %12 = vector.broadcast %11 : vector<16x1xf32> to vector<16x32xf32>
    %13 = arith.subf %7, %12 : vector<16x32xf32>
    %14 = arith.mulf %13, %13 : vector<16x32xf32>
    %cst_11 = arith.constant dense<0.000000e+00> : vector<16xf32>
    %15 = vector.multi_reduction <add>, %14, %cst_11 [1] : vector<16x32xf32> to vector<16xf32>
    %16 = vector.shape_cast %15 : vector<16xf32> to vector<16x1xf32>
    %cst_12 = arith.constant 3.200000e+01 : f32
    %17 = vector.broadcast %cst_12 : f32 to vector<16x1xf32>
    %18 = arith.divf %16, %17 : vector<16x1xf32>
    %19 = vector.broadcast %11 : vector<16x1xf32> to vector<16x32xf32>
    %20 = arith.subf %7, %19 : vector<16x32xf32>
    %cst_13 = arith.constant 9.99999974E-6 : f32
    %21 = vector.broadcast %cst_13 : f32 to vector<16x1xf32>
    %22 = arith.addf %18, %21 : vector<16x1xf32>
    %23 = math.rsqrt %22 : vector<16x1xf32>
    %24 = vector.broadcast %23 : vector<16x1xf32> to vector<16x32xf32>
    %25 = arith.mulf %20, %24 : vector<16x32xf32>
    %26 = vector.broadcast %4 : vector<1x32xf32> to vector<16x32xf32>
    %27 = arith.mulf %25, %26 : vector<16x32xf32>
    %28 = vector.broadcast %6 : vector<1x32xf32> to vector<16x32xf32>
    %29 = arith.addf %27, %28 : vector<16x32xf32>
    %30 = tpu.iota {dimensions = array<i32: 0>} : vector<8x8xi32>
    %31 = tpu.iota {dimensions = array<i32: 1>} : vector<8x8xi32>
    %32 = arith.cmpi sle, %31, %30 : vector<8x8xi32>
    %cst_14 = arith.constant 0.000000e+00 : f32
    %cst_15 = arith.constant -1.000000e+09 : f32
    %33 = vector.broadcast %cst_14 : f32 to vector<8x8xf32>
    %34 = vector.broadcast %cst_15 : f32 to vector<8x8xf32>
    %35 = arith.select %32, %33, %34 : vector<8x8xi1>, vector<8x8xf32>
    %36 = vector.shape_cast %35 : vector<8x8xf32> to vector<1x8x8xf32>
    %c0_16 = arith.constant 0 : index
    %c0_17 = arith.constant 0 : index
    %37 = vector.load %arg2[%c0_16, %c0_17] : memref<2x8xf32, #tpu.memory_space<vmem>>, vector<2x8xf32>
    %38 = vector.shape_cast %37 : vector<2x8xf32> to vector<2x1x1x8xf32>
    %39 = vector.shape_cast %38 : vector<2x1x1x8xf32> to vector<2x1x1x8xf32>
    %40 = vector.broadcast %39 : vector<2x1x1x8xf32> to vector<2x4x1x8xf32>
    %41 = vector.shape_cast %40 : vector<2x4x1x8xf32> to vector<8x1x8xf32>
    %42 = vector.extract_strided_slice %0 {offsets = [2, 0, 0], sizes = [1, 32, 128], strides = [1, 1, 1]} : vector<3x32x256xbf16> to vector<1x32x128xbf16>
    %43 = vector.shape_cast %42 : vector<1x32x128xbf16> to vector<32x128xbf16>
    %44 = vector.extract_strided_slice %2 {offsets = [2, 0, 64], sizes = [1, 1, 128], strides = [1, 1, 1]} : vector<3x1x480xf32> to vector<1x1x128xf32>
    %45 = vector.shape_cast %44 : vector<1x1x128xf32> to vector<1x128xf32>
    %c0_18 = arith.constant 0 : index
    %c0_19 = arith.constant 0 : index
    %46 = vector.load %arg1[%c0_18, %c0_19] : memref<16x32xf32, #tpu.memory_space<vmem>>, vector<16x32xf32>
    %47 = arith.truncf %46 : vector<16x32xf32> to vector<16x32xbf16>
    %cst_20 = arith.constant dense<0.000000e+00> : vector<16x128xf32>
    %48 = tpu.matmul %47, %43, %cst_20 {dimension_numbers = #tpu.dot_dimension_numbers<[1], [0], [0], [1], [0, 0, 1, 1], [], []>} : vector<16x32xbf16>, vector<32x128xbf16>, vector<16x128xf32> -> vector<16x128xf32>
    %49 = vector.broadcast %45 : vector<1x128xf32> to vector<16x128xf32>
    %50 = arith.addf %48, %49 : vector<16x128xf32>
    %c0_21 = arith.constant 0 : index
    %c0_22 = arith.constant 0 : index
    %51 = vector.load %arg8[%c0_21, %c0_22] : memref<16x128xf32, #tpu.memory_space<vmem>>, vector<16x128xf32>
    tpu.vector_store %arg8[%c0_21, %c0_22], %50 {strides = array<i32>} : memref<16x128xf32, #tpu.memory_space<vmem>>, vector<16x128xf32>,
    %52 = vector.extract_strided_slice %0 {offsets = [0, 0, 0], sizes = [1, 32, 96], strides = [1, 1, 1]} : vector<3x32x256xbf16> to vector<1x32x96xbf16>
    %53 = vector.shape_cast %52 : vector<1x32x96xbf16> to vector<32x96xbf16>
    %54 = vector.extract_strided_slice %2 {offsets = [0, 0, 0], sizes = [1, 1, 96], strides = [1, 1, 1]} : vector<3x1x480xf32> to vector<1x1x96xf32>
    %55 = vector.shape_cast %54 : vector<1x1x96xf32> to vector<1x96xf32>
    %56 = arith.truncf %29 : vector<16x32xf32> to vector<16x32xbf16>
    %cst_23 = arith.constant dense<0.000000e+00> : vector<16x96xf32>
    %57 = tpu.matmul %56, %53, %cst_23 {dimension_numbers = #tpu.dot_dimension_numbers<[1], [0], [0], [1], [0, 0, 1, 1], [], []>} : vector<16x32xbf16>, vector<32x96xbf16>, vector<16x96xf32> -> vector<16x96xf32>
    %58 = vector.broadcast %55 : vector<1x96xf32> to vector<16x96xf32>
    %59 = arith.addf %57, %58 : vector<16x96xf32>
    %60 = vector.extract_strided_slice %59 {offsets = [0, 32], sizes = [16, 64], strides = [1, 1]} : vector<16x96xf32> to vector<16x64xf32>
    %61 = vector.extract_strided_slice %59 {offsets = [0, 0], sizes = [16, 32], strides = [1, 1]} : vector<16x96xf32> to vector<16x32xf32>
    %62 = vector.extract_strided_slice %59 {offsets = [0, 32], sizes = [16, 32], strides = [1, 1]} : vector<16x96xf32> to vector<16x32xf32>
    %63 = vector.extract_strided_slice %59 {offsets = [0, 64], sizes = [16, 32], strides = [1, 1]} : vector<16x96xf32> to vector<16x32xf32>
    %64 = vector.shape_cast %61 : vector<16x32xf32> to vector<2x8x4x8xf32>
    %65 = tpu.transpose %64, [0, 2, 1, 3] : vector<2x8x4x8xf32> -> vector<2x4x8x8xf32>
    %66 = vector.shape_cast %65 : vector<2x4x8x8xf32> to vector<8x8x8xf32>
    %67 = arith.truncf %66 : vector<8x8x8xf32> to vector<8x8x8xbf16>
    %68 = vector.shape_cast %62 : vector<16x32xf32> to vector<2x8x4x8xf32>
    %69 = tpu.transpose %68, [0, 2, 1, 3] : vector<2x8x4x8xf32> -> vector<2x4x8x8xf32>
    %70 = vector.shape_cast %69 : vector<2x4x8x8xf32> to vector<8x8x8xf32>
    %71 = arith.truncf %70 : vector<8x8x8xf32> to vector<8x8x8xbf16>
    %72 = vector.shape_cast %63 : vector<16x32xf32> to vector<2x8x4x8xf32>
    %73 = tpu.transpose %72, [0, 2, 1, 3] : vector<2x8x4x8xf32> -> vector<2x4x8x8xf32>
    %74 = vector.shape_cast %73 : vector<2x4x8x8xf32> to vector<8x8x8xf32>
    %75 = arith.truncf %74 : vector<8x8x8xf32> to vector<8x8x8xbf16>
    "tpu.trace_start"() <{level = 10 : i32, message = "bqd,bkd->bqk"}> : () -> ()
    %cst_24 = arith.constant dense<0.000000e+00> : vector<8x8x8xf32>
    %76 = tpu.matmul %67, %71, %cst_24 {dimension_numbers = #tpu.dot_dimension_numbers<[2], [2], [1], [1], [0, 0, 0, 1, 1, 1], [0], [0]>} : vector<8x8x8xbf16>, vector<8x8x8xbf16>, vector<8x8x8xf32> -> vector<8x8x8xf32>
    "tpu.trace_stop"() : () -> ()
    %77 = vector.broadcast %36 : vector<1x8x8xf32> to vector<8x8x8xf32>
    %78 = arith.addf %76, %77 : vector<8x8x8xf32>
    %cst_25 = arith.constant dense<0xFF800000> : vector<8x8xf32>
    %79 = vector.multi_reduction <maximumf>, %78, %cst_25 [2] : vector<8x8x8xf32> to vector<8x8xf32>
    %80 = vector.shape_cast %79 : vector<8x8xf32> to vector<8x8x1xf32>
    %81 = vector.broadcast %80 : vector<8x8x1xf32> to vector<8x8x8xf32>
    %82 = arith.subf %78, %81 : vector<8x8x8xf32>
    %83 = math.exp %82 : vector<8x8x8xf32>
    %cst_26 = arith.constant dense<0.000000e+00> : vector<8x8xf32>
    %84 = vector.multi_reduction <add>, %83, %cst_26 [2] : vector<8x8x8xf32> to vector<8x8xf32>
    %85 = vector.shape_cast %84 : vector<8x8xf32> to vector<8x8x1xf32>
    %86 = tpu.reciprocal %85 {approx = true} : vector<8x8x1xf32> -> vector<8x8x1xf32>
    %87 = vector.broadcast %86 : vector<8x8x1xf32> to vector<8x8x8xf32>
    %88 = arith.mulf %83, %87 : vector<8x8x8xf32>
    %89 = arith.truncf %88 : vector<8x8x8xf32> to vector<8x8x8xbf16>
    "tpu.trace_start"() <{level = 10 : i32, message = "bqk,bkd->bqd"}> : () -> ()
    %cst_27 = arith.constant dense<0.000000e+00> : vector<8x8x8xf32>
    %90 = tpu.matmul %89, %75, %cst_27 {dimension_numbers = #tpu.dot_dimension_numbers<[2], [1], [1], [2], [0, 0, 0, 1, 1, 2], [0], [0]>} : vector<8x8x8xbf16>, vector<8x8x8xbf16>, vector<8x8x8xf32> -> vector<8x8x8xf32>
    "tpu.trace_stop"() : () -> ()
    %91 = vector.shape_cast %90 : vector<8x8x8xf32> to vector<2x4x8x8xf32>
    %92 = tpu.transpose %91, [0, 2, 1, 3] : vector<2x4x8x8xf32> -> vector<2x8x4x8xf32>
    %93 = vector.shape_cast %92 : vector<2x8x4x8xf32> to vector<16x32xf32>
    %94 = vector.extract_strided_slice %0 {offsets = [0, 0, 96], sizes = [1, 32, 32], strides = [1, 1, 1]} : vector<3x32x256xbf16> to vector<1x32x32xbf16>
    %95 = vector.shape_cast %94 : vector<1x32x32xbf16> to vector<32x32xbf16>
    %96 = vector.extract_strided_slice %2 {offsets = [0, 0, 96], sizes = [1, 1, 32], strides = [1, 1, 1]} : vector<3x1x480xf32> to vector<1x1x32xf32>
    %97 = vector.shape_cast %96 : vector<1x1x32xf32> to vector<1x32xf32>
    %98 = arith.truncf %93 : vector<16x32xf32> to vector<16x32xbf16>
    %cst_28 = arith.constant dense<0.000000e+00> : vector<16x32xf32>
    %99 = tpu.matmul %98, %95, %cst_28 {dimension_numbers = #tpu.dot_dimension_numbers<[1], [0], [0], [1], [0, 0, 1, 1], [], []>} : vector<16x32xbf16>, vector<32x32xbf16>, vector<16x32xf32> -> vector<16x32xf32>
    %100 = vector.broadcast %97 : vector<1x32xf32> to vector<16x32xf32>
    %101 = arith.addf %99, %100 : vector<16x32xf32>
    %102 = arith.addf %29, %101 : vector<16x32xf32>
    %103 = vector.extract_strided_slice %2 {offsets = [0, 0, 128], sizes = [1, 1, 32], strides = [1, 1, 1]} : vector<3x1x480xf32> to vector<1x1x32xf32>
    %104 = vector.shape_cast %103 : vector<1x1x32xf32> to vector<1x32xf32>
    %105 = vector.extract_strided_slice %2 {offsets = [0, 0, 160], sizes = [1, 1, 32], strides = [1, 1, 1]} : vector<3x1x480xf32> to vector<1x1x32xf32>
    %106 = vector.shape_cast %105 : vector<1x1x32xf32> to vector<1x32xf32>
    %cst_29 = arith.constant dense<0.000000e+00> : vector<16xf32>
    %107 = vector.multi_reduction <add>, %102, %cst_29 [1] : vector<16x32xf32> to vector<16xf32>
    %108 = vector.shape_cast %107 : vector<16xf32> to vector<16x1xf32>
    %cst_30 = arith.constant 3.200000e+01 : f32
    %109 = vector.broadcast %cst_30 : f32 to vector<16x1xf32>
    %110 = arith.divf %108, %109 : vector<16x1xf32>
    %111 = vector.broadcast %110 : vector<16x1xf32> to vector<16x32xf32>
    %112 = arith.subf %102, %111 : vector<16x32xf32>
    %113 = arith.mulf %112, %112 : vector<16x32xf32>
    %cst_31 = arith.constant dense<0.000000e+00> : vector<16xf32>
    %114 = vector.multi_reduction <add>, %113, %cst_31 [1] : vector<16x32xf32> to vector<16xf32>
    %115 = vector.shape_cast %114 : vector<16xf32> to vector<16x1xf32>
    %cst_32 = arith.constant 3.200000e+01 : f32
    %116 = vector.broadcast %cst_32 : f32 to vector<16x1xf32>
    %117 = arith.divf %115, %116 : vector<16x1xf32>
    %118 = vector.broadcast %110 : vector<16x1xf32> to vector<16x32xf32>
    %119 = arith.subf %102, %118 : vector<16x32xf32>
    %cst_33 = arith.constant 9.99999974E-6 : f32
    %120 = vector.broadcast %cst_33 : f32 to vector<16x1xf32>
    %121 = arith.addf %117, %120 : vector<16x1xf32>
    %122 = math.rsqrt %121 : vector<16x1xf32>
    %123 = vector.broadcast %122 : vector<16x1xf32> to vector<16x32xf32>
    %124 = arith.mulf %119, %123 : vector<16x32xf32>
    %125 = vector.broadcast %104 : vector<1x32xf32> to vector<16x32xf32>
    %126 = arith.mulf %124, %125 : vector<16x32xf32>
    %127 = vector.broadcast %106 : vector<1x32xf32> to vector<16x32xf32>
    %128 = arith.addf %126, %127 : vector<16x32xf32>
    %129 = vector.extract_strided_slice %0 {offsets = [0, 0, 128], sizes = [1, 32, 32], strides = [1, 1, 1]} : vector<3x32x256xbf16> to vector<1x32x32xbf16>
    %130 = vector.shape_cast %129 : vector<1x32x32xbf16> to vector<32x32xbf16>
    %131 = vector.extract_strided_slice %2 {offsets = [0, 0, 192], sizes = [1, 1, 32], strides = [1, 1, 1]} : vector<3x1x480xf32> to vector<1x1x32xf32>
    %132 = vector.shape_cast %131 : vector<1x1x32xf32> to vector<1x32xf32>
    %133 = arith.truncf %128 : vector<16x32xf32> to vector<16x32xbf16>
    %cst_34 = arith.constant dense<0.000000e+00> : vector<16x32xf32>
    %134 = tpu.matmul %133, %130, %cst_34 {dimension_numbers = #tpu.dot_dimension_numbers<[1], [0], [0], [1], [0, 0, 1, 1], [], []>} : vector<16x32xbf16>, vector<32x32xbf16>, vector<16x32xf32> -> vector<16x32xf32>
    %135 = vector.broadcast %132 : vector<1x32xf32> to vector<16x32xf32>
    %136 = arith.addf %134, %135 : vector<16x32xf32>
    %137 = vector.extract_strided_slice %50 {offsets = [0, 0], sizes = [16, 32], strides = [1, 1]} : vector<16x128xf32> to vector<16x32xf32>
    %138 = vector.extract_strided_slice %50 {offsets = [0, 32], sizes = [16, 32], strides = [1, 1]} : vector<16x128xf32> to vector<16x32xf32>
    %139 = vector.shape_cast %136 : vector<16x32xf32> to vector<2x8x4x8xf32>
    %140 = tpu.transpose %139, [0, 2, 1, 3] : vector<2x8x4x8xf32> -> vector<2x4x8x8xf32>
    %141 = vector.shape_cast %140 : vector<2x4x8x8xf32> to vector<8x8x8xf32>
    %142 = arith.truncf %141 : vector<8x8x8xf32> to vector<8x8x8xbf16>
    %143 = vector.shape_cast %137 : vector<16x32xf32> to vector<2x8x4x8xf32>
    %144 = tpu.transpose %143, [0, 2, 1, 3] : vector<2x8x4x8xf32> -> vector<2x4x8x8xf32>
    %145 = vector.shape_cast %144 : vector<2x4x8x8xf32> to vector<8x8x8xf32>
    %146 = arith.truncf %145 : vector<8x8x8xf32> to vector<8x8x8xbf16>
    %147 = vector.shape_cast %138 : vector<16x32xf32> to vector<2x8x4x8xf32>
    %148 = tpu.transpose %147, [0, 2, 1, 3] : vector<2x8x4x8xf32> -> vector<2x4x8x8xf32>
    %149 = vector.shape_cast %148 : vector<2x4x8x8xf32> to vector<8x8x8xf32>
    %150 = arith.truncf %149 : vector<8x8x8xf32> to vector<8x8x8xbf16>
    "tpu.trace_start"() <{level = 10 : i32, message = "bqd,bkd->bqk"}> : () -> ()
    %cst_35 = arith.constant dense<0.000000e+00> : vector<8x8x8xf32>
    %151 = tpu.matmul %142, %146, %cst_35 {dimension_numbers = #tpu.dot_dimension_numbers<[2], [2], [1], [1], [0, 0, 0, 1, 1, 1], [0], [0]>} : vector<8x8x8xbf16>, vector<8x8x8xbf16>, vector<8x8x8xf32> -> vector<8x8x8xf32>
    "tpu.trace_stop"() : () -> ()
    %152 = vector.broadcast %41 : vector<8x1x8xf32> to vector<8x8x8xf32>
    %153 = arith.addf %151, %152 : vector<8x8x8xf32>
    %cst_36 = arith.constant dense<0xFF800000> : vector<8x8xf32>
    %154 = vector.multi_reduction <maximumf>, %153, %cst_36 [2] : vector<8x8x8xf32> to vector<8x8xf32>
    %155 = vector.shape_cast %154 : vector<8x8xf32> to vector<8x8x1xf32>
    %156 = vector.broadcast %155 : vector<8x8x1xf32> to vector<8x8x8xf32>
    %157 = arith.subf %153, %156 : vector<8x8x8xf32>
    %158 = math.exp %157 : vector<8x8x8xf32>
    %cst_37 = arith.constant dense<0.000000e+00> : vector<8x8xf32>
    %159 = vector.multi_reduction <add>, %158, %cst_37 [2] : vector<8x8x8xf32> to vector<8x8xf32>
    %160 = vector.shape_cast %159 : vector<8x8xf32> to vector<8x8x1xf32>
    %161 = tpu.reciprocal %160 {approx = true} : vector<8x8x1xf32> -> vector<8x8x1xf32>
    %162 = vector.broadcast %161 : vector<8x8x1xf32> to vector<8x8x8xf32>
    %163 = arith.mulf %158, %162 : vector<8x8x8xf32>
    %164 = arith.truncf %163 : vector<8x8x8xf32> to vector<8x8x8xbf16>
    "tpu.trace_start"() <{level = 10 : i32, message = "bqk,bkd->bqd"}> : () -> ()
    %cst_38 = arith.constant dense<0.000000e+00> : vector<8x8x8xf32>
    %165 = tpu.matmul %164, %150, %cst_38 {dimension_numbers = #tpu.dot_dimension_numbers<[2], [1], [1], [2], [0, 0, 0, 1, 1, 2], [0], [0]>} : vector<8x8x8xbf16>, vector<8x8x8xbf16>, vector<8x8x8xf32> -> vector<8x8x8xf32>
    "tpu.trace_stop"() : () -> ()
    %166 = vector.shape_cast %165 : vector<8x8x8xf32> to vector<2x4x8x8xf32>
    %167 = tpu.transpose %166, [0, 2, 1, 3] : vector<2x4x8x8xf32> -> vector<2x8x4x8xf32>
    %168 = vector.shape_cast %167 : vector<2x8x4x8xf32> to vector<16x32xf32>
    %169 = vector.extract_strided_slice %0 {offsets = [0, 0, 160], sizes = [1, 32, 32], strides = [1, 1, 1]} : vector<3x32x256xbf16> to vector<1x32x32xbf16>
    %170 = vector.shape_cast %169 : vector<1x32x32xbf16> to vector<32x32xbf16>
    %171 = vector.extract_strided_slice %2 {offsets = [0, 0, 224], sizes = [1, 1, 32], strides = [1, 1, 1]} : vector<3x1x480xf32> to vector<1x1x32xf32>
    %172 = vector.shape_cast %171 : vector<1x1x32xf32> to vector<1x32xf32>
    %173 = arith.truncf %168 : vector<16x32xf32> to vector<16x32xbf16>
    %cst_39 = arith.constant dense<0.000000e+00> : vector<16x32xf32>
    %174 = tpu.matmul %173, %170, %cst_39 {dimension_numbers = #tpu.dot_dimension_numbers<[1], [0], [0], [1], [0, 0, 1, 1], [], []>} : vector<16x32xbf16>, vector<32x32xbf16>, vector<16x32xf32> -> vector<16x32xf32>
    %175 = vector.broadcast %172 : vector<1x32xf32> to vector<16x32xf32>
    %176 = arith.addf %174, %175 : vector<16x32xf32>
    %177 = arith.addf %128, %176 : vector<16x32xf32>
    %178 = vector.extract_strided_slice %2 {offsets = [0, 0, 256], sizes = [1, 1, 32], strides = [1, 1, 1]} : vector<3x1x480xf32> to vector<1x1x32xf32>
    %179 = vector.shape_cast %178 : vector<1x1x32xf32> to vector<1x32xf32>
    %180 = vector.extract_strided_slice %2 {offsets = [0, 0, 288], sizes = [1, 1, 32], strides = [1, 1, 1]} : vector<3x1x480xf32> to vector<1x1x32xf32>
    %181 = vector.shape_cast %180 : vector<1x1x32xf32> to vector<1x32xf32>
    %cst_40 = arith.constant dense<0.000000e+00> : vector<16xf32>
    %182 = vector.multi_reduction <add>, %177, %cst_40 [1] : vector<16x32xf32> to vector<16xf32>
    %183 = vector.shape_cast %182 : vector<16xf32> to vector<16x1xf32>
    %cst_41 = arith.constant 3.200000e+01 : f32
    %184 = vector.broadcast %cst_41 : f32 to vector<16x1xf32>
    %185 = arith.divf %183, %184 : vector<16x1xf32>
    %186 = vector.broadcast %185 : vector<16x1xf32> to vector<16x32xf32>
    %187 = arith.subf %177, %186 : vector<16x32xf32>
    %188 = arith.mulf %187, %187 : vector<16x32xf32>
    %cst_42 = arith.constant dense<0.000000e+00> : vector<16xf32>
    %189 = vector.multi_reduction <add>, %188, %cst_42 [1] : vector<16x32xf32> to vector<16xf32>
    %190 = vector.shape_cast %189 : vector<16xf32> to vector<16x1xf32>
    %cst_43 = arith.constant 3.200000e+01 : f32
    %191 = vector.broadcast %cst_43 : f32 to vector<16x1xf32>
    %192 = arith.divf %190, %191 : vector<16x1xf32>
    %193 = vector.broadcast %185 : vector<16x1xf32> to vector<16x32xf32>
    %194 = arith.subf %177, %193 : vector<16x32xf32>
    %cst_44 = arith.constant 9.99999974E-6 : f32
    %195 = vector.broadcast %cst_44 : f32 to vector<16x1xf32>
    %196 = arith.addf %192, %195 : vector<16x1xf32>
    %197 = math.rsqrt %196 : vector<16x1xf32>
    %198 = vector.broadcast %197 : vector<16x1xf32> to vector<16x32xf32>
    %199 = arith.mulf %194, %198 : vector<16x32xf32>
    %200 = vector.broadcast %179 : vector<1x32xf32> to vector<16x32xf32>
    %201 = arith.mulf %199, %200 : vector<16x32xf32>
    %202 = vector.broadcast %181 : vector<1x32xf32> to vector<16x32xf32>
    %203 = arith.addf %201, %202 : vector<16x32xf32>
    %204 = vector.extract_strided_slice %0 {offsets = [0, 0, 192], sizes = [1, 32, 64], strides = [1, 1, 1]} : vector<3x32x256xbf16> to vector<1x32x64xbf16>
    %205 = vector.shape_cast %204 : vector<1x32x64xbf16> to vector<32x64xbf16>
    %206 = vector.extract_strided_slice %2 {offsets = [0, 0, 320], sizes = [1, 1, 64], strides = [1, 1, 1]} : vector<3x1x480xf32> to vector<1x1x64xf32>
    %207 = vector.shape_cast %206 : vector<1x1x64xf32> to vector<1x64xf32>
    %208 = arith.truncf %203 : vector<16x32xf32> to vector<16x32xbf16>
    %cst_45 = arith.constant dense<0.000000e+00> : vector<16x64xf32>
    %209 = tpu.matmul %208, %205, %cst_45 {dimension_numbers = #tpu.dot_dimension_numbers<[1], [0], [0], [1], [0, 0, 1, 1], [], []>} : vector<16x32xbf16>, vector<32x64xbf16>, vector<16x64xf32> -> vector<16x64xf32>
    %210 = vector.broadcast %207 : vector<1x64xf32> to vector<16x64xf32>
    %211 = arith.addf %209, %210 : vector<16x64xf32>
    %212 = arith.mulf %211, %211 : vector<16x64xf32>
    %213 = arith.mulf %211, %212 : vector<16x64xf32>
    %cst_46 = arith.constant 4.471500e-02 : f32
    %214 = vector.broadcast %cst_46 : f32 to vector<16x64xf32>
    %215 = arith.mulf %214, %213 : vector<16x64xf32>
    %216 = arith.addf %211, %215 : vector<16x64xf32>
    %cst_47 = arith.constant 0.797884583 : f32
    %217 = vector.broadcast %cst_47 : f32 to vector<16x64xf32>
    %218 = arith.mulf %217, %216 : vector<16x64xf32>
    %219 = math.tanh %218 : vector<16x64xf32>
    %cst_48 = arith.constant 1.000000e+00 : f32
    %220 = vector.broadcast %cst_48 : f32 to vector<16x64xf32>
    %221 = arith.addf %220, %219 : vector<16x64xf32>
    %cst_49 = arith.constant 5.000000e-01 : f32
    %222 = vector.broadcast %cst_49 : f32 to vector<16x64xf32>
    %223 = arith.mulf %222, %221 : vector<16x64xf32>
    %224 = arith.mulf %211, %223 : vector<16x64xf32>
    %225 = vector.extract_strided_slice %1 {offsets = [0, 0, 0], sizes = [1, 64, 32], strides = [1, 1, 1]} : vector<2x64x32xbf16> to vector<1x64x32xbf16>
    %226 = vector.shape_cast %225 : vector<1x64x32xbf16> to vector<64x32xbf16>
    %227 = vector.extract_strided_slice %2 {offsets = [0, 0, 384], sizes = [1, 1, 32], strides = [1, 1, 1]} : vector<3x1x480xf32> to vector<1x1x32xf32>
    %228 = vector.shape_cast %227 : vector<1x1x32xf32> to vector<1x32xf32>
    %229 = arith.truncf %224 : vector<16x64xf32> to vector<16x64xbf16>
    %cst_50 = arith.constant dense<0.000000e+00> : vector<16x32xf32>
    %230 = tpu.matmul %229, %226, %cst_50 {dimension_numbers = #tpu.dot_dimension_numbers<[1], [0], [0], [1], [0, 0, 1, 1], [], []>} : vector<16x64xbf16>, vector<64x32xbf16>, vector<16x32xf32> -> vector<16x32xf32>
    %231 = vector.broadcast %228 : vector<1x32xf32> to vector<16x32xf32>
    %232 = arith.addf %230, %231 : vector<16x32xf32>
    %233 = arith.addf %203, %232 : vector<16x32xf32>
    %234 = vector.extract_strided_slice %2 {offsets = [0, 0, 416], sizes = [1, 1, 32], strides = [1, 1, 1]} : vector<3x1x480xf32> to vector<1x1x32xf32>
    %235 = vector.shape_cast %234 : vector<1x1x32xf32> to vector<1x32xf32>
    %236 = vector.extract_strided_slice %2 {offsets = [0, 0, 448], sizes = [1, 1, 32], strides = [1, 1, 1]} : vector<3x1x480xf32> to vector<1x1x32xf32>
    %237 = vector.shape_cast %236 : vector<1x1x32xf32> to vector<1x32xf32>
    %cst_51 = arith.constant dense<0.000000e+00> : vector<16xf32>
    %238 = vector.multi_reduction <add>, %233, %cst_51 [1] : vector<16x32xf32> to vector<16xf32>
    %239 = vector.shape_cast %238 : vector<16xf32> to vector<16x1xf32>
    %cst_52 = arith.constant 3.200000e+01 : f32
    %240 = vector.broadcast %cst_52 : f32 to vector<16x1xf32>
    %241 = arith.divf %239, %240 : vector<16x1xf32>
    %242 = vector.broadcast %241 : vector<16x1xf32> to vector<16x32xf32>
    %243 = arith.subf %233, %242 : vector<16x32xf32>
    %244 = arith.mulf %243, %243 : vector<16x32xf32>
    %cst_53 = arith.constant dense<0.000000e+00> : vector<16xf32>
    %245 = vector.multi_reduction <add>, %244, %cst_53 [1] : vector<16x32xf32> to vector<16xf32>
    %246 = vector.shape_cast %245 : vector<16xf32> to vector<16x1xf32>
    %cst_54 = arith.constant 3.200000e+01 : f32
    %247 = vector.broadcast %cst_54 : f32 to vector<16x1xf32>
    %248 = arith.divf %246, %247 : vector<16x1xf32>
    %249 = vector.broadcast %241 : vector<16x1xf32> to vector<16x32xf32>
    %250 = arith.subf %233, %249 : vector<16x32xf32>
    %cst_55 = arith.constant 9.99999974E-6 : f32
    %251 = vector.broadcast %cst_55 : f32 to vector<16x1xf32>
    %252 = arith.addf %248, %251 : vector<16x1xf32>
    %253 = math.rsqrt %252 : vector<16x1xf32>
    %254 = vector.broadcast %253 : vector<16x1xf32> to vector<16x32xf32>
    %255 = arith.mulf %250, %254 : vector<16x32xf32>
    %256 = vector.broadcast %235 : vector<1x32xf32> to vector<16x32xf32>
    %257 = arith.mulf %255, %256 : vector<16x32xf32>
    %258 = vector.broadcast %237 : vector<1x32xf32> to vector<16x32xf32>
    %259 = arith.addf %257, %258 : vector<16x32xf32>
    %260 = vector.extract_strided_slice %0 {offsets = [1, 0, 0], sizes = [1, 32, 96], strides = [1, 1, 1]} : vector<3x32x256xbf16> to vector<1x32x96xbf16>
    %261 = vector.shape_cast %260 : vector<1x32x96xbf16> to vector<32x96xbf16>
    %262 = vector.extract_strided_slice %2 {offsets = [1, 0, 0], sizes = [1, 1, 96], strides = [1, 1, 1]} : vector<3x1x480xf32> to vector<1x1x96xf32>
    %263 = vector.shape_cast %262 : vector<1x1x96xf32> to vector<1x96xf32>
    %264 = arith.truncf %259 : vector<16x32xf32> to vector<16x32xbf16>
    %cst_56 = arith.constant dense<0.000000e+00> : vector<16x96xf32>
    %265 = tpu.matmul %264, %261, %cst_56 {dimension_numbers = #tpu.dot_dimension_numbers<[1], [0], [0], [1], [0, 0, 1, 1], [], []>} : vector<16x32xbf16>, vector<32x96xbf16>, vector<16x96xf32> -> vector<16x96xf32>
    %266 = vector.broadcast %263 : vector<1x96xf32> to vector<16x96xf32>
    %267 = arith.addf %265, %266 : vector<16x96xf32>
    %268 = vector.extract_strided_slice %267 {offsets = [0, 32], sizes = [16, 64], strides = [1, 1]} : vector<16x96xf32> to vector<16x64xf32>
    %269 = vector.extract_strided_slice %267 {offsets = [0, 0], sizes = [16, 32], strides = [1, 1]} : vector<16x96xf32> to vector<16x32xf32>
    %270 = vector.extract_strided_slice %267 {offsets = [0, 32], sizes = [16, 32], strides = [1, 1]} : vector<16x96xf32> to vector<16x32xf32>
    %271 = vector.extract_strided_slice %267 {offsets = [0, 64], sizes = [16, 32], strides = [1, 1]} : vector<16x96xf32> to vector<16x32xf32>
    %272 = vector.shape_cast %269 : vector<16x32xf32> to vector<2x8x4x8xf32>
    %273 = tpu.transpose %272, [0, 2, 1, 3] : vector<2x8x4x8xf32> -> vector<2x4x8x8xf32>
    %274 = vector.shape_cast %273 : vector<2x4x8x8xf32> to vector<8x8x8xf32>
    %275 = arith.truncf %274 : vector<8x8x8xf32> to vector<8x8x8xbf16>
    %276 = vector.shape_cast %270 : vector<16x32xf32> to vector<2x8x4x8xf32>
    %277 = tpu.transpose %276, [0, 2, 1, 3] : vector<2x8x4x8xf32> -> vector<2x4x8x8xf32>
    %278 = vector.shape_cast %277 : vector<2x4x8x8xf32> to vector<8x8x8xf32>
    %279 = arith.truncf %278 : vector<8x8x8xf32> to vector<8x8x8xbf16>
    %280 = vector.shape_cast %271 : vector<16x32xf32> to vector<2x8x4x8xf32>
    %281 = tpu.transpose %280, [0, 2, 1, 3] : vector<2x8x4x8xf32> -> vector<2x4x8x8xf32>
    %282 = vector.shape_cast %281 : vector<2x4x8x8xf32> to vector<8x8x8xf32>
    %283 = arith.truncf %282 : vector<8x8x8xf32> to vector<8x8x8xbf16>
    "tpu.trace_start"() <{level = 10 : i32, message = "bqd,bkd->bqk"}> : () -> ()
    %cst_57 = arith.constant dense<0.000000e+00> : vector<8x8x8xf32>
    %284 = tpu.matmul %275, %279, %cst_57 {dimension_numbers = #tpu.dot_dimension_numbers<[2], [2], [1], [1], [0, 0, 0, 1, 1, 1], [0], [0]>} : vector<8x8x8xbf16>, vector<8x8x8xbf16>, vector<8x8x8xf32> -> vector<8x8x8xf32>
    "tpu.trace_stop"() : () -> ()
    %285 = vector.broadcast %36 : vector<1x8x8xf32> to vector<8x8x8xf32>
    %286 = arith.addf %284, %285 : vector<8x8x8xf32>
    %cst_58 = arith.constant dense<0xFF800000> : vector<8x8xf32>
    %287 = vector.multi_reduction <maximumf>, %286, %cst_58 [2] : vector<8x8x8xf32> to vector<8x8xf32>
    %288 = vector.shape_cast %287 : vector<8x8xf32> to vector<8x8x1xf32>
    %289 = vector.broadcast %288 : vector<8x8x1xf32> to vector<8x8x8xf32>
    %290 = arith.subf %286, %289 : vector<8x8x8xf32>
    %291 = math.exp %290 : vector<8x8x8xf32>
    %cst_59 = arith.constant dense<0.000000e+00> : vector<8x8xf32>
    %292 = vector.multi_reduction <add>, %291, %cst_59 [2] : vector<8x8x8xf32> to vector<8x8xf32>
    %293 = vector.shape_cast %292 : vector<8x8xf32> to vector<8x8x1xf32>
    %294 = tpu.reciprocal %293 {approx = true} : vector<8x8x1xf32> -> vector<8x8x1xf32>
    %295 = vector.broadcast %294 : vector<8x8x1xf32> to vector<8x8x8xf32>
    %296 = arith.mulf %291, %295 : vector<8x8x8xf32>
    %297 = arith.truncf %296 : vector<8x8x8xf32> to vector<8x8x8xbf16>
    "tpu.trace_start"() <{level = 10 : i32, message = "bqk,bkd->bqd"}> : () -> ()
    %cst_60 = arith.constant dense<0.000000e+00> : vector<8x8x8xf32>
    %298 = tpu.matmul %297, %283, %cst_60 {dimension_numbers = #tpu.dot_dimension_numbers<[2], [1], [1], [2], [0, 0, 0, 1, 1, 2], [0], [0]>} : vector<8x8x8xbf16>, vector<8x8x8xbf16>, vector<8x8x8xf32> -> vector<8x8x8xf32>
    "tpu.trace_stop"() : () -> ()
    %299 = vector.shape_cast %298 : vector<8x8x8xf32> to vector<2x4x8x8xf32>
    %300 = tpu.transpose %299, [0, 2, 1, 3] : vector<2x4x8x8xf32> -> vector<2x8x4x8xf32>
    %301 = vector.shape_cast %300 : vector<2x8x4x8xf32> to vector<16x32xf32>
    %302 = vector.extract_strided_slice %0 {offsets = [1, 0, 96], sizes = [1, 32, 32], strides = [1, 1, 1]} : vector<3x32x256xbf16> to vector<1x32x32xbf16>
    %303 = vector.shape_cast %302 : vector<1x32x32xbf16> to vector<32x32xbf16>
    %304 = vector.extract_strided_slice %2 {offsets = [1, 0, 96], sizes = [1, 1, 32], strides = [1, 1, 1]} : vector<3x1x480xf32> to vector<1x1x32xf32>
    %305 = vector.shape_cast %304 : vector<1x1x32xf32> to vector<1x32xf32>
    %306 = arith.truncf %301 : vector<16x32xf32> to vector<16x32xbf16>
    %cst_61 = arith.constant dense<0.000000e+00> : vector<16x32xf32>
    %307 = tpu.matmul %306, %303, %cst_61 {dimension_numbers = #tpu.dot_dimension_numbers<[1], [0], [0], [1], [0, 0, 1, 1], [], []>} : vector<16x32xbf16>, vector<32x32xbf16>, vector<16x32xf32> -> vector<16x32xf32>
    %308 = vector.broadcast %305 : vector<1x32xf32> to vector<16x32xf32>
    %309 = arith.addf %307, %308 : vector<16x32xf32>
    %310 = arith.addf %259, %309 : vector<16x32xf32>
    %311 = vector.extract_strided_slice %2 {offsets = [1, 0, 128], sizes = [1, 1, 32], strides = [1, 1, 1]} : vector<3x1x480xf32> to vector<1x1x32xf32>
    %312 = vector.shape_cast %311 : vector<1x1x32xf32> to vector<1x32xf32>
    %313 = vector.extract_strided_slice %2 {offsets = [1, 0, 160], sizes = [1, 1, 32], strides = [1, 1, 1]} : vector<3x1x480xf32> to vector<1x1x32xf32>
    %314 = vector.shape_cast %313 : vector<1x1x32xf32> to vector<1x32xf32>
    %cst_62 = arith.constant dense<0.000000e+00> : vector<16xf32>
    %315 = vector.multi_reduction <add>, %310, %cst_62 [1] : vector<16x32xf32> to vector<16xf32>
    %316 = vector.shape_cast %315 : vector<16xf32> to vector<16x1xf32>
    %cst_63 = arith.constant 3.200000e+01 : f32
    %317 = vector.broadcast %cst_63 : f32 to vector<16x1xf32>
    %318 = arith.divf %316, %317 : vector<16x1xf32>
    %319 = vector.broadcast %318 : vector<16x1xf32> to vector<16x32xf32>
    %320 = arith.subf %310, %319 : vector<16x32xf32>
    %321 = arith.mulf %320, %320 : vector<16x32xf32>
    %cst_64 = arith.constant dense<0.000000e+00> : vector<16xf32>
    %322 = vector.multi_reduction <add>, %321, %cst_64 [1] : vector<16x32xf32> to vector<16xf32>
    %323 = vector.shape_cast %322 : vector<16xf32> to vector<16x1xf32>
    %cst_65 = arith.constant 3.200000e+01 : f32
    %324 = vector.broadcast %cst_65 : f32 to vector<16x1xf32>
    %325 = arith.divf %323, %324 : vector<16x1xf32>
    %326 = vector.broadcast %318 : vector<16x1xf32> to vector<16x32xf32>
    %327 = arith.subf %310, %326 : vector<16x32xf32>
    %cst_66 = arith.constant 9.99999974E-6 : f32
    %328 = vector.broadcast %cst_66 : f32 to vector<16x1xf32>
    %329 = arith.addf %325, %328 : vector<16x1xf32>
    %330 = math.rsqrt %329 : vector<16x1xf32>
    %331 = vector.broadcast %330 : vector<16x1xf32> to vector<16x32xf32>
    %332 = arith.mulf %327, %331 : vector<16x32xf32>
    %333 = vector.broadcast %312 : vector<1x32xf32> to vector<16x32xf32>
    %334 = arith.mulf %332, %333 : vector<16x32xf32>
    %335 = vector.broadcast %314 : vector<1x32xf32> to vector<16x32xf32>
    %336 = arith.addf %334, %335 : vector<16x32xf32>
    %337 = vector.extract_strided_slice %0 {offsets = [1, 0, 128], sizes = [1, 32, 32], strides = [1, 1, 1]} : vector<3x32x256xbf16> to vector<1x32x32xbf16>
    %338 = vector.shape_cast %337 : vector<1x32x32xbf16> to vector<32x32xbf16>
    %339 = vector.extract_strided_slice %2 {offsets = [1, 0, 192], sizes = [1, 1, 32], strides = [1, 1, 1]} : vector<3x1x480xf32> to vector<1x1x32xf32>
    %340 = vector.shape_cast %339 : vector<1x1x32xf32> to vector<1x32xf32>
    %341 = arith.truncf %336 : vector<16x32xf32> to vector<16x32xbf16>
    %cst_67 = arith.constant dense<0.000000e+00> : vector<16x32xf32>
    %342 = tpu.matmul %341, %338, %cst_67 {dimension_numbers = #tpu.dot_dimension_numbers<[1], [0], [0], [1], [0, 0, 1, 1], [], []>} : vector<16x32xbf16>, vector<32x32xbf16>, vector<16x32xf32> -> vector<16x32xf32>
    %343 = vector.broadcast %340 : vector<1x32xf32> to vector<16x32xf32>
    %344 = arith.addf %342, %343 : vector<16x32xf32>
    %345 = vector.extract_strided_slice %50 {offsets = [0, 64], sizes = [16, 32], strides = [1, 1]} : vector<16x128xf32> to vector<16x32xf32>
    %346 = vector.extract_strided_slice %50 {offsets = [0, 96], sizes = [16, 32], strides = [1, 1]} : vector<16x128xf32> to vector<16x32xf32>
    %347 = vector.shape_cast %344 : vector<16x32xf32> to vector<2x8x4x8xf32>
    %348 = tpu.transpose %347, [0, 2, 1, 3] : vector<2x8x4x8xf32> -> vector<2x4x8x8xf32>
    %349 = vector.shape_cast %348 : vector<2x4x8x8xf32> to vector<8x8x8xf32>
    %350 = arith.truncf %349 : vector<8x8x8xf32> to vector<8x8x8xbf16>
    %351 = vector.shape_cast %345 : vector<16x32xf32> to vector<2x8x4x8xf32>
    %352 = tpu.transpose %351, [0, 2, 1, 3] : vector<2x8x4x8xf32> -> vector<2x4x8x8xf32>
    %353 = vector.shape_cast %352 : vector<2x4x8x8xf32> to vector<8x8x8xf32>
    %354 = arith.truncf %353 : vector<8x8x8xf32> to vector<8x8x8xbf16>
    %355 = vector.shape_cast %346 : vector<16x32xf32> to vector<2x8x4x8xf32>
    %356 = tpu.transpose %355, [0, 2, 1, 3] : vector<2x8x4x8xf32> -> vector<2x4x8x8xf32>
    %357 = vector.shape_cast %356 : vector<2x4x8x8xf32> to vector<8x8x8xf32>
    %358 = arith.truncf %357 : vector<8x8x8xf32> to vector<8x8x8xbf16>
    "tpu.trace_start"() <{level = 10 : i32, message = "bqd,bkd->bqk"}> : () -> ()
    %cst_68 = arith.constant dense<0.000000e+00> : vector<8x8x8xf32>
    %359 = tpu.matmul %350, %354, %cst_68 {dimension_numbers = #tpu.dot_dimension_numbers<[2], [2], [1], [1], [0, 0, 0, 1, 1, 1], [0], [0]>} : vector<8x8x8xbf16>, vector<8x8x8xbf16>, vector<8x8x8xf32> -> vector<8x8x8xf32>
    "tpu.trace_stop"() : () -> ()
    %360 = vector.broadcast %41 : vector<8x1x8xf32> to vector<8x8x8xf32>
    %361 = arith.addf %359, %360 : vector<8x8x8xf32>
    %cst_69 = arith.constant dense<0xFF800000> : vector<8x8xf32>
    %362 = vector.multi_reduction <maximumf>, %361, %cst_69 [2] : vector<8x8x8xf32> to vector<8x8xf32>
    %363 = vector.shape_cast %362 : vector<8x8xf32> to vector<8x8x1xf32>
    %364 = vector.broadcast %363 : vector<8x8x1xf32> to vector<8x8x8xf32>
    %365 = arith.subf %361, %364 : vector<8x8x8xf32>
    %366 = math.exp %365 : vector<8x8x8xf32>
    %cst_70 = arith.constant dense<0.000000e+00> : vector<8x8xf32>
    %367 = vector.multi_reduction <add>, %366, %cst_70 [2] : vector<8x8x8xf32> to vector<8x8xf32>
    %368 = vector.shape_cast %367 : vector<8x8xf32> to vector<8x8x1xf32>
    %369 = tpu.reciprocal %368 {approx = true} : vector<8x8x1xf32> -> vector<8x8x1xf32>
    %370 = vector.broadcast %369 : vector<8x8x1xf32> to vector<8x8x8xf32>
    %371 = arith.mulf %366, %370 : vector<8x8x8xf32>
    %372 = arith.truncf %371 : vector<8x8x8xf32> to vector<8x8x8xbf16>
    "tpu.trace_start"() <{level = 10 : i32, message = "bqk,bkd->bqd"}> : () -> ()
    %cst_71 = arith.constant dense<0.000000e+00> : vector<8x8x8xf32>
    %373 = tpu.matmul %372, %358, %cst_71 {dimension_numbers = #tpu.dot_dimension_numbers<[2], [1], [1], [2], [0, 0, 0, 1, 1, 2], [0], [0]>} : vector<8x8x8xbf16>, vector<8x8x8xbf16>, vector<8x8x8xf32> -> vector<8x8x8xf32>
    "tpu.trace_stop"() : () -> ()
    %374 = vector.shape_cast %373 : vector<8x8x8xf32> to vector<2x4x8x8xf32>
    %375 = tpu.transpose %374, [0, 2, 1, 3] : vector<2x4x8x8xf32> -> vector<2x8x4x8xf32>
    %376 = vector.shape_cast %375 : vector<2x8x4x8xf32> to vector<16x32xf32>
    %377 = vector.extract_strided_slice %0 {offsets = [1, 0, 160], sizes = [1, 32, 32], strides = [1, 1, 1]} : vector<3x32x256xbf16> to vector<1x32x32xbf16>
    %378 = vector.shape_cast %377 : vector<1x32x32xbf16> to vector<32x32xbf16>
    %379 = vector.extract_strided_slice %2 {offsets = [1, 0, 224], sizes = [1, 1, 32], strides = [1, 1, 1]} : vector<3x1x480xf32> to vector<1x1x32xf32>
    %380 = vector.shape_cast %379 : vector<1x1x32xf32> to vector<1x32xf32>
    %381 = arith.truncf %376 : vector<16x32xf32> to vector<16x32xbf16>
    %cst_72 = arith.constant dense<0.000000e+00> : vector<16x32xf32>
    %382 = tpu.matmul %381, %378, %cst_72 {dimension_numbers = #tpu.dot_dimension_numbers<[1], [0], [0], [1], [0, 0, 1, 1], [], []>} : vector<16x32xbf16>, vector<32x32xbf16>, vector<16x32xf32> -> vector<16x32xf32>
    %383 = vector.broadcast %380 : vector<1x32xf32> to vector<16x32xf32>
    %384 = arith.addf %382, %383 : vector<16x32xf32>
    %385 = arith.addf %336, %384 : vector<16x32xf32>
    %386 = vector.extract_strided_slice %2 {offsets = [1, 0, 256], sizes = [1, 1, 32], strides = [1, 1, 1]} : vector<3x1x480xf32> to vector<1x1x32xf32>
    %387 = vector.shape_cast %386 : vector<1x1x32xf32> to vector<1x32xf32>
    %388 = vector.extract_strided_slice %2 {offsets = [1, 0, 288], sizes = [1, 1, 32], strides = [1, 1, 1]} : vector<3x1x480xf32> to vector<1x1x32xf32>
    %389 = vector.shape_cast %388 : vector<1x1x32xf32> to vector<1x32xf32>
    %cst_73 = arith.constant dense<0.000000e+00> : vector<16xf32>
    %390 = vector.multi_reduction <add>, %385, %cst_73 [1] : vector<16x32xf32> to vector<16xf32>
    %391 = vector.shape_cast %390 : vector<16xf32> to vector<16x1xf32>
    %cst_74 = arith.constant 3.200000e+01 : f32
    %392 = vector.broadcast %cst_74 : f32 to vector<16x1xf32>
    %393 = arith.divf %391, %392 : vector<16x1xf32>
    %394 = vector.broadcast %393 : vector<16x1xf32> to vector<16x32xf32>
    %395 = arith.subf %385, %394 : vector<16x32xf32>
    %396 = arith.mulf %395, %395 : vector<16x32xf32>
    %cst_75 = arith.constant dense<0.000000e+00> : vector<16xf32>
    %397 = vector.multi_reduction <add>, %396, %cst_75 [1] : vector<16x32xf32> to vector<16xf32>
    %398 = vector.shape_cast %397 : vector<16xf32> to vector<16x1xf32>
    %cst_76 = arith.constant 3.200000e+01 : f32
    %399 = vector.broadcast %cst_76 : f32 to vector<16x1xf32>
    %400 = arith.divf %398, %399 : vector<16x1xf32>
    %401 = vector.broadcast %393 : vector<16x1xf32> to vector<16x32xf32>
    %402 = arith.subf %385, %401 : vector<16x32xf32>
    %cst_77 = arith.constant 9.99999974E-6 : f32
    %403 = vector.broadcast %cst_77 : f32 to vector<16x1xf32>
    %404 = arith.addf %400, %403 : vector<16x1xf32>
    %405 = math.rsqrt %404 : vector<16x1xf32>
    %406 = vector.broadcast %405 : vector<16x1xf32> to vector<16x32xf32>
    %407 = arith.mulf %402, %406 : vector<16x32xf32>
    %408 = vector.broadcast %387 : vector<1x32xf32> to vector<16x32xf32>
    %409 = arith.mulf %407, %408 : vector<16x32xf32>
    %410 = vector.broadcast %389 : vector<1x32xf32> to vector<16x32xf32>
    %411 = arith.addf %409, %410 : vector<16x32xf32>
    %412 = vector.extract_strided_slice %0 {offsets = [1, 0, 192], sizes = [1, 32, 64], strides = [1, 1, 1]} : vector<3x32x256xbf16> to vector<1x32x64xbf16>
    %413 = vector.shape_cast %412 : vector<1x32x64xbf16> to vector<32x64xbf16>
    %414 = vector.extract_strided_slice %2 {offsets = [1, 0, 320], sizes = [1, 1, 64], strides = [1, 1, 1]} : vector<3x1x480xf32> to vector<1x1x64xf32>
    %415 = vector.shape_cast %414 : vector<1x1x64xf32> to vector<1x64xf32>
    %416 = arith.truncf %411 : vector<16x32xf32> to vector<16x32xbf16>
    %cst_78 = arith.constant dense<0.000000e+00> : vector<16x64xf32>
    %417 = tpu.matmul %416, %413, %cst_78 {dimension_numbers = #tpu.dot_dimension_numbers<[1], [0], [0], [1], [0, 0, 1, 1], [], []>} : vector<16x32xbf16>, vector<32x64xbf16>, vector<16x64xf32> -> vector<16x64xf32>
    %418 = vector.broadcast %415 : vector<1x64xf32> to vector<16x64xf32>
    %419 = arith.addf %417, %418 : vector<16x64xf32>
    %420 = arith.mulf %419, %419 : vector<16x64xf32>
    %421 = arith.mulf %419, %420 : vector<16x64xf32>
    %cst_79 = arith.constant 4.471500e-02 : f32
    %422 = vector.broadcast %cst_79 : f32 to vector<16x64xf32>
    %423 = arith.mulf %422, %421 : vector<16x64xf32>
    %424 = arith.addf %419, %423 : vector<16x64xf32>
    %cst_80 = arith.constant 0.797884583 : f32
    %425 = vector.broadcast %cst_80 : f32 to vector<16x64xf32>
    %426 = arith.mulf %425, %424 : vector<16x64xf32>
    %427 = math.tanh %426 : vector<16x64xf32>
    %cst_81 = arith.constant 1.000000e+00 : f32
    %428 = vector.broadcast %cst_81 : f32 to vector<16x64xf32>
    %429 = arith.addf %428, %427 : vector<16x64xf32>
    %cst_82 = arith.constant 5.000000e-01 : f32
    %430 = vector.broadcast %cst_82 : f32 to vector<16x64xf32>
    %431 = arith.mulf %430, %429 : vector<16x64xf32>
    %432 = arith.mulf %419, %431 : vector<16x64xf32>
    %433 = vector.extract_strided_slice %1 {offsets = [1, 0, 0], sizes = [1, 64, 32], strides = [1, 1, 1]} : vector<2x64x32xbf16> to vector<1x64x32xbf16>
    %434 = vector.shape_cast %433 : vector<1x64x32xbf16> to vector<64x32xbf16>
    %435 = vector.extract_strided_slice %2 {offsets = [1, 0, 384], sizes = [1, 1, 32], strides = [1, 1, 1]} : vector<3x1x480xf32> to vector<1x1x32xf32>
    %436 = vector.shape_cast %435 : vector<1x1x32xf32> to vector<1x32xf32>
    %437 = arith.truncf %432 : vector<16x64xf32> to vector<16x64xbf16>
    %cst_83 = arith.constant dense<0.000000e+00> : vector<16x32xf32>
    %438 = tpu.matmul %437, %434, %cst_83 {dimension_numbers = #tpu.dot_dimension_numbers<[1], [0], [0], [1], [0, 0, 1, 1], [], []>} : vector<16x64xbf16>, vector<64x32xbf16>, vector<16x32xf32> -> vector<16x32xf32>
    %439 = vector.broadcast %436 : vector<1x32xf32> to vector<16x32xf32>
    %440 = arith.addf %438, %439 : vector<16x32xf32>
    %441 = arith.addf %411, %440 : vector<16x32xf32>
    %442 = vector.extract_strided_slice %2 {offsets = [1, 0, 416], sizes = [1, 1, 32], strides = [1, 1, 1]} : vector<3x1x480xf32> to vector<1x1x32xf32>
    %443 = vector.shape_cast %442 : vector<1x1x32xf32> to vector<1x32xf32>
    %444 = vector.extract_strided_slice %2 {offsets = [1, 0, 448], sizes = [1, 1, 32], strides = [1, 1, 1]} : vector<3x1x480xf32> to vector<1x1x32xf32>
    %445 = vector.shape_cast %444 : vector<1x1x32xf32> to vector<1x32xf32>
    %cst_84 = arith.constant dense<0.000000e+00> : vector<16xf32>
    %446 = vector.multi_reduction <add>, %441, %cst_84 [1] : vector<16x32xf32> to vector<16xf32>
    %447 = vector.shape_cast %446 : vector<16xf32> to vector<16x1xf32>
    %cst_85 = arith.constant 3.200000e+01 : f32
    %448 = vector.broadcast %cst_85 : f32 to vector<16x1xf32>
    %449 = arith.divf %447, %448 : vector<16x1xf32>
    %450 = vector.broadcast %449 : vector<16x1xf32> to vector<16x32xf32>
    %451 = arith.subf %441, %450 : vector<16x32xf32>
    %452 = arith.mulf %451, %451 : vector<16x32xf32>
    %cst_86 = arith.constant dense<0.000000e+00> : vector<16xf32>
    %453 = vector.multi_reduction <add>, %452, %cst_86 [1] : vector<16x32xf32> to vector<16xf32>
    %454 = vector.shape_cast %453 : vector<16xf32> to vector<16x1xf32>
    %cst_87 = arith.constant 3.200000e+01 : f32
    %455 = vector.broadcast %cst_87 : f32 to vector<16x1xf32>
    %456 = arith.divf %454, %455 : vector<16x1xf32>
    %457 = vector.broadcast %449 : vector<16x1xf32> to vector<16x32xf32>
    %458 = arith.subf %441, %457 : vector<16x32xf32>
    %cst_88 = arith.constant 9.99999974E-6 : f32
    %459 = vector.broadcast %cst_88 : f32 to vector<16x1xf32>
    %460 = arith.addf %456, %459 : vector<16x1xf32>
    %461 = math.rsqrt %460 : vector<16x1xf32>
    %462 = vector.broadcast %461 : vector<16x1xf32> to vector<16x32xf32>
    %463 = arith.mulf %458, %462 : vector<16x32xf32>
    %464 = vector.broadcast %443 : vector<1x32xf32> to vector<16x32xf32>
    %465 = arith.mulf %463, %464 : vector<16x32xf32>
    %466 = vector.broadcast %445 : vector<1x32xf32> to vector<16x32xf32>
    %467 = arith.addf %465, %466 : vector<16x32xf32>
    %468 = tpu.concatenate %60, %268 in 1 : vector<16x64xf32>, vector<16x64xf32> -> vector<16x128xf32>
    %c0_89 = arith.constant 0 : index
    %c0_90 = arith.constant 0 : index
    %469 = vector.load %arg7[%c0_89, %c0_90] : memref<16x128xf32, #tpu.memory_space<vmem>>, vector<16x128xf32>
    tpu.vector_store %arg7[%c0_89, %c0_90], %468 {strides = array<i32>} : memref<16x128xf32, #tpu.memory_space<vmem>>, vector<16x128xf32>,
    %470 = vector.extract_strided_slice %0 {offsets = [2, 0, 128], sizes = [1, 32, 128], strides = [1, 1, 1]} : vector<3x32x256xbf16> to vector<1x32x128xbf16>
    %471 = vector.shape_cast %470 : vector<1x32x128xbf16> to vector<32x128xbf16>
    %472 = arith.truncf %467 : vector<16x32xf32> to vector<16x32xbf16>
    %cst_91 = arith.constant dense<0.000000e+00> : vector<16x128xf32>
    %473 = tpu.matmul %472, %471, %cst_91 {dimension_numbers = #tpu.dot_dimension_numbers<[1], [0], [0], [1], [0, 0, 1, 1], [], []>} : vector<16x32xbf16>, vector<32x128xbf16>, vector<16x128xf32> -> vector<16x128xf32>
    %c0_92 = arith.constant 0 : index
    %c0_93 = arith.constant 0 : index
    %474 = vector.load %arg6[%c0_92, %c0_93] : memref<16x128xf32, #tpu.memory_space<vmem>>, vector<16x128xf32>
    tpu.vector_store %arg6[%c0_92, %c0_93], %473 {strides = array<i32>} : memref<16x128xf32, #tpu.memory_space<vmem>>, vector<16x128xf32>,
    return
  }
}

</mosaic_0001>

<bundles_post_ra>
// kernel: bart_decoder_init.1
= control target key start
LH: loop header
LB: loop body
LE: loop exit
PB: predicated region body
PF: predicated region fallthrough
CT: control target
= control target key end

     0   :  { %vm61_vm0 = vcmask 261120   ;;  %s12913_s0 = inlined_call_operand.vmem [shape: f32[16,32], index: 0, kind: input, shape index: {}]   ;;  %s12914_s1 = inlined_call_operand.vmem [shape: f32[16,32], index: 1, kind: input, shape index: {}]   ;;  %s12915_s2 = inlined_call_operand.vmem [shape: f32[2,8], index: 2, kind: input, shape index: {}]   ;;  %s12916_s3 = inlined_call_operand.vmem [shape: bf16[3,32,256], index: 3, kind: input, shape index: {}]   ;;  %s12917_s4 = inlined_call_operand.vmem [shape: bf16[2,64,32], index: 4, kind: input, shape index: {}]   ;;  %s12918_s5 = inlined_call_operand.vmem [shape: f32[3,1,480], index: 5, kind: input, shape index: {}]   ;;  %s12919_s6 = inlined_call_operand.hbm [shape: f32[16,128], index: 6, kind: output, shape index: {0}]   ;;  %s12920_s7 = inlined_call_operand.vmem [shape: f32[16,128], index: 7, kind: output, shape index: {1}]   ;;  %s12921_s8 = inlined_call_operand.vmem [shape: f32[16,128], index: 8, kind: output, shape index: {2}]  }
   0x1   :  { %v59_v0 = vld [vmem:[%s12913_s0] sm:$0xff]  ;;  %v60_v1 = vld [vmem:[%s12913_s0 + $0x8] sm:$0xff] }
   0x2   :  { %v62_v2 = vsel %vm61_vm0, %v59_v0, 0.0  ;;  %v65_v3 = vsel %vm61_vm0, %v60_v1, 0.0 }
   0x3   :  { %63 = vadd.xlane.f32.xlu0 %v62_v2 }
   0x7   :  { %66 = vadd.xlane.f32.xlu0 %v65_v3 }
   0x8   :  { %14 = vsyncpa [#allocation3], 0  ;;  %v90_v4 = vlaneseq  ;;  %v58_v6 = vld [vmem:[%s12918_s5 + $0x8] sm:$0xf]  ;;  %s10734_s0 = smov 96   ;;  %v28_v19 = vld [vmem:[%s12916_s3] sm:$0xff] }
   0x9   :  { %v29_v20 = vld [vmem:[%s12916_s3 + $0x8] sm:$0xff]  ;;  %v10735_v22 = vmov 0.0   ;;  %v30_v23 = vld [vmem:[%s12916_s3 + $0x10] sm:$0xff]  ;;  %v31_v24 = vld [vmem:[%s12916_s3 + $0x18] sm:$0xff]  ;;  %vm10736_vm1 = vmmov 0   ;;  %s10737_s21 = smov 120  }
   0xa   :  { %v10805_v5 = vshrl.u32 %v90_v4, 7  ;;  %v10826_v21 = vcombine.low %v28_v19, %v29_v20  ;;  %9934 = vmatprep.subr.bf16.mxu1 %v10735_v22  ;;  %9926 = vmatprep.subr.bf16.mxu0 %v10735_v22  ;;  %v10838_v25 = vcombine.low %v30_v23, %v31_v24  ;;  %v56_v42 = vld [vmem:[%s12918_s5] sm:$0xf]  ;;  %s10738_s22 = smov 112   ;;  %s10739_s23 = smov 104   ;;  %v37_v52 = vld [vmem:[%s12916_s3 + $0x48] sm:$0xff] }
   0xb   :  { %9938 = vmatprep.mubr.msk.bf16.mxu1 %vm10736_vm1, %v10735_v22  ;;  %9930 = vmatprep.mubr.msk.bf16.mxu0 %vm10736_vm1, %v10735_v22  ;;  %v36_v51 = vld [vmem:[%s12916_s3 + $0x40] sm:$0xff]  ;;  %v38_v55 = vld [vmem:[%s12916_s3 + $0x50] sm:$0xff]  ;;  %v39_v56 = vld [vmem:[%s12916_s3 + $0x58] sm:$0xff]  ;;  %v9499_v62 = vrot.slane %v37_v52, 4  ;;  %s10740_s14 = smov 64   ;;  %vm1175_vm2 = vcmask 64512  }
   0xc   :  { %v10811_v7 = vsub.s32 0, %v10805_v5  ;;  %9935 = vmatpush3.bf16.msra.mxu1 %v10826_v21  ;;  %v9582_v54 = vcombine.low %v36_v51, %v37_v52  ;;  %v9583_v58 = vcombine.low %v38_v55, %v39_v56  ;;  %v9498_v61 = vrot.slane %v36_v51, 4  ;;  %s10745_s15 = smov 24   ;;  %s10746_s16 = smov 8  }
   0xd   :  { %9936 = vmatprep.subr.bf16.mxu1 %v10735_v22  ;;  %vm1643_vm4 = vcmask 1043456   ;;  %s10747_s17 = smov 16   ;;  %vm2307_vm5 = vcmask 130048   ;;  %vm2310_vm6 = vcmask 195584   ;;  %vm155_vm7 = vcmask 523264  }
   0xe   :  { %v10814_v8 = vrot.slane %v58_v6, %v10811_v7  ;;  %v10861_v43 = vrot.slane %v56_v42, %v10811_v7  ;;  %9927 = vmatpush3.bf16.msra.mxu0 %v9582_v54  ;;  %v10919_v63 = vcombine.low %v9498_v61, %v9499_v62  ;;  %v10741_v6 = vmov 1983009808  }
   0xf   :  { %9928 = vmatprep.subr.bf16.mxu0 %v10735_v22 }
  0x10   :  { %9937 = vmatpush3.bf16.msra.mxu1 %v10838_v25 }
  0x11   :  { %9948 = vmatprep.subr.bf16.mxu1 %v10735_v22 }
  0x12   :  { %9929 = vmatpush3.bf16.msra.mxu0 %v9583_v58 }
  0x13   :  { %9942 = vmatprep.subr.bf16.mxu0 %v10735_v22 }
  0x1d   :  { %97 = vrot.lane.b32.xlu0 %v10814_v8, %s10734_s0 }
  0x90   :  { %v64_v9 = vpop.xlane.xlu0 %63 }
  0x91   :  { %v69_v10 = vmul.f32 0.03125, %v64_v9  ;;  %v290_v9 = vunpack.c.l.s4 %v10741_v6 }
  0x93   :  { %v71_v11 = vsub.f32 %v59_v0, %v69_v10  ;;  %v132_v0 = vld [vmem:[%s12914_s1] sm:$0xff]  ;;  %v291_v10 = vunpack.c.0.s8 %v290_v9 }
  0x94   :  { %v67_v12 = vpop.xlane.xlu0 %66 }
  0x95   :  { %v70_v13 = vmul.f32 0.03125, %v67_v12  ;;  %v73_v14 = vmul.f32 %v71_v11, %v71_v11 }
  0x97   :  { %v72_v15 = vsub.f32 %v60_v1, %v70_v13  ;;  %v75_v16 = vsel %vm61_vm0, %v73_v14, 0.0  ;;  %v133_v1 = vld [vmem:[%s12914_s1 + $0x8] sm:$0xff]  ;;  %v10939_v14 = vsub.s32 %v291_v10, %v10805_v5  ;;  %s10744_s1 = smov 32  }
  0x98   :  { %76 = vadd.xlane.f32.xlu1 %v75_v16  ;;  %v98_v37 = vpop.permute.xlu0 %97  ;;  %v134_v3 = vpack.c.bf16 %v133_v1, %v132_v0 }
  0x99   :  { %v74_v17 = vmul.f32 %v72_v15, %v72_v15 }
  0x9a   :  { %9931 = vmatmul.mubr.msk.bf16.vlgmr.msra.gmra.mrb[0].mxu0 %vm61_vm0, %v134_v3 }
  0x9b   :  { %v78_v18 = vsel %vm61_vm0, %v74_v17, 0.0  ;;  %9944 = vmatprep.mubr.msk.bf16.mxu0 %vm10736_vm1, %v10735_v22 }
  0x9c   :  { %79 = vadd.xlane.f32.xlu1 %v78_v18 }
 0x125   :  { %v77_v26 = vpop.xlane.xlu1 %76 }
 0x126   :  { %v81_v27 = vmul.f32 0.03125, %v77_v26 }
 0x128   :  { %v83_v28 = vadd.f32 1e-05, %v81_v27 }
 0x129   :  { %v80_v29 = vpop.xlane.xlu1 %79 }
 0x12a   :  { %10521 = vrsqrt.f32 %v83_v28  ;;  %v82_v30 = vmul.f32 0.03125, %v80_v29 }
 0x12c   :  { %v84_v31 = vadd.f32 1e-05, %v82_v30 }
 0x12e   :  { %10523 = vrsqrt.f32 %v84_v31 }
 0x134   :  { %v10522_v32 = vpop.eup %10521 }
 0x135   :  { %v87_v33 = vmul.f32 %v10522_v32, %v71_v11  ;;  %v10742_v11 = vmov 1934713408  }
 0x136   :  { %v322_v12 = vunpack.c.l.s4 %v10742_v11 }
 0x137   :  { %v95_v36 = vmul.f32 %v10814_v8, %v87_v33 }
 0x138   :  { %v10524_v34 = vpop.eup %10523  ;;  %v323_v17 = vunpack.c.0.s8 %v322_v12 }
 0x139   :  { %v88_v35 = vmul.f32 %v10524_v34, %v72_v15  ;;  %v10848_v39 = vadd.f32 %v98_v37, %v95_v36 }
 0x13a   :  { %v10951_v24 = vsub.s32 %v323_v17, %v10805_v5 }
 0x13b   :  { %v96_v38 = vmul.f32 %v10814_v8, %v88_v35 }
 0x13d   :  { %v10850_v40 = vadd.f32 %v98_v37, %v96_v38 }
 0x13f   :  { %v204_v41 = vpack.c.bf16 %v10850_v40, %v10848_v39 }
 0x141   :  { %9939 = vmatmul.mubr.msk.bf16.vlgmr.msra.gmra.mrb[0].mxu1 %vm61_vm0, %v204_v41 }
 0x142   :  { %9950 = vmatprep.mubr.msk.bf16.mxu1 %vm10736_vm1, %v10735_v22 }
 0x214   :  { %v260_v44 = vpop.f32.mrb[0].mxu1 }
 0x215   :  { %v10864_v45 = vadd.f32 %v260_v44, %v10861_v43  ;;  %v9940_v46 = vpop.f32.mrb[1].mxu1 }
 0x216   :  { %v263_v47 = vpop.f32.mrb[2].mxu1 }
 0x217   :  { %v10867_v48 = vadd.f32 %v263_v47, %v10861_v43  ;;  %269 = vrot.lane.b32.xlu1 %v10864_v45, %s10737_s21  ;;  %v9941_v49 = vpop.f32.mrb[3].mxu1 }
 0x219   :  { %271 = vrot.lane.b32.xlu0 %v10867_v48, %s10737_s21 }
 0x21b   :  { %275 = vrot.lane.b32.xlu1 %v10864_v45, %s10738_s22 }
 0x21d   :  { %283 = vrot.lane.b32.xlu0 %v10867_v48, %s10739_s23 }
 0x21f   :  { %281 = vrot.lane.b32.xlu1 %v10864_v45, %s10739_s23 }
 0x223   :  { %277 = vrot.lane.b32.xlu1 %v10867_v48, %s10738_s22 }
 0x227   :  { %567 = vrot.lane.b32.xlu1 %v10864_v45, %s10734_s0 }
 0x289   :  { %v10883_v50 = vpop.permute.xlu1 %269 }
 0x28a   :  { %571 = vrot.lane.b32.xlu0 %v10883_v50, %s10734_s0 }
 0x28b   :  { %v10910_v59 = vpop.permute.xlu0 %271 }
 0x28d   :  { %v10893_v53 = vpop.permute.xlu1 %275 }
 0x28e   :  { %575 = vrot.lane.b32.xlu1 %v10893_v53, %s10734_s0  ;;  %v287_v15 = vcombine.low %v10864_v45, %v10893_v53  ;;  %v288_v18 = vcombine.high %v10864_v45, %v10893_v53 }
 0x28f   :  { %v10927_v2 = vpop.permute.xlu0 %283 }
 0x290   :  { %v295_v20 = vrot.slane %v287_v15, %v10939_v14  ;;  %v302_v26 = vrot.slane %v288_v18, %v10939_v14  ;;  %v371_v32 = vcombine.low %v10910_v59, %v10927_v2  ;;  %v372_v33 = vcombine.high %v10910_v59, %v10927_v2 }
 0x291   :  { %v10904_v57 = vpop.permute.xlu1 %281 }
 0x292   :  { %569 = vrot.lane.b32.xlu1 %v10867_v48, %s10734_s0  ;;  %579 = vrot.lane.b32.xlu0 %v10904_v57, %s10734_s0  ;;  %v303_v13 = vcombine.low %v10883_v50, %v10904_v57  ;;  %v304_v16 = vcombine.high %v10883_v50, %v10904_v57  ;;  %v386_v46 = vrot.slane %v372_v33, %v10939_v14 }
 0x294   :  { %v311_v19 = vrot.slane %v303_v13, %v10939_v14  ;;  %v318_v23 = vrot.slane %v304_v16, %v10939_v14 }
 0x295   :  { %v10913_v60 = vpop.permute.xlu1 %277 }
 0x296   :  { %577 = vrot.lane.b32.xlu1 %v10913_v60, %s10734_s0  ;;  %573 = vrot.lane.b32.xlu0 %v10910_v59, %s10734_s0  ;;  %v319_v28 = vcombine.low %v295_v20, %v311_v19  ;;  %v320_v29 = vcombine.high %v295_v20, %v311_v19  ;;  %v355_v30 = vcombine.low %v10867_v48, %v10913_v60 }
 0x297   :  { %v356_v31 = vcombine.high %v10867_v48, %v10913_v60  ;;  %v335_v34 = vcombine.low %v302_v26, %v318_v23  ;;  %v336_v35 = vcombine.high %v302_v26, %v318_v23 }
 0x298   :  { %v327_v37 = vrot.slane %v319_v28, %v10951_v24  ;;  %v334_v38 = vrot.slane %v320_v29, %v10951_v24  ;;  %v363_v41 = vrot.slane %v355_v30, %v10939_v14 }
 0x299   :  { %v10954_v27 = vpop.permute.xlu1 %567  ;;  %v370_v42 = vrot.slane %v356_v31, %v10939_v14  ;;  %v343_v47 = vrot.slane %v335_v34, %v10951_v24  ;;  %v350_v49 = vrot.slane %v336_v35, %v10951_v24 }
 0x29a   :  { %871 = vrot.lane.b32.xlu1 %v10864_v45, %s10740_s14  ;;  %581 = vrot.lane.b32.xlu0 %v10927_v2, %s10734_s0  ;;  %v379_v45 = vrot.slane %v371_v32, %v10939_v14  ;;  %v423_v55 = vcombine.low %v327_v37, %v334_v38  ;;  %v9588_v3 = vcombine.high %v327_v37, %v334_v38 }
 0x29b   :  { %v403_v61 = vcombine.low %v370_v42, %v386_v46  ;;  %v439_v6 = vcombine.low %v343_v47, %v350_v49  ;;  %v9589_v9 = vcombine.high %v343_v47, %v350_v49  ;;  %v404_v10 = vcombine.high %v370_v42, %v386_v46 }
 0x29c   :  { %v387_v56 = vcombine.low %v363_v41, %v379_v45  ;;  %v388_v58 = vcombine.high %v363_v41, %v379_v45  ;;  %v10990_v20 = vrot.slane %v423_v55, %v10939_v14  ;;  %v10996_v32 = vrot.slane %v9588_v3, %v10939_v14 }
 0x29d   :  { %v10987_v18 = vrot.slane %v403_v61, %v10951_v24  ;;  %v10993_v31 = vrot.slane %v404_v10, %v10951_v24  ;;  %v10999_v33 = vrot.slane %v439_v6, %v10939_v14  ;;  %v11002_v34 = vrot.slane %v9589_v9, %v10939_v14 }
 0x29e   :  { %v10981_v16 = vrot.slane %v387_v56, %v10951_v24  ;;  %v10984_v17 = vrot.slane %v388_v58, %v10951_v24  ;;  %v455_v58 = vcombine.low %v10990_v20, %v10996_v32 }
 0x29f   :  { %v471_v61 = vcombine.low %v10999_v33, %v11002_v34 }
 0x2a0   :  { %v491_v41 = vcombine.low %v10981_v16, %v10984_v17  ;;  %v9590_v42 = vcombine.high %v10981_v16, %v10984_v17 }
 0x2fc   :  { %v572_v44 = vpop.permute.xlu0 %571 }
 0x300   :  { %v576_v36 = vpop.permute.xlu1 %575 }
 0x301   :  { %v591_v51 = vcombine.low %v10954_v27, %v576_v36  ;;  %v592_v52 = vcombine.high %v10954_v27, %v576_v36 }
 0x303   :  { %v599_v11 = vrot.slane %v591_v51, %v10939_v14  ;;  %v606_v12 = vrot.slane %v592_v52, %v10939_v14 }
 0x304   :  { %v10974_v54 = vpop.permute.xlu1 %569  ;;  %v580_v62 = vpop.permute.xlu0 %579 }
 0x305   :  { %v607_v0 = vcombine.low %v572_v44, %v580_v62  ;;  %v608_v1 = vcombine.high %v572_v44, %v580_v62 }
 0x307   :  { %v615_v13 = vrot.slane %v607_v0, %v10939_v14  ;;  %v622_v15 = vrot.slane %v608_v1, %v10939_v14 }
 0x308   :  { %v574_v19 = vpop.permute.xlu0 %573  ;;  %v578_v30 = vpop.permute.xlu1 %577 }
 0x309   :  { %v623_v23 = vcombine.low %v599_v11, %v615_v13  ;;  %v624_v26 = vcombine.high %v599_v11, %v615_v13  ;;  %v639_v28 = vcombine.low %v606_v12, %v622_v15  ;;  %v640_v29 = vcombine.high %v606_v12, %v622_v15 }
 0x30a   :  { %v659_v44 = vcombine.low %v10974_v54, %v578_v30  ;;  %v660_v45 = vcombine.high %v10974_v54, %v578_v30 }
 0x30b   :  { %v631_v35 = vrot.slane %v623_v23, %v10951_v24  ;;  %v638_v36 = vrot.slane %v624_v26, %v10951_v24  ;;  %v647_v37 = vrot.slane %v639_v28, %v10951_v24  ;;  %v654_v38 = vrot.slane %v640_v29, %v10951_v24 }
 0x30c   :  { %v582_v46 = vpop.permute.xlu0 %581  ;;  %v667_v6 = vrot.slane %v659_v44, %v10939_v14  ;;  %v674_v9 = vrot.slane %v660_v45, %v10939_v14 }
 0x30d   :  { %v727_v47 = vcombine.low %v631_v35, %v638_v36  ;;  %v9592_v49 = vcombine.high %v631_v35, %v638_v36  ;;  %v743_v51 = vcombine.low %v647_v37, %v654_v38  ;;  %v9593_v52 = vcombine.high %v647_v37, %v654_v38 }
 0x30e   :  { %v675_v55 = vcombine.low %v574_v19, %v582_v46  ;;  %v676_v56 = vcombine.high %v574_v19, %v582_v46 }
 0x30f   :  { %v734_v62 = vrot.slane %v727_v47, %v10939_v14  ;;  %v742_v0 = vrot.slane %v9592_v49, %v10939_v14  ;;  %v750_v1 = vrot.slane %v743_v51, %v10939_v14  ;;  %v758_v3 = vrot.slane %v9593_v52, %v10939_v14 }
 0x310   :  { %v683_v10 = vrot.slane %v675_v55, %v10939_v14  ;;  %v690_v11 = vrot.slane %v676_v56, %v10939_v14  ;;  %v507_v47 = vcombine.low %v10987_v18, %v10993_v31  ;;  %v463_v52 = vrot.slane %v455_v58, %v10951_v24 }
 0x311   :  { %v759_v12 = vcombine.low %v734_v62, %v742_v0  ;;  %v775_v13 = vcombine.low %v750_v1, %v758_v3  ;;  %v760_v15 = vcombine.high %v734_v62, %v742_v0  ;;  %v776_v19 = vcombine.high %v750_v1, %v758_v3 }
 0x312   :  { %v691_v23 = vcombine.low %v667_v6, %v683_v10  ;;  %v692_v26 = vcombine.high %v667_v6, %v683_v10  ;;  %v707_v28 = vcombine.low %v674_v9, %v690_v11  ;;  %v708_v29 = vcombine.high %v674_v9, %v690_v11 }
 0x313   :  { %v767_v30 = vrot.slane %v759_v12, %v10951_v24  ;;  %v783_v35 = vrot.slane %v775_v13, %v10951_v24  ;;  %v774_v36 = vrot.slane %v760_v15, %v10951_v24  ;;  %v790_v37 = vrot.slane %v776_v19, %v10951_v24 }
 0x314   :  { %v699_v38 = vrot.slane %v691_v23, %v10951_v24  ;;  %v706_v44 = vrot.slane %v692_v26, %v10951_v24  ;;  %v715_v45 = vrot.slane %v707_v28, %v10951_v24  ;;  %v722_v46 = vrot.slane %v708_v29, %v10951_v24 }
 0x315   :  { %v791_v49 = vcombine.low %v767_v30, %v783_v35  ;;  %v792_v51 = vcombine.high %v767_v30, %v783_v35  ;;  %v479_v6 = vrot.slane %v471_v61, %v10951_v24  ;;  %v793_v9 = vcombine.low %v774_v36, %v790_v37 }
 0x316   :  { %v795_v55 = vcombine.low %v699_v38, %v706_v44  ;;  %v9594_v56 = vcombine.high %v699_v38, %v706_v44  ;;  %v811_v62 = vcombine.low %v715_v45, %v722_v46  ;;  %v9595_v0 = vcombine.high %v715_v45, %v722_v46 }
 0x317   :  { %v863_v1 = vpack.c.bf16 %v791_v49, %v791_v49  ;;  %v864_v3 = vpack.c.bf16 %v792_v51, %v792_v51  ;;  %v9591_v58 = vcombine.high %v10987_v18, %v10993_v31  ;;  %v794_v23 = vcombine.high %v774_v36, %v790_v37 }
 0x318   :  { %v802_v10 = vrot.slane %v795_v55, %v10939_v14  ;;  %v810_v11 = vrot.slane %v9594_v56, %v10939_v14  ;;  %v818_v12 = vrot.slane %v811_v62, %v10939_v14  ;;  %v826_v13 = vrot.slane %v9595_v0, %v10939_v14 }
 0x319   :  { %v1180_v15 = vsel %vm1175_vm2, %v863_v1, 0  ;;  %v1226_v19 = vsel %vm1175_vm2, %v864_v3, 0  ;;  %v456_v61 = vcombine.high %v10990_v20, %v10996_v32  ;;  %v487_v29 = vcombine.low %v463_v52, %v479_v6 }
 0x31a   :  { %9943 = vmatpush3.bf16.xpose.msra.mxu0 %v1180_v15  ;;  %9949 = vmatpush3.bf16.xpose.msra.mxu1 %v1226_v19  ;;  %v827_v26 = vcombine.low %v802_v10, %v810_v11  ;;  %v843_v28 = vcombine.low %v818_v12, %v826_v13  ;;  %v488_v30 = vcombine.high %v463_v52, %v479_v6 }
 0x31b   :  { %9954 = vmatprep.subr.bf16.mxu0 %v10735_v22  ;;  %9960 = vmatprep.subr.bf16.mxu1 %v10735_v22  ;;  %v472_v18 = vcombine.high %v10999_v33, %v11002_v34  ;;  %v865_v31 = vpack.c.bf16 %v793_v9, %v793_v9  ;;  %v866_v35 = vpack.c.bf16 %v794_v23, %v794_v23 }
 0x31c   :  { %v835_v36 = vrot.slane %v827_v26, %v10951_v24  ;;  %v851_v37 = vrot.slane %v843_v28, %v10951_v24  ;;  %v498_v20 = vrot.slane %v491_v41, %v10939_v14  ;;  %v506_v32 = vrot.slane %v9590_v42, %v10939_v14 }
 0x31d   :  { %v514_v38 = vrot.slane %v507_v47, %v10939_v14  ;;  %v522_v33 = vrot.slane %v9591_v58, %v10939_v14  ;;  %v559_v34 = vpack.c.bf16 %v487_v29, %v487_v29  ;;  %v560_v44 = vpack.c.bf16 %v488_v30, %v488_v30 }
 0x31e   :  { %v470_v45 = vrot.slane %v456_v61, %v10951_v24  ;;  %v486_v46 = vrot.slane %v472_v18, %v10951_v24  ;;  %v1272_v49 = vsel %vm1175_vm2, %v865_v31, 0  ;;  %v828_v51 = vcombine.high %v802_v10, %v810_v11 }
 0x31f   :  { %v1318_v16 = vsel %vm1175_vm2, %v866_v35, 0  ;;  %v859_v17 = vcombine.low %v835_v36, %v851_v37  ;;  %v860_v41 = vcombine.high %v835_v36, %v851_v37  ;;  %v844_v42 = vcombine.high %v818_v12, %v826_v13 }
 0x320   :  { %v523_v47 = vcombine.low %v498_v20, %v506_v32  ;;  %v489_v52 = vcombine.low %v470_v45, %v486_v46  ;;  %v490_v55 = vcombine.high %v470_v45, %v486_v46  ;;  %v539_v56 = vcombine.low %v514_v38, %v522_v33 }
 0x321   :  { %9945 = vmatmul.mubr.msk.bf16.vlgmr.msra.gmra.mrb[4].mxu0 %vm1175_vm2, %v559_v34  ;;  %9951 = vmatmul.mubr.msk.bf16.vlgmr.msra.gmra.mrb[4].mxu1 %vm1175_vm2, %v560_v44  ;;  %v867_v62 = vpack.c.bf16 %v859_v17, %v859_v17  ;;  %v868_v0 = vpack.c.bf16 %v860_v41, %v860_v41  ;;  %v842_v1 = vrot.slane %v828_v51, %v10951_v24  ;;  %v11108_v34 = vpop.f32.mrb[0].mxu0  ;;  %v10743_v51 = vmov -1e+09  }
 0x322   :  { %9955 = vmatpush3.bf16.xpose.msra.mxu0 %v1272_v49  ;;  %9961 = vmatpush3.bf16.xpose.msra.mxu1 %v1318_v16  ;;  %v858_v3 = vrot.slane %v844_v42, %v10951_v24  ;;  %v561_v6 = vpack.c.bf16 %v489_v52, %v489_v52  ;;  %v562_v9 = vpack.c.bf16 %v490_v55, %v490_v55  ;;  %v9932_v44 = vpop.f32.mrb[1].mxu0  ;;  %v105_v49 = vand.u32 127, %v90_v4 }
 0x323   :  { %9956 = vmatprep.mubr.msk.bf16.mxu0 %vm10736_vm1, %v10735_v22  ;;  %9962 = vmatprep.mubr.msk.bf16.mxu1 %vm10736_vm1, %v10735_v22  ;;  %v531_v10 = vrot.slane %v523_v47, %v10951_v24  ;;  %v547_v11 = vrot.slane %v539_v56, %v10951_v24  ;;  %v1364_v12 = vsel %vm1175_vm2, %v867_v62, 0  ;;  %v1410_v13 = vsel %vm1175_vm2, %v868_v0, 0  ;;  %v11110_v45 = vpop.f32.mrb[2].mxu0 }
 0x324   :  { %9966 = vmatprep.subr.bf16.mxu0 %v10735_v22  ;;  %9972 = vmatprep.subr.bf16.mxu1 %v10735_v22  ;;  %v861_v58 = vcombine.low %v842_v1, %v858_v3  ;;  %v862_v15 = vcombine.high %v842_v1, %v858_v3  ;;  %v524_v19 = vcombine.high %v498_v20, %v506_v32  ;;  %v9933_v46 = vpop.f32.mrb[3].mxu0 }
 0x325   :  { %v555_v23 = vcombine.low %v531_v10, %v547_v11  ;;  %v556_v61 = vcombine.high %v531_v10, %v547_v11  ;;  %v540_v26 = vcombine.high %v514_v38, %v522_v33  ;;  %vm106_vm3 = vcmp.le.s32.totalorder %v105_v49, %v10805_v5 }
 0x326   :  { %v869_v28 = vpack.c.bf16 %v861_v58, %v861_v58  ;;  %v870_v29 = vpack.c.bf16 %v862_v15, %v862_v15  ;;  %v538_v31 = vrot.slane %v524_v19, %v10951_v24  ;;  %v11114_v16 = vsel %vm106_vm3, 0.0, %v10743_v51 }
 0x327   :  { %v563_v30 = vpack.c.bf16 %v555_v23, %v555_v23  ;;  %v564_v18 = vpack.c.bf16 %v556_v61, %v556_v61  ;;  %v554_v35 = vrot.slane %v540_v26, %v10951_v24 }
 0x328   :  { %v1456_v36 = vsel %vm1175_vm2, %v869_v28, 0  ;;  %v1502_v37 = vsel %vm1175_vm2, %v870_v29, 0 }
 0x329   :  { %9957 = vmatmul.mubr.msk.bf16.vlgmr.msra.gmra.mrb[8].mxu0 %vm1175_vm2, %v561_v6  ;;  %9963 = vmatmul.mubr.msk.bf16.vlgmr.msra.gmra.mrb[8].mxu1 %vm1175_vm2, %v562_v9  ;;  %v557_v20 = vcombine.low %v538_v31, %v554_v35  ;;  %v558_v32 = vcombine.high %v538_v31, %v554_v35 }
 0x32a   :  { %9967 = vmatpush3.bf16.xpose.msra.mxu0 %v1364_v12  ;;  %9973 = vmatpush3.bf16.xpose.msra.mxu1 %v1410_v13 }
 0x32b   :  { %9968 = vmatprep.mubr.msk.bf16.mxu0 %vm10736_vm1, %v10735_v22  ;;  %9974 = vmatprep.mubr.msk.bf16.mxu1 %vm10736_vm1, %v10735_v22  ;;  %v565_v38 = vpack.c.bf16 %v557_v20, %v557_v20  ;;  %v566_v33 = vpack.c.bf16 %v558_v32, %v558_v32 }
 0x32c   :  { %9978 = vmatprep.subr.bf16.mxu0 %v10735_v22  ;;  %9984 = vmatprep.subr.bf16.mxu1 %v10735_v22 }
 0x331   :  { %9969 = vmatmul.mubr.msk.bf16.vlgmr.msra.gmra.mrb[12].mxu0 %vm1175_vm2, %v563_v30  ;;  %9975 = vmatmul.mubr.msk.bf16.vlgmr.msra.gmra.mrb[12].mxu1 %vm1175_vm2, %v564_v18 }
 0x332   :  { %9979 = vmatpush3.bf16.xpose.msra.mxu0 %v1456_v36  ;;  %9985 = vmatpush3.bf16.xpose.msra.mxu1 %v1502_v37 }
 0x333   :  { %9980 = vmatprep.mubr.msk.bf16.mxu0 %vm10736_vm1, %v10735_v22  ;;  %9986 = vmatprep.mubr.msk.bf16.mxu1 %vm10736_vm1, %v10735_v22 }
 0x334   :  { %9990 = vmatprep.subr.bf16.mxu0 %v10735_v22  ;;  %9996 = vmatprep.subr.bf16.mxu1 %v10735_v22 }
 0x339   :  { %9981 = vmatmul.mubr.msk.bf16.vlgmr.msra.gmra.mrb[16].mxu0 %vm1175_vm2, %v565_v38  ;;  %9987 = vmatmul.mubr.msk.bf16.vlgmr.msra.gmra.mrb[16].mxu1 %vm1175_vm2, %v566_v33 }
 0x33a   :  { %9992 = vmatprep.mubr.msk.bf16.mxu0 %vm10736_vm1, %v10735_v22  ;;  %9998 = vmatprep.mubr.msk.bf16.mxu1 %vm10736_vm1, %v10735_v22 }
 0x3f4   :  { %v1216_v17 = vpop.f32.mrb[4].mxu0  ;;  %v1262_v41 = vpop.f32.mrb[4].mxu1 }
 0x3f5   :  { %v11117_v42 = vadd.f32 %v1216_v17, %v11114_v16  ;;  %v11120_v47 = vadd.f32 %v1262_v41, %v11114_v16  ;;  %v9946_v52 = vpop.f32.mrb[5].mxu0  ;;  %v9952_v55 = vpop.f32.mrb[5].mxu1 }
 0x3f6   :  { %v1219_v56 = vpop.f32.mrb[6].mxu0  ;;  %v1265_v62 = vpop.f32.mrb[6].mxu1 }
 0x3f7   :  { %v9947_v0 = vpop.f32.mrb[7].mxu0  ;;  %v9953_v1 = vpop.f32.mrb[7].mxu1  ;;  %v1544_v4 = vsel %vm1175_vm2, %v11117_v42, -inf  ;;  %v1547_v3 = vsel %vm1175_vm2, %v11120_v47, -inf }
 0x3f8   :  { %1545 = vmax.xlane.f32.xlu1 %v1544_v4  ;;  %1548 = vmax.xlane.f32.xlu0 %v1547_v3  ;;  %v872_v4 = vpop.permute.xlu1 %871 }
 0x3fc   :  { %v1308_v6 = vpop.f32.mrb[8].mxu0  ;;  %v1354_v9 = vpop.f32.mrb[8].mxu1 }
 0x3fd   :  { %v1309_v10 = vadd.f32 %v1308_v6, %v11114_v16  ;;  %v9958_v11 = vpop.f32.mrb[9].mxu0  ;;  %v9964_v12 = vpop.f32.mrb[9].mxu1  ;;  %v1355_v15 = vadd.f32 %v1354_v9, %v11114_v16 }
 0x3fe   :  { %v1311_v13 = vpop.f32.mrb[10].mxu0  ;;  %v1357_v58 = vpop.f32.mrb[10].mxu1 }
 0x3ff   :  { %v9959_v19 = vpop.f32.mrb[11].mxu0  ;;  %v9965_v23 = vpop.f32.mrb[11].mxu1  ;;  %v1550_v61 = vsel %vm1175_vm2, %v1309_v10, -inf  ;;  %v1553_v26 = vsel %vm1175_vm2, %v1355_v15, -inf }
 0x400   :  { %1551 = vmax.xlane.f32.xlu0 %v1550_v61 }
 0x404   :  { %v1400_v28 = vpop.f32.mrb[12].mxu0  ;;  %1554 = vmax.xlane.f32.xlu0 %v1553_v26  ;;  %v1446_v29 = vpop.f32.mrb[12].mxu1 }
 0x405   :  { %v1401_v30 = vadd.f32 %v1400_v28, %v11114_v16  ;;  %v1447_v18 = vadd.f32 %v1446_v29, %v11114_v16  ;;  %v9970_v31 = vpop.f32.mrb[13].mxu0  ;;  %v9976_v35 = vpop.f32.mrb[13].mxu1 }
 0x406   :  { %v1403_v36 = vpop.f32.mrb[14].mxu0  ;;  %v1449_v37 = vpop.f32.mrb[14].mxu1 }
 0x407   :  { %v9971_v20 = vpop.f32.mrb[15].mxu0  ;;  %v9977_v32 = vpop.f32.mrb[15].mxu1  ;;  %v1556_v38 = vsel %vm1175_vm2, %v1401_v30, -inf  ;;  %v1559_v33 = vsel %vm1175_vm2, %v1447_v18, -inf }
 0x408   :  { %1557 = vmax.xlane.f32.xlu1 %v1556_v38  ;;  %1560 = vmax.xlane.f32.xlu0 %v1559_v33 }
 0x40c   :  { %v1492_v44 = vpop.f32.mrb[16].mxu0  ;;  %v1538_v46 = vpop.f32.mrb[16].mxu1 }
 0x40d   :  { %v11135_v49 = vadd.f32 %v1492_v44, %v11114_v16  ;;  %v11138_v51 = vadd.f32 %v1538_v46, %v11114_v16  ;;  %v9982_v17 = vpop.f32.mrb[17].mxu0  ;;  %v9988_v41 = vpop.f32.mrb[17].mxu1 }
 0x40e   :  { %v1495_v52 = vpop.f32.mrb[18].mxu0  ;;  %v1541_v55 = vpop.f32.mrb[18].mxu1 }
 0x40f   :  { %v9983_v56 = vpop.f32.mrb[19].mxu0  ;;  %v9989_v62 = vpop.f32.mrb[19].mxu1  ;;  %v1562_v0 = vsel %vm1175_vm2, %v11135_v49, -inf  ;;  %v1565_v1 = vsel %vm1175_vm2, %v11138_v51, -inf }
 0x410   :  { %1563 = vmax.xlane.f32.xlu1 %v1562_v0  ;;  %1566 = vmax.xlane.f32.xlu0 %v1565_v1 }
 0x421   :  { %879 = vrot.lane.b32.xlu1 %v10893_v53, %s10740_s14 }
 0x425   :  { %883 = vrot.lane.b32.xlu1 %v10904_v57, %s10740_s14 }
 0x426   :  { %875 = vrot.lane.b32.xlu0 %v10883_v50, %s10740_s14 }
 0x429   :  { %873 = vrot.lane.b32.xlu1 %v10867_v48, %s10740_s14 }
 0x485   :  { %v1546_v3 = vpop.xlane.xlu1 %1545  ;;  %v1549_v6 = vpop.xlane.xlu0 %1548 }
 0x486   :  { %v1568_v9 = vsub.f32 %v11117_v42, %v1546_v3  ;;  %v1569_v11 = vsub.f32 %v11120_v47, %v1549_v6 }
 0x488   :  { %v1576_v12 = vmul.f32 1.442695, %v1568_v9  ;;  %v1578_v13 = vmul.f32 1.442695, %v1569_v11 }
 0x48a   :  { %10525 = vpow2.f32 %v1576_v12 }
 0x48b   :  { %10527 = vpow2.f32 %v1578_v13 }
 0x48d   :  { %v1552_v53 = vpop.xlane.xlu0 %1551 }
 0x48e   :  { %v1570_v58 = vsub.f32 %v1309_v10, %v1552_v53 }
 0x490   :  { %v1580_v57 = vmul.f32 1.442695, %v1570_v58 }
 0x491   :  { %v1555_v19 = vpop.xlane.xlu0 %1554 }
 0x492   :  { %10529 = vpow2.f32 %v1580_v57  ;;  %v1571_v50 = vsub.f32 %v1355_v15, %v1555_v19 }
 0x494   :  { %v11154_v23 = vpop.eup %10525  ;;  %v1582_v48 = vmul.f32 1.442695, %v1571_v50 }
 0x495   :  { %v11156_v61 = vpop.eup %10527  ;;  %v1558_v26 = vpop.xlane.xlu1 %1557  ;;  %v1592_v42 = vsel %vm1175_vm2, %v11154_v23, 0.0 }
 0x496   :  { %v1561_v28 = vpop.xlane.xlu0 %1560  ;;  %10531 = vpow2.f32 %v1582_v48  ;;  %v1572_v47 = vsub.f32 %v1401_v30, %v1558_v26  ;;  %1593 = vadd.xlane.f32.xlu1 %v1592_v42  ;;  %v1595_v10 = vsel %vm1175_vm2, %v11156_v61, 0.0 }
 0x497   :  { %v1573_v29 = vsub.f32 %v1447_v18, %v1561_v28  ;;  %1596 = vadd.xlane.f32.xlu0 %v1595_v10 }
 0x498   :  { %v1584_v31 = vmul.f32 1.442695, %v1572_v47 }
 0x499   :  { %v1586_v15 = vmul.f32 1.442695, %v1573_v29 }
 0x49a   :  { %10533 = vpow2.f32 %v1584_v31 }
 0x49b   :  { %10535 = vpow2.f32 %v1586_v15 }
 0x49c   :  { %v11162_v35 = vpop.eup %10529 }
 0x49d   :  { %v11164_v36 = vpop.xlane.xlu1 %1563  ;;  %v1598_v37 = vsel %vm1175_vm2, %v11162_v35, 0.0  ;;  %v11168_v20 = vpop.xlane.xlu0 %1566 }
 0x49e   :  { %1599 = vadd.xlane.f32.xlu1 %v1598_v37 }
 0x4a0   :  { %v11170_v30 = vpop.eup %10531 }
 0x4a1   :  { %v880_v18 = vpop.permute.xlu1 %879  ;;  %v1601_v32 = vsel %vm1175_vm2, %v11170_v30, 0.0  ;;  %v876_v46 = vpop.permute.xlu0 %875 }
 0x4a2   :  { %1602 = vadd.xlane.f32.xlu0 %v1601_v32  ;;  %v895_v33 = vcombine.low %v872_v4, %v880_v18  ;;  %v896_v44 = vcombine.high %v872_v4, %v880_v18 }
 0x4a4   :  { %v11174_v38 = vpop.eup %10533  ;;  %v903_v62 = vrot.slane %v895_v33, %v10939_v14  ;;  %v910_v0 = vrot.slane %v896_v44, %v10939_v14 }
 0x4a5   :  { %v884_v17 = vpop.permute.xlu1 %883  ;;  %v1604_v41 = vsel %vm1175_vm2, %v11174_v38, 0.0  ;;  %v11178_v52 = vpop.eup %10535 }
 0x4a6   :  { %v911_v55 = vcombine.low %v876_v46, %v884_v17  ;;  %v912_v56 = vcombine.high %v876_v46, %v884_v17  ;;  %1605 = vadd.xlane.f32.xlu0 %v1604_v41  ;;  %v1607_v4 = vsel %vm1175_vm2, %v11178_v52, 0.0 }
 0x4a8   :  { %v919_v1 = vrot.slane %v911_v55, %v10939_v14  ;;  %v926_v3 = vrot.slane %v912_v56, %v10939_v14 }
 0x4aa   :  { %v927_v6 = vcombine.low %v903_v62, %v919_v1  ;;  %v928_v9 = vcombine.high %v903_v62, %v919_v1  ;;  %v943_v11 = vcombine.low %v910_v0, %v926_v3  ;;  %v944_v12 = vcombine.high %v910_v0, %v926_v3  ;;  %1608 = vadd.xlane.f32.xlu0 %v1607_v4 }
 0x4ab   :  { %v1575_v3 = vsub.f32 %v11138_v51, %v11168_v20 }
 0x4ac   :  { %v935_v13 = vrot.slane %v927_v6, %v10951_v24  ;;  %v942_v53 = vrot.slane %v928_v9, %v10951_v24  ;;  %v951_v58 = vrot.slane %v943_v11, %v10951_v24  ;;  %v958_v57 = vrot.slane %v944_v12, %v10951_v24 }
 0x4ad   :  { %v1590_v4 = vmul.f32 1.442695, %v1575_v3 }
 0x4ae   :  { %v1031_v19 = vcombine.low %v935_v13, %v942_v53  ;;  %v9596_v50 = vcombine.high %v935_v13, %v942_v53  ;;  %v1047_v48 = vcombine.low %v951_v58, %v958_v57  ;;  %v9597_v26 = vcombine.high %v951_v58, %v958_v57 }
 0x4af   :  { %881 = vrot.lane.b32.xlu1 %v10913_v60, %s10740_s14 }
 0x4b0   :  { %v1038_v28 = vrot.slane %v1031_v19, %v10939_v14  ;;  %v1046_v42 = vrot.slane %v9596_v50, %v10939_v14  ;;  %v1054_v47 = vrot.slane %v1047_v48, %v10939_v14  ;;  %v1062_v29 = vrot.slane %v9597_v26, %v10939_v14 }
 0x4b2   :  { %v1063_v10 = vcombine.low %v1038_v28, %v1046_v42  ;;  %v1079_v31 = vcombine.low %v1054_v47, %v1062_v29  ;;  %v1064_v15 = vcombine.high %v1038_v28, %v1046_v42  ;;  %v1080_v37 = vcombine.high %v1054_v47, %v1062_v29 }
 0x4b3   :  { %885 = vrot.lane.b32.xlu1 %v10927_v2, %s10740_s14  ;;  %v1574_v2 = vsub.f32 %v11135_v49, %v11164_v36  ;;  %v874_v49 = vpop.permute.xlu1 %873 }
 0x4b4   :  { %v1071_v18 = vrot.slane %v1063_v10, %v10951_v24  ;;  %v1087_v32 = vrot.slane %v1079_v31, %v10951_v24  ;;  %v1078_v60 = vrot.slane %v1064_v15, %v10951_v24  ;;  %v1094_v33 = vrot.slane %v1080_v37, %v10951_v24 }
 0x4b5   :  { %v1588_v1 = vmul.f32 1.442695, %v1574_v2 }
 0x4b6   :  { %v1095_v44 = vcombine.low %v1071_v18, %v1087_v32  ;;  %v1096_v46 = vcombine.high %v1071_v18, %v1087_v32  ;;  %v1097_v17 = vcombine.low %v1078_v60, %v1094_v33  ;;  %v1098_v41 = vcombine.high %v1078_v60, %v1094_v33 }
 0x4b7   :  { %10537 = vpow2.f32 %v1588_v1 }
 0x4b8   :  { %v1167_v55 = vpack.c.bf16 %v1095_v44, %v1095_v44  ;;  %v1168_v56 = vpack.c.bf16 %v1096_v46, %v1096_v46  ;;  %10539 = vpow2.f32 %v1590_v4  ;;  %v1169_v57 = vpack.c.bf16 %v1097_v17, %v1097_v17 }
 0x4b9   :  { %v1170_v50 = vpack.c.bf16 %v1098_v41, %v1098_v41 }
 0x4ba   :  { %v1645_v62 = vsel %vm1643_vm4, %v1167_v55, 0  ;;  %v1691_v0 = vsel %vm1643_vm4, %v1168_v56, 0  ;;  %v1737_v28 = vsel %vm1643_vm4, %v1169_v57, 0 }
 0x4bb   :  { %9991 = vmatpush3.bf16.msra.mxu0 %v1645_v62  ;;  %9997 = vmatpush3.bf16.msra.mxu1 %v1691_v0  ;;  %v1783_v47 = vsel %vm1643_vm4, %v1170_v50, 0 }
 0x4bc   :  { %10002 = vmatprep.subr.bf16.mxu0 %v10735_v22  ;;  %10008 = vmatprep.subr.bf16.mxu1 %v10735_v22 }
 0x4c0   :  { %877 = vrot.lane.b32.xlu0 %v10910_v59, %s10740_s14 }
 0x4c1   :  { %v11212_v6 = vpop.eup %10537 }
 0x4c2   :  { %v1610_v9 = vsel %vm1175_vm2, %v11212_v6, 0.0  ;;  %v11216_v11 = vpop.eup %10539 }
 0x4c3   :  { %v1613_v59 = vsel %vm1175_vm2, %v11216_v11, 0.0 }
 0x4d7   :  { %1611 = vadd.xlane.f32.xlu1 %v1610_v9 }
 0x4df   :  { %1614 = vadd.xlane.f32.xlu0 %v1613_v59 }
 0x4f5   :  { %2314 = vrot.lane.b32.xlu0 %v10826_v21, %s10744_s1 }
 0x523   :  { %v1594_v36 = vpop.xlane.xlu1 %1593 }
 0x524   :  { %10541 = vrcp.f32 %v1594_v36  ;;  %v1597_v12 = vpop.xlane.xlu0 %1596 }
 0x525   :  { %10543 = vrcp.f32 %v1597_v12 }
 0x52b   :  { %v1600_v51 = vpop.xlane.xlu1 %1599 }
 0x52c   :  { %10545 = vrcp.f32 %v1600_v51 }
 0x52e   :  { %v10542_v20 = vpop.eup %10541 }
 0x52f   :  { %v10544_v13 = vpop.eup %10543  ;;  %v1603_v53 = vpop.xlane.xlu0 %1602  ;;  %v1624_v58 = vmul.f32 %v10542_v20, %v11154_v23 }
 0x530   :  { %10547 = vrcp.f32 %v1603_v53  ;;  %v1625_v19 = vmul.f32 %v10544_v13, %v11156_v61  ;;  %v882_v29 = vpop.permute.xlu1 %881 }
 0x531   :  { %v1632_v48 = vpack.c.bf16 %v1624_v58, %v1624_v58  ;;  %v963_v37 = vcombine.low %v874_v49, %v882_v29  ;;  %v964_v18 = vcombine.high %v874_v49, %v882_v29 }
 0x532   :  { %v1633_v26 = vpack.c.bf16 %v1625_v19, %v1625_v19 }
 0x533   :  { %9993 = vmatmul.mubr.msk.bf16.vlgmr.msra.gmra.mrb[20].mxu0 %vm1175_vm2, %v1632_v48  ;;  %v1606_v42 = vpop.xlane.xlu0 %1605  ;;  %v978_v41 = vrot.slane %v964_v18, %v10939_v14 }
 0x534   :  { %9999 = vmatmul.mubr.msk.bf16.vlgmr.msra.gmra.mrb[20].mxu1 %vm1175_vm2, %v1633_v26  ;;  %10003 = vmatpush3.bf16.msra.mxu0 %v1737_v28  ;;  %v886_v32 = vpop.permute.xlu1 %885  ;;  %10549 = vrcp.f32 %v1606_v42 }
 0x535   :  { %10009 = vmatpush3.bf16.msra.mxu1 %v1783_v47  ;;  %10004 = vmatprep.mubr.msk.bf16.mxu0 %vm10736_vm1, %v10735_v22 }
 0x536   :  { %v10546_v23 = vpop.eup %10545  ;;  %10010 = vmatprep.mubr.msk.bf16.mxu1 %vm10736_vm1, %v10735_v22  ;;  %10014 = vmatprep.subr.bf16.mxu0 %v10735_v22 }
 0x537   :  { %v1609_v61 = vpop.xlane.xlu0 %1608  ;;  %v1626_v10 = vmul.f32 %v10546_v23, %v11162_v35  ;;  %10020 = vmatprep.subr.bf16.mxu1 %v10735_v22  ;;  %v971_v35 = vrot.slane %v963_v37, %v10939_v14 }
 0x538   :  { %10551 = vrcp.f32 %v1609_v61 }
 0x539   :  { %v1634_v31 = vpack.c.bf16 %v1626_v10, %v1626_v10 }
 0x53a   :  { %v10548_v15 = vpop.eup %10547 }
 0x53b   :  { %10005 = vmatmul.mubr.msk.bf16.vlgmr.msra.gmra.mrb[24].mxu0 %vm1175_vm2, %v1634_v31  ;;  %v878_v60 = vpop.permute.xlu0 %877  ;;  %v1627_v33 = vmul.f32 %v10548_v15, %v11170_v30 }
 0x53c   :  { %v979_v44 = vcombine.low %v878_v60, %v886_v32  ;;  %v980_v46 = vcombine.high %v878_v60, %v886_v32  ;;  %10016 = vmatprep.mubr.msk.bf16.mxu0 %vm10736_vm1, %v10735_v22 }
 0x53d   :  { %v1635_v17 = vpack.c.bf16 %v1627_v33, %v1627_v33 }
 0x53e   :  { %v987_v55 = vrot.slane %v979_v44, %v10939_v14  ;;  %v994_v56 = vrot.slane %v980_v46, %v10939_v14  ;;  %v10550_v48 = vpop.eup %10549 }
 0x53f   :  { %10011 = vmatmul.mubr.msk.bf16.vlgmr.msra.gmra.mrb[24].mxu1 %vm1175_vm2, %v1635_v17  ;;  %v1628_v18 = vmul.f32 %v10550_v48, %v11174_v38 }
 0x540   :  { %v995_v62 = vcombine.low %v971_v35, %v987_v55  ;;  %v996_v0 = vcombine.high %v971_v35, %v987_v55  ;;  %v1011_v30 = vcombine.low %v978_v41, %v994_v56  ;;  %v1012_v2 = vcombine.high %v978_v41, %v994_v56  ;;  %10022 = vmatprep.mubr.msk.bf16.mxu1 %vm10736_vm1, %v10735_v22 }
 0x541   :  { %v1636_v17 = vpack.c.bf16 %v1628_v18, %v1628_v18 }
 0x542   :  { %v1003_v1 = vrot.slane %v995_v62, %v10951_v24  ;;  %v1010_v3 = vrot.slane %v996_v0, %v10951_v24  ;;  %v1019_v4 = vrot.slane %v1011_v30, %v10951_v24  ;;  %v1026_v9 = vrot.slane %v1012_v2, %v10951_v24  ;;  %v10552_v29 = vpop.eup %10551 }
 0x543   :  { %v1629_v32 = vmul.f32 %v10552_v29, %v11178_v52 }
 0x544   :  { %v1099_v59 = vcombine.low %v1003_v1, %v1010_v3  ;;  %v9598_v49 = vcombine.high %v1003_v1, %v1010_v3  ;;  %v1115_v36 = vcombine.low %v1019_v4, %v1026_v9  ;;  %v9599_v12 = vcombine.high %v1019_v4, %v1026_v9 }
 0x545   :  { %v1637_v35 = vpack.c.bf16 %v1629_v32, %v1629_v32 }
 0x546   :  { %v1106_v51 = vrot.slane %v1099_v59, %v10939_v14  ;;  %v1114_v20 = vrot.slane %v9598_v49, %v10939_v14  ;;  %v1122_v13 = vrot.slane %v1115_v36, %v10939_v14  ;;  %v1130_v53 = vrot.slane %v9599_v12, %v10939_v14 }
 0x548   :  { %v1131_v58 = vcombine.low %v1106_v51, %v1114_v20  ;;  %v1147_v57 = vcombine.low %v1122_v13, %v1130_v53  ;;  %v1132_v19 = vcombine.high %v1106_v51, %v1114_v20  ;;  %v1148_v50 = vcombine.high %v1122_v13, %v1130_v53 }
 0x54a   :  { %v1139_v26 = vrot.slane %v1131_v58, %v10951_v24  ;;  %v1155_v28 = vrot.slane %v1147_v57, %v10951_v24  ;;  %v1146_v42 = vrot.slane %v1132_v19, %v10951_v24  ;;  %v1162_v47 = vrot.slane %v1148_v50, %v10951_v24 }
 0x54c   :  { %v1163_v23 = vcombine.low %v1139_v26, %v1155_v28  ;;  %v1164_v61 = vcombine.high %v1139_v26, %v1155_v28  ;;  %v1165_v10 = vcombine.low %v1146_v42, %v1162_v47  ;;  %v1166_v31 = vcombine.high %v1146_v42, %v1162_v47 }
 0x54e   :  { %v1171_v15 = vpack.c.bf16 %v1163_v23, %v1163_v23  ;;  %v1172_v37 = vpack.c.bf16 %v1164_v61, %v1164_v61  ;;  %v1173_v44 = vpack.c.bf16 %v1165_v10, %v1165_v10  ;;  %v1174_v46 = vpack.c.bf16 %v1166_v31, %v1166_v31 }
 0x550   :  { %v1829_v60 = vsel %vm1643_vm4, %v1171_v15, 0  ;;  %v1875_v33 = vsel %vm1643_vm4, %v1172_v37, 0  ;;  %v1921_v38 = vsel %vm1643_vm4, %v1173_v44, 0  ;;  %v1967_v52 = vsel %vm1643_vm4, %v1174_v46, 0 }
 0x551   :  { %10015 = vmatpush3.bf16.msra.mxu0 %v1829_v60  ;;  %10021 = vmatpush3.bf16.msra.mxu1 %v1875_v33 }
 0x552   :  { %10026 = vmatprep.subr.bf16.mxu0 %v10735_v22  ;;  %10032 = vmatprep.subr.bf16.mxu1 %v10735_v22 }
 0x554   :  { %10017 = vmatmul.mubr.msk.bf16.vlgmr.msra.gmra.mrb[28].mxu0 %vm1175_vm2, %v1636_v17  ;;  %10023 = vmatmul.mubr.msk.bf16.vlgmr.msra.gmra.mrb[28].mxu1 %vm1175_vm2, %v1637_v35 }
 0x555   :  { %10027 = vmatpush3.bf16.msra.mxu0 %v1921_v38  ;;  %10033 = vmatpush3.bf16.msra.mxu1 %v1967_v52 }
 0x556   :  { %10028 = vmatprep.mubr.msk.bf16.mxu0 %vm10736_vm1, %v10735_v22  ;;  %10034 = vmatprep.mubr.msk.bf16.mxu1 %vm10736_vm1, %v10735_v22 }
 0x557   :  { %10038 = vmatprep.subr.bf16.mxu0 %v10735_v22  ;;  %10046 = vmatprep.subr.bf16.mxu1 %v10735_v22 }
 0x564   :  { %v1612_v41 = vpop.xlane.xlu1 %1611 }
 0x565   :  { %10553 = vrcp.f32 %v1612_v41 }
 0x56c   :  { %v1615_v55 = vpop.xlane.xlu0 %1614 }
 0x56d   :  { %10555 = vrcp.f32 %v1615_v55 }
 0x56f   :  { %v10554_v56 = vpop.eup %10553 }
 0x570   :  { %v1630_v62 = vmul.f32 %v10554_v56, %v11212_v6 }
 0x572   :  { %v1638_v0 = vpack.c.bf16 %v1630_v62, %v1630_v62 }
 0x574   :  { %10029 = vmatmul.mubr.msk.bf16.vlgmr.msra.gmra.mrb[32].mxu0 %vm1175_vm2, %v1638_v0 }
 0x575   :  { %10042 = vmatprep.mubr.msk.bf16.mxu0 %vm10736_vm1, %v10735_v22 }
 0x577   :  { %v10556_v30 = vpop.eup %10555 }
 0x578   :  { %v1631_v2 = vmul.f32 %v10556_v30, %v11216_v11 }
 0x57a   :  { %v1639_v1 = vpack.c.bf16 %v1631_v2, %v1631_v2 }
 0x57c   :  { %10035 = vmatmul.mubr.msk.bf16.vlgmr.msra.gmra.mrb[32].mxu1 %vm1175_vm2, %v1639_v1 }
 0x57d   :  { %10050 = vmatprep.mubr.msk.bf16.mxu1 %vm10736_vm1, %v10735_v22 }
 0x606   :  { %v1681_v6 = vpop.f32.mrb[20].mxu0 }
 0x607   :  { %v1727_v3 = vpop.f32.mrb[20].mxu1  ;;  %v9994_v4 = vpop.f32.mrb[21].mxu0 }
 0x608   :  { %v10000_v9 = vpop.f32.mrb[21].mxu1  ;;  %v1684_v59 = vpop.f32.mrb[22].mxu0 }
 0x609   :  { %v1730_v49 = vpop.f32.mrb[22].mxu1  ;;  %v9995_v36 = vpop.f32.mrb[23].mxu0 }
 0x60a   :  { %v10001_v12 = vpop.f32.mrb[23].mxu1 }
 0x60e   :  { %v1773_v51 = vpop.f32.mrb[24].mxu0 }
 0x60f   :  { %v2009_v11 = vcombine.low %v1681_v6, %v1773_v51  ;;  %v2010_v20 = vcombine.high %v1681_v6, %v1773_v51  ;;  %v10006_v13 = vpop.f32.mrb[25].mxu0 }
 0x610   :  { %v1776_v53 = vpop.f32.mrb[26].mxu0 }
 0x611   :  { %v10007_v58 = vpop.f32.mrb[27].mxu0  ;;  %v2017_v21 = vrot.slane %v2009_v11, %v10939_v14  ;;  %v2024_v28 = vrot.slane %v2010_v20, %v10939_v14 }
 0x612   :  { %v1819_v57 = vpop.f32.mrb[24].mxu1 }
 0x613   :  { %v2025_v19 = vcombine.low %v1727_v3, %v1819_v57  ;;  %v2026_v50 = vcombine.high %v1727_v3, %v1819_v57  ;;  %v10012_v48 = vpop.f32.mrb[25].mxu1 }
 0x614   :  { %v1822_v26 = vpop.f32.mrb[26].mxu1 }
 0x615   :  { %v2033_v42 = vrot.slane %v2025_v19, %v10939_v14  ;;  %v2040_v47 = vrot.slane %v2026_v50, %v10939_v14  ;;  %v10013_v29 = vpop.f32.mrb[27].mxu1  ;;  %v2315_v26 = vpop.permute.xlu0 %2314 }
 0x616   :  { %10039 = vmatpush3.bf16.msra.mxu0 %v2315_v26 }
 0x617   :  { %v2041_v23 = vcombine.low %v2017_v21, %v2033_v42  ;;  %v2042_v61 = vcombine.high %v2017_v21, %v2033_v42  ;;  %v2057_v10 = vcombine.low %v2024_v28, %v2040_v47  ;;  %v2058_v31 = vcombine.high %v2024_v28, %v2040_v47  ;;  %10040 = vmatprep.subr.bf16.mxu0 %v10735_v22 }
 0x619   :  { %v2049_v15 = vrot.slane %v2041_v23, %v10951_v24  ;;  %v2056_v37 = vrot.slane %v2042_v61, %v10951_v24  ;;  %v2065_v18 = vrot.slane %v2057_v10, %v10951_v24  ;;  %v2072_v32 = vrot.slane %v2058_v31, %v10951_v24 }
 0x61b   :  { %v2145_v60 = vcombine.low %v2049_v15, %v2056_v37  ;;  %v9616_v33 = vcombine.high %v2049_v15, %v2056_v37  ;;  %v2161_v44 = vcombine.low %v2065_v18, %v2072_v32  ;;  %v9617_v46 = vcombine.high %v2065_v18, %v2072_v32 }
 0x61d   :  { %v2152_v17 = vrot.slane %v2145_v60, %v10939_v14  ;;  %v2160_v35 = vrot.slane %v9616_v33, %v10939_v14  ;;  %v2168_v38 = vrot.slane %v2161_v44, %v10939_v14  ;;  %v2176_v52 = vrot.slane %v9617_v46, %v10939_v14 }
 0x61f   :  { %v2178_v41 = vcombine.high %v2152_v17, %v2160_v35  ;;  %v2194_v55 = vcombine.high %v2168_v38, %v2176_v52  ;;  %v2177_v56 = vcombine.low %v2152_v17, %v2160_v35  ;;  %v2193_v62 = vcombine.low %v2168_v38, %v2176_v52 }
 0x621   :  { %v11295_v0 = vrot.slane %v2178_v41, %v10951_v24  ;;  %v11298_v30 = vrot.slane %v2194_v55, %v10951_v24  ;;  %v11301_v2 = vrot.slane %v2177_v56, %v10951_v24  ;;  %v11304_v1 = vrot.slane %v2193_v62, %v10951_v24 }
 0x623   :  { %v2212_v6 = vcombine.high %v11295_v0, %v11298_v30  ;;  %v2209_v3 = vcombine.low %v11301_v2, %v11304_v1  ;;  %v2210_v4 = vcombine.high %v11301_v2, %v11304_v1  ;;  %v2211_v9 = vcombine.low %v11295_v0, %v11298_v30 }
 0x627   :  { %v1865_v59 = vpop.f32.mrb[28].mxu0  ;;  %v1911_v49 = vpop.f32.mrb[28].mxu1 }
 0x628   :  { %v10018_v36 = vpop.f32.mrb[29].mxu0  ;;  %v10024_v12 = vpop.f32.mrb[29].mxu1 }
 0x629   :  { %v1868_v51 = vpop.f32.mrb[30].mxu0  ;;  %v1914_v11 = vpop.f32.mrb[30].mxu1 }
 0x62a   :  { %v10019_v20 = vpop.f32.mrb[31].mxu0  ;;  %v10025_v13 = vpop.f32.mrb[31].mxu1 }
 0x647   :  { %v1957_v53 = vpop.f32.mrb[32].mxu0 }
 0x648   :  { %v2077_v58 = vcombine.low %v1865_v59, %v1957_v53  ;;  %v2078_v57 = vcombine.high %v1865_v59, %v1957_v53  ;;  %v10030_v19 = vpop.f32.mrb[33].mxu0 }
 0x649   :  { %v1960_v50 = vpop.f32.mrb[34].mxu0 }
 0x64a   :  { %v10031_v48 = vpop.f32.mrb[35].mxu0  ;;  %v2085_v23 = vrot.slane %v2077_v58, %v10939_v14  ;;  %v2092_v61 = vrot.slane %v2078_v57, %v10939_v14 }
 0x64f   :  { %v2003_v21 = vpop.f32.mrb[32].mxu1 }
 0x650   :  { %v2093_v28 = vcombine.low %v1911_v49, %v2003_v21  ;;  %v2094_v42 = vcombine.high %v1911_v49, %v2003_v21  ;;  %v10036_v47 = vpop.f32.mrb[33].mxu1 }
 0x651   :  { %v2006_v29 = vpop.f32.mrb[34].mxu1 }
 0x652   :  { %v2101_v10 = vrot.slane %v2093_v28, %v10939_v14  ;;  %v2108_v31 = vrot.slane %v2094_v42, %v10939_v14  ;;  %v10037_v15 = vpop.f32.mrb[35].mxu1 }
 0x654   :  { %v2109_v37 = vcombine.low %v2085_v23, %v2101_v10  ;;  %v2110_v18 = vcombine.high %v2085_v23, %v2101_v10  ;;  %v2125_v32 = vcombine.low %v2092_v61, %v2108_v31  ;;  %v2126_v60 = vcombine.high %v2092_v61, %v2108_v31 }
 0x656   :  { %v2117_v33 = vrot.slane %v2109_v37, %v10951_v24  ;;  %v2124_v44 = vrot.slane %v2110_v18, %v10951_v24  ;;  %v2133_v46 = vrot.slane %v2125_v32, %v10951_v24  ;;  %v2140_v17 = vrot.slane %v2126_v60, %v10951_v24 }
 0x658   :  { %v2213_v35 = vcombine.low %v2117_v33, %v2124_v44  ;;  %v9618_v38 = vcombine.high %v2117_v33, %v2124_v44  ;;  %v2229_v52 = vcombine.low %v2133_v46, %v2140_v17  ;;  %v9619_v41 = vcombine.high %v2133_v46, %v2140_v17 }
 0x65a   :  { %v2220_v55 = vrot.slane %v2213_v35, %v10939_v14  ;;  %v2228_v56 = vrot.slane %v9618_v38, %v10939_v14  ;;  %v2236_v62 = vrot.slane %v2229_v52, %v10939_v14  ;;  %v2244_v0 = vrot.slane %v9619_v41, %v10939_v14  ;;  %v10685_v38 = vld [vmem:[%s12918_s5] sm:$0xf] }
 0x65b   :  { %v137_v52 = vsub.s32 1, %v10805_v5 }
 0x65c   :  { %v2246_v30 = vcombine.high %v2220_v55, %v2228_v56  ;;  %v2262_v59 = vcombine.high %v2236_v62, %v2244_v0  ;;  %v2245_v49 = vcombine.low %v2220_v55, %v2228_v56  ;;  %v2261_v36 = vcombine.low %v2236_v62, %v2244_v0 }
 0x65e   :  { %v2260_v12 = vrot.slane %v2246_v30, %v10951_v24  ;;  %v2276_v51 = vrot.slane %v2262_v59, %v10951_v24  ;;  %v2253_v11 = vrot.slane %v2245_v49, %v10951_v24  ;;  %v2269_v20 = vrot.slane %v2261_v36, %v10951_v24 }
 0x660   :  { %v2280_v13 = vcombine.high %v2260_v12, %v2276_v51  ;;  %v2278_v53 = vcombine.high %v2253_v11, %v2269_v20  ;;  %v2277_v58 = vcombine.low %v2253_v11, %v2269_v20  ;;  %v2279_v57 = vcombine.low %v2260_v12, %v2276_v51  ;;  %v11372_v51 = vld [vmem:[%s12916_s3] sm:$0xff]  ;;  %v11378_v20 = vld [vmem:[%s12916_s3 + $0x8] sm:$0xff] }
 0x661   :  { %v2413_v11 = vrot.slane %v11372_v51, 4 }
 0x662   :  { %v10457_v19 = vpack.i.bf16 %v2280_v13, %v2212_v6  ;;  %v10447_v50 = vpack.i.bf16 %v2278_v53, %v2210_v4  ;;  %v10452_v48 = vpack.i.bf16 %v2279_v57, %v2211_v9  ;;  %v2414_v13 = vrot.slane %v11378_v20, 4  ;;  %v11390_v57 = vld [vmem:[%s12916_s3 + $0x18] sm:$0xff] }
 0x664   :  { %10458 = vrot.lane.b32.xlu0 %v10457_v19, %s10745_s15  ;;  %10448 = vrot.lane.b32.xlu1 %v10447_v50, %s10746_s16  ;;  %v9621_v53 = vcombine.low %v2413_v11, %v2414_v13  ;;  %v2416_v19 = vrot.slane %v11390_v57, 4 }
 0x666   :  { %10047 = vmatpush3.bf16.msra.mxu1 %v9621_v53 }
 0x667   :  { %10048 = vmatprep.subr.bf16.mxu1 %v10735_v22 }
 0x668   :  { %10453 = vrot.lane.b32.xlu1 %v10452_v48, %s10747_s17  ;;  %2320 = vrot.lane.b32.xlu0 %v10861_v43, %s10744_s1 }
 0x66c   :  { %2316 = vrot.lane.b32.xlu1 %v10838_v25, %s10744_s1 }
 0x6d6   :  { %v10449_v26 = vpop.permute.xlu1 %10448  ;;  %v10459_v4 = vpop.permute.xlu0 %10458 }
 0x6d7   :  { %v10451_v21 = vunpack.i.h.bf16 %v10449_v26  ;;  %v10450_v6 = vunpack.i.l.bf16 %v10449_v26  ;;  %v10461_v47 = vunpack.i.h.bf16 %v10459_v4  ;;  %v10460_v29 = vunpack.i.l.bf16 %v10459_v4 }
 0x6d9   :  { %v2305_v23 = vsel %vm1175_vm2, %v2209_v3, %v10450_v6  ;;  %v2306_v43 = vsel %vm1175_vm2, %v2277_v58, %v10451_v21  ;;  %v11384_v58 = vld [vmem:[%s12916_s3 + $0x10] sm:$0xff] }
 0x6da   :  { %v10454_v9 = vpop.permute.xlu1 %10453  ;;  %v2321_v2 = vpop.permute.xlu0 %2320 }
 0x6db   :  { %v10456_v28 = vunpack.i.h.bf16 %v10454_v9  ;;  %v10455_v42 = vunpack.i.l.bf16 %v10454_v9 }
 0x6dd   :  { %v2308_v25 = vsel %vm2307_vm5, %v2305_v23, %v10455_v42  ;;  %v2309_v61 = vsel %vm2307_vm5, %v2306_v43, %v10456_v28 }
 0x6de   :  { %v2311_v10 = vsel %vm2310_vm6, %v2308_v25, %v10460_v29  ;;  %v2312_v31 = vsel %vm2310_vm6, %v2309_v61, %v10461_v47  ;;  %v2317_v15 = vpop.permute.xlu1 %2316  ;;  %v2369_v25 = vrot.slane %v10685_v38, 1 }
 0x6df   :  { %v2313_v37 = vpack.c.bf16 %v2312_v31, %v2311_v10  ;;  %10041 = vmatpush3.bf16.msra.mxu0 %v2317_v15 }
 0x6e0   :  { %10054 = vmatprep.subr.bf16.mxu0 %v10735_v22 }
 0x6e2   :  { %10043 = vmatmul.mubr.msk.bf16.vlgmr.msra.gmra.mrb[36].mxu0 %vm61_vm0, %v2313_v37 }
 0x6e3   :  { %10056 = vmatprep.mubr.msk.bf16.mxu0 %vm10736_vm1, %v10735_v22 }
 0x7b5   :  { %v2360_v1 = vpop.f32.mrb[36].mxu0 }
 0x7b6   :  { %v2361_v3 = vadd.f32 %v2360_v1, %v2321_v2  ;;  %v10044_v18 = vpop.f32.mrb[37].mxu0 }
 0x7b7   :  { %v2363_v32 = vpop.f32.mrb[38].mxu0 }
 0x7b8   :  { %v2364_v60 = vadd.f32 %v2363_v32, %v2321_v2  ;;  %v10045_v33 = vpop.f32.mrb[39].mxu0  ;;  %v2367_v44 = vadd.f32 %v2361_v3, %v10848_v39  ;;  %v10686_v39 = vld [vmem:[%s12918_s5 + $0x8] sm:$0xf] }
 0x7b9   :  { %v138_v41 = vrot.slane %v10686_v39, %v137_v52 }
 0x7ba   :  { %v2373_v46 = vsel %vm61_vm0, %v2367_v44, 0.0  ;;  %v2368_v17 = vadd.f32 %v2364_v60, %v10850_v40 }
 0x7bb   :  { %2374 = vadd.xlane.f32.xlu1 %v2373_v46 }
 0x7bc   :  { %v2376_v35 = vsel %vm61_vm0, %v2368_v17, 0.0 }
 0x7bd   :  { %2377 = vadd.xlane.f32.xlu0 %v2376_v35 }
 0x7cc   :  { %2370 = vrot.lane.b32.xlu1 %v10685_v38, %s10734_s0 }
 0x7d0   :  { %153 = vrot.lane.b32.xlu1 %v138_v41, %s10740_s14 }
 0x7d4   :  { %2417 = vrot.lane.b32.xlu1 %v10685_v38, %s10740_s14 }
 0x848   :  { %v2375_v40 = vpop.xlane.xlu1 %2374 }
 0x849   :  { %v2379_v55 = vmul.f32 0.03125, %v2375_v40 }
 0x84a   :  { %v2378_v56 = vpop.xlane.xlu0 %2377 }
 0x84b   :  { %v2381_v62 = vsub.f32 %v2367_v44, %v2379_v55  ;;  %v2380_v0 = vmul.f32 0.03125, %v2378_v56 }
 0x84c   :  { %v11395_v26 = vpop.permute.xlu1 %2370 }
 0x84d   :  { %v2382_v30 = vsub.f32 %v2368_v17, %v2380_v0  ;;  %v2383_v59 = vmul.f32 %v2381_v62, %v2381_v62  ;;  %v2372_v61 = vrot.slane %v11395_v26, 1 }
 0x84f   :  { %v2385_v49 = vsel %vm61_vm0, %v2383_v59, 0.0  ;;  %v2384_v36 = vmul.f32 %v2382_v30, %v2382_v30  ;;  %v2409_v37 = vrot.slane %v2372_v61, %v10811_v7 }
 0x850   :  { %2386 = vadd.xlane.f32.xlu0 %v2385_v49  ;;  %v154_v28 = vpop.permute.xlu1 %153 }
 0x851   :  { %v2388_v12 = vsel %vm61_vm0, %v2384_v36, 0.0 }
 0x854   :  { %2389 = vadd.xlane.f32.xlu0 %v2388_v12  ;;  %v11430_v60 = vpop.permute.xlu1 %2417 }
 0x86a   :  { %151 = vrot.lane.b32.xlu0 %v10814_v8, %s10740_s14  ;;  %v2415_v8 = vrot.slane %v11384_v58, 4 }
 0x86c   :  { %v9622_v50 = vcombine.low %v2415_v8, %v2416_v19 }
 0x86e   :  { %10049 = vmatpush3.bf16.msra.mxu1 %v9622_v50 }
 0x86f   :  { %10060 = vmatprep.subr.bf16.mxu1 %v10735_v22 }
 0x8dd   :  { %v2387_v48 = vpop.xlane.xlu0 %2386 }
 0x8de   :  { %v2391_v21 = vmul.f32 0.03125, %v2387_v48 }
 0x8e0   :  { %v2393_v6 = vadd.f32 1e-05, %v2391_v21 }
 0x8e1   :  { %v2390_v4 = vpop.xlane.xlu0 %2389 }
 0x8e2   :  { %10557 = vrsqrt.f32 %v2393_v6  ;;  %v2392_v9 = vmul.f32 0.03125, %v2390_v4 }
 0x8e4   :  { %v2394_v42 = vadd.f32 1e-05, %v2392_v9 }
 0x8e5   :  { %v152_v47 = vpop.permute.xlu0 %151 }
 0x8e6   :  { %10559 = vrsqrt.f32 %v2394_v42  ;;  %v156_v29 = vsel %vm155_vm7, %v152_v47, %v154_v28 }
 0x8e7   :  { %v11399_v23 = vadd.f32 %v11108_v34, %v156_v29  ;;  %v11402_v43 = vadd.f32 %v11110_v45, %v156_v29  ;;  %v2402_v45 = vrot.slane %v2369_v25, %v10811_v7 }
 0x8e9   :  { %202 = vst [vmem:[%s12921_s8] sm:$0xff] %v11399_v23  ;;  %203 = vst [vmem:[%s12921_s8 + $0x8] sm:$0xff] %v11402_v43  ;;  %2786 = vrot.lane.b32.xlu0 %v11399_v23, %s10738_s22  ;;  %2780 = vrot.lane.b32.xlu1 %v11399_v23, %s10737_s21 }
 0x8ec   :  { %v10558_v34 = vpop.eup %10557 }
 0x8ed   :  { %v2397_v10 = vmul.f32 %v10558_v34, %v2381_v62  ;;  %2792 = vrot.lane.b32.xlu1 %v11399_v23, %s10739_s23 }
 0x8ef   :  { %v2404_v15 = vmul.f32 %v2402_v45, %v2397_v10 }
 0x8f0   :  { %v10560_v31 = vpop.eup %10559 }
 0x8f1   :  { %v2398_v2 = vmul.f32 %v10560_v31, %v2382_v30  ;;  %v11421_v3 = vadd.f32 %v2409_v37, %v2404_v15 }
 0x8f3   :  { %v2405_v1 = vmul.f32 %v2402_v45, %v2398_v2 }
 0x8f5   :  { %v11423_v18 = vadd.f32 %v2409_v37, %v2405_v1  ;;  %v2419_v1 = vrot.slane %v11430_v60, 1 }
 0x8f7   :  { %v2420_v32 = vpack.c.bf16 %v11423_v18, %v11421_v3 }
 0x8f9   :  { %10051 = vmatmul.mubr.msk.bf16.vlgmr.msra.gmra.mrb[36].mxu1 %vm61_vm0, %v2420_v32  ;;  %v2424_v32 = vrot.slane %v2419_v1, %v10811_v7 }
 0x8fa   :  { %10062 = vmatprep.mubr.msk.bf16.mxu1 %vm10736_vm1, %v10735_v22 }
 0x95b   :  { %v11432_v33 = vpop.permute.xlu0 %2786  ;;  %v11434_v44 = vpop.permute.xlu1 %2780 }
 0x95c   :  { %v2798_v46 = vcombine.low %v11399_v23, %v11432_v33  ;;  %v2799_v17 = vcombine.high %v11399_v23, %v11432_v33 }
 0x95e   :  { %v2806_v39 = vrot.slane %v2798_v46, %v10939_v14  ;;  %v2813_v41 = vrot.slane %v2799_v17, %v10939_v14 }
 0x95f   :  { %v11440_v35 = vpop.permute.xlu1 %2792 }
 0x960   :  { %v2814_v38 = vcombine.low %v11434_v44, %v11440_v35  ;;  %v2815_v52 = vcombine.high %v11434_v44, %v11440_v35 }
 0x962   :  { %v2822_v40 = vrot.slane %v2814_v38, %v10939_v14  ;;  %v2829_v55 = vrot.slane %v2815_v52, %v10939_v14 }
 0x964   :  { %v2830_v56 = vcombine.low %v2806_v39, %v2822_v40  ;;  %v2831_v62 = vcombine.high %v2806_v39, %v2822_v40  ;;  %v2846_v0 = vcombine.low %v2813_v41, %v2829_v55  ;;  %v2847_v30 = vcombine.high %v2813_v41, %v2829_v55 }
 0x966   :  { %v2838_v59 = vrot.slane %v2830_v56, %v10951_v24  ;;  %v2845_v49 = vrot.slane %v2831_v62, %v10951_v24  ;;  %v2854_v36 = vrot.slane %v2846_v0, %v10951_v24  ;;  %v2861_v12 = vrot.slane %v2847_v30, %v10951_v24 }
 0x968   :  { %v2934_v11 = vcombine.low %v2838_v59, %v2845_v49  ;;  %v9628_v13 = vcombine.high %v2838_v59, %v2845_v49  ;;  %v2950_v53 = vcombine.low %v2854_v36, %v2861_v12  ;;  %v9629_v8 = vcombine.high %v2854_v36, %v2861_v12 }
 0x96a   :  { %v2941_v19 = vrot.slane %v2934_v11, %v10939_v14  ;;  %v2949_v50 = vrot.slane %v9628_v13, %v10939_v14  ;;  %v2957_v48 = vrot.slane %v2950_v53, %v10939_v14  ;;  %v2965_v21 = vrot.slane %v9629_v8, %v10939_v14 }
 0x96c   :  { %v2966_v6 = vcombine.low %v2941_v19, %v2949_v50  ;;  %v2982_v4 = vcombine.low %v2957_v48, %v2965_v21  ;;  %v2967_v9 = vcombine.high %v2941_v19, %v2949_v50  ;;  %v2983_v28 = vcombine.high %v2957_v48, %v2965_v21 }
 0x96e   :  { %v2974_v42 = vrot.slane %v2966_v6, %v10951_v24  ;;  %v2990_v47 = vrot.slane %v2982_v4, %v10951_v24  ;;  %v2981_v29 = vrot.slane %v2967_v9, %v10951_v24  ;;  %v2997_v25 = vrot.slane %v2983_v28, %v10951_v24 }
 0x970   :  { %v2998_v34 = vcombine.low %v2974_v42, %v2990_v47  ;;  %v2999_v45 = vcombine.high %v2974_v42, %v2990_v47  ;;  %v11462_v61 = vcombine.low %v2981_v29, %v2997_v25  ;;  %v11464_v10 = vcombine.high %v2981_v29, %v2997_v25 }
 0x972   :  { %v3070_v31 = vpack.c.bf16 %v2998_v34, %v2998_v34  ;;  %v3071_v15 = vpack.c.bf16 %v2999_v45, %v2999_v45 }
 0x974   :  { %v3396_v37 = vsel %vm1175_vm2, %v3070_v31, 0  ;;  %v3442_v2 = vsel %vm1175_vm2, %v3071_v15, 0 }
 0x975   :  { %10055 = vmatpush3.bf16.xpose.msra.mxu0 %v3396_v37  ;;  %10061 = vmatpush3.bf16.xpose.msra.mxu1 %v3442_v2 }
 0x976   :  { %10066 = vmatprep.subr.bf16.mxu0 %v10735_v22  ;;  %10072 = vmatprep.subr.bf16.mxu1 %v10735_v22 }
 0x9cc   :  { %v2471_v46 = vpop.f32.mrb[36].mxu1 }
 0x9cd   :  { %v2472_v17 = vadd.f32 %v2471_v46, %v2424_v32  ;;  %v10052_v38 = vpop.f32.mrb[37].mxu1 }
 0x9ce   :  { %v2474_v52 = vpop.f32.mrb[38].mxu1 }
 0x9cf   :  { %2486 = vrot.lane.b32.xlu1 %v2472_v17, %s10738_s22  ;;  %2480 = vrot.lane.b32.xlu0 %v2472_v17, %s10737_s21  ;;  %v10053_v39 = vpop.f32.mrb[39].mxu1  ;;  %v11481_v41 = vadd.f32 %v2474_v52, %v2424_v32  ;;  %v3072_v52 = vpack.c.bf16 %v11462_v61, %v11462_v61 }
 0x9d0   :  { %v3073_v39 = vpack.c.bf16 %v11464_v10, %v11464_v10 }
 0x9d3   :  { %2782 = vrot.lane.b32.xlu1 %v11402_v43, %s10737_s21  ;;  %2492 = vrot.lane.b32.xlu0 %v2472_v17, %s10739_s23 }
 0x9d7   :  { %2794 = vrot.lane.b32.xlu1 %v11402_v43, %s10739_s23  ;;  %2788 = vrot.lane.b32.xlu0 %v11402_v43, %s10738_s22 }
 0x9db   :  { %2488 = vrot.lane.b32.xlu1 %v11481_v41, %s10738_s22  ;;  %2482 = vrot.lane.b32.xlu0 %v11481_v41, %s10737_s21 }
 0x9df   :  { %3078 = vrot.lane.b32.xlu1 %v11399_v23, %s10734_s0  ;;  %2494 = vrot.lane.b32.xlu0 %v11481_v41, %s10739_s23 }
 0xa41   :  { %v2487_v40 = vpop.permute.xlu1 %2486  ;;  %v2481_v55 = vpop.permute.xlu0 %2480 }
 0xa42   :  { %v2498_v56 = vcombine.low %v2472_v17, %v2487_v40  ;;  %v2499_v62 = vcombine.high %v2472_v17, %v2487_v40 }
 0xa44   :  { %v2506_v36 = vrot.slane %v2498_v56, %v10939_v14  ;;  %v2513_v12 = vrot.slane %v2499_v62, %v10939_v14 }
 0xa45   :  { %v11491_v0 = vpop.permute.xlu1 %2782  ;;  %v2493_v30 = vpop.permute.xlu0 %2492 }
 0xa46   :  { %v2514_v59 = vcombine.low %v2481_v55, %v2493_v30  ;;  %v2515_v49 = vcombine.high %v2481_v55, %v2493_v30 }
 0xa48   :  { %v2522_v11 = vrot.slane %v2514_v59, %v10939_v14  ;;  %v2529_v23 = vrot.slane %v2515_v49, %v10939_v14 }
 0xa49   :  { %v11497_v13 = vpop.permute.xlu1 %2794  ;;  %v11499_v53 = vpop.permute.xlu0 %2788 }
 0xa4a   :  { %v2530_v8 = vcombine.low %v2506_v36, %v2522_v11  ;;  %v2531_v19 = vcombine.high %v2506_v36, %v2522_v11  ;;  %v2546_v50 = vcombine.low %v2513_v12, %v2529_v23  ;;  %v2547_v48 = vcombine.high %v2513_v12, %v2529_v23 }
 0xa4b   :  { %v2882_v21 = vcombine.low %v11491_v0, %v11497_v13  ;;  %v2883_v6 = vcombine.high %v11491_v0, %v11497_v13  ;;  %v2866_v4 = vcombine.low %v11402_v43, %v11499_v53  ;;  %v2867_v9 = vcombine.high %v11402_v43, %v11499_v53 }
 0xa4c   :  { %v2538_v28 = vrot.slane %v2530_v8, %v10951_v24  ;;  %v2545_v42 = vrot.slane %v2531_v19, %v10951_v24  ;;  %v2554_v47 = vrot.slane %v2546_v50, %v10951_v24  ;;  %v2561_v29 = vrot.slane %v2547_v48, %v10951_v24 }
 0xa4d   :  { %v2890_v25 = vrot.slane %v2882_v21, %v10939_v14  ;;  %v2897_v34 = vrot.slane %v2883_v6, %v10939_v14  ;;  %v2874_v45 = vrot.slane %v2866_v4, %v10939_v14  ;;  %v2881_v31 = vrot.slane %v2867_v9, %v10939_v14  ;;  %v2483_v15 = vpop.permute.xlu0 %2482  ;;  %v2489_v46 = vpop.permute.xlu1 %2488 }
 0xa4e   :  { %v2634_v37 = vcombine.low %v2538_v28, %v2545_v42  ;;  %v9624_v2 = vcombine.high %v2538_v28, %v2545_v42  ;;  %v2650_v1 = vcombine.low %v2554_v47, %v2561_v29  ;;  %v9625_v32 = vcombine.high %v2554_v47, %v2561_v29 }
 0xa4f   :  { %v2898_v17 = vcombine.low %v2874_v45, %v2890_v25  ;;  %v2899_v38 = vcombine.high %v2874_v45, %v2890_v25  ;;  %v2914_v30 = vcombine.low %v2881_v31, %v2897_v34  ;;  %v2915_v59 = vcombine.high %v2881_v31, %v2897_v34 }
 0xa50   :  { %v2641_v40 = vrot.slane %v2634_v37, %v10939_v14  ;;  %v2649_v55 = vrot.slane %v9624_v2, %v10939_v14  ;;  %v2657_v56 = vrot.slane %v2650_v1, %v10939_v14  ;;  %v2665_v62 = vrot.slane %v9625_v32, %v10939_v14 }
 0xa51   :  { %v2566_v49 = vcombine.low %v11481_v41, %v2489_v46  ;;  %v2567_v36 = vcombine.high %v11481_v41, %v2489_v46  ;;  %v2495_v12 = vpop.permute.xlu0 %2494  ;;  %v2906_v50 = vrot.slane %v2898_v17, %v10951_v24  ;;  %v2913_v48 = vrot.slane %v2899_v38, %v10951_v24 }
 0xa52   :  { %v2666_v11 = vcombine.low %v2641_v40, %v2649_v55  ;;  %v2667_v61 = vcombine.high %v2641_v40, %v2649_v55  ;;  %v2682_v23 = vcombine.low %v2657_v56, %v2665_v62  ;;  %v2683_v8 = vcombine.high %v2657_v56, %v2665_v62 }
 0xa53   :  { %v2582_v10 = vcombine.low %v2483_v15, %v2495_v12  ;;  %v2583_v19 = vcombine.high %v2483_v15, %v2495_v12  ;;  %v2574_v21 = vrot.slane %v2566_v49, %v10939_v14  ;;  %v2581_v6 = vrot.slane %v2567_v36, %v10939_v14 }
 0xa54   :  { %v2674_v4 = vrot.slane %v2666_v11, %v10951_v24  ;;  %v2690_v9 = vrot.slane %v2682_v23, %v10951_v24  ;;  %v2681_v42 = vrot.slane %v2667_v61, %v10951_v24  ;;  %v2697_v47 = vrot.slane %v2683_v8, %v10951_v24 }
 0xa55   :  { %v2590_v41 = vrot.slane %v2582_v10, %v10939_v14  ;;  %v2597_v28 = vrot.slane %v2583_v19, %v10939_v14  ;;  %v2922_v34 = vrot.slane %v2914_v30, %v10951_v24  ;;  %v2929_v45 = vrot.slane %v2915_v59, %v10951_v24 }
 0xa56   :  { %v2698_v29 = vcombine.low %v2674_v4, %v2690_v9  ;;  %v2699_v25 = vcombine.high %v2674_v4, %v2690_v9  ;;  %v3488_v46 = vsel %vm1175_vm2, %v3072_v52, 0  ;;  %v3534_v56 = vsel %vm1175_vm2, %v3073_v39, 0 }
 0xa57   :  { %v2598_v31 = vcombine.low %v2574_v21, %v2590_v41  ;;  %v2599_v15 = vcombine.high %v2574_v21, %v2590_v41  ;;  %v2614_v37 = vcombine.low %v2581_v6, %v2597_v28  ;;  %v2615_v2 = vcombine.high %v2581_v6, %v2597_v28 }
 0xa58   :  { %v2770_v1 = vpack.c.bf16 %v2698_v29, %v2698_v29  ;;  %v2771_v32 = vpack.c.bf16 %v2699_v25, %v2699_v25  ;;  %v3002_v62 = vcombine.low %v2906_v50, %v2913_v48  ;;  %v9630_v30 = vcombine.high %v2906_v50, %v2913_v48 }
 0xa59   :  { %v2606_v17 = vrot.slane %v2598_v31, %v10951_v24  ;;  %v2613_v38 = vrot.slane %v2599_v15, %v10951_v24  ;;  %v2622_v40 = vrot.slane %v2614_v37, %v10951_v24  ;;  %v2629_v55 = vrot.slane %v2615_v2, %v10951_v24 }
 0xa5a   :  { %10057 = vmatmul.mubr.msk.bf16.vlgmr.msra.gmra.mrb[40].mxu0 %vm1175_vm2, %v2770_v1  ;;  %10063 = vmatmul.mubr.msk.bf16.vlgmr.msra.gmra.mrb[40].mxu1 %vm1175_vm2, %v2771_v32  ;;  %v3018_v59 = vcombine.low %v2922_v34, %v2929_v45  ;;  %v2700_v12 = vcombine.low %v2681_v42, %v2697_v47  ;;  %v3009_v61 = vrot.slane %v3002_v62, %v10939_v14 }
 0xa5b   :  { %v2702_v49 = vcombine.low %v2606_v17, %v2613_v38  ;;  %v9626_v36 = vcombine.high %v2606_v17, %v2613_v38  ;;  %v2718_v52 = vcombine.low %v2622_v40, %v2629_v55  ;;  %10067 = vmatpush3.bf16.xpose.msra.mxu0 %v3488_v46  ;;  %v9627_v11 = vcombine.high %v2622_v40, %v2629_v55 }
 0xa5c   :  { %10073 = vmatpush3.bf16.xpose.msra.mxu1 %v3534_v56  ;;  %10068 = vmatprep.mubr.msk.bf16.mxu0 %vm10736_vm1, %v10735_v22  ;;  %v3017_v23 = vrot.slane %v9630_v30, %v10939_v14  ;;  %v2701_v39 = vcombine.high %v2681_v42, %v2697_v47  ;;  %v3025_v8 = vrot.slane %v3018_v59, %v10939_v14 }
 0xa5d   :  { %10074 = vmatprep.mubr.msk.bf16.mxu1 %vm10736_vm1, %v10735_v22  ;;  %10078 = vmatprep.subr.bf16.mxu0 %v10735_v22  ;;  %v9631_v10 = vcombine.high %v2922_v34, %v2929_v45  ;;  %v2709_v50 = vrot.slane %v2702_v49, %v10939_v14  ;;  %v2772_v48 = vpack.c.bf16 %v2700_v12, %v2700_v12 }
 0xa5e   :  { %10084 = vmatprep.subr.bf16.mxu1 %v10735_v22  ;;  %v3034_v19 = vcombine.low %v3009_v61, %v3017_v23  ;;  %v2717_v21 = vrot.slane %v9626_v36, %v10939_v14  ;;  %v2725_v6 = vrot.slane %v2718_v52, %v10939_v14  ;;  %v2733_v4 = vrot.slane %v9627_v11, %v10939_v14 }
 0xa5f   :  { %v3033_v9 = vrot.slane %v9631_v10, %v10939_v14  ;;  %v2773_v41 = vpack.c.bf16 %v2701_v39, %v2701_v39  ;;  %v3035_v47 = vcombine.high %v3009_v61, %v3017_v23 }
 0xa60   :  { %v3042_v28 = vrot.slane %v3034_v19, %v10951_v24  ;;  %v2734_v25 = vcombine.low %v2709_v50, %v2717_v21  ;;  %v2750_v34 = vcombine.low %v2725_v6, %v2733_v4  ;;  %v2735_v62 = vcombine.high %v2709_v50, %v2717_v21 }
 0xa61   :  { %v3050_v42 = vcombine.low %v3025_v8, %v3033_v9  ;;  %v3051_v29 = vcombine.high %v3025_v8, %v3033_v9  ;;  %v3049_v37 = vrot.slane %v3035_v47, %v10951_v24  ;;  %v2751_v30 = vcombine.high %v2725_v6, %v2733_v4 }
 0xa62   :  { %10069 = vmatmul.mubr.msk.bf16.vlgmr.msra.gmra.mrb[44].mxu0 %vm1175_vm2, %v2772_v48  ;;  %v2742_v46 = vrot.slane %v2734_v25, %v10951_v24  ;;  %v2758_v17 = vrot.slane %v2750_v34, %v10951_v24  ;;  %v2749_v61 = vrot.slane %v2735_v62, %v10951_v24  ;;  %v10748_v21 = vmov 1966171168  }
 0xa63   :  { %10075 = vmatmul.mubr.msk.bf16.vlgmr.msra.gmra.mrb[44].mxu1 %vm1175_vm2, %v2773_v41  ;;  %10080 = vmatprep.mubr.msk.bf16.mxu0 %vm10736_vm1, %v10735_v22  ;;  %v3058_v45 = vrot.slane %v3050_v42, %v10951_v24  ;;  %v3065_v2 = vrot.slane %v3051_v29, %v10951_v24  ;;  %v2765_v23 = vrot.slane %v2751_v30, %v10951_v24  ;;  %v119_v6 = vunpack.c.l.s4 %v10748_v21  ;;  %v9581_v41 = vld.sshfl [vmem:[%s12915_s2] sm:$0x11 pattern:$0x75316420] }
 0xa64   :  { %10086 = vmatprep.mubr.msk.bf16.mxu1 %vm10736_vm1, %v10735_v22  ;;  %v2766_v59 = vcombine.low %v2742_v46, %v2758_v17  ;;  %v2767_v49 = vcombine.high %v2742_v46, %v2758_v17 }
 0xa65   :  { %v3066_v31 = vcombine.low %v3042_v28, %v3058_v45  ;;  %v3067_v15 = vcombine.high %v3042_v28, %v3058_v45  ;;  %v3068_v55 = vcombine.low %v3049_v37, %v3065_v2  ;;  %v3069_v56 = vcombine.high %v3049_v37, %v3065_v2 }
 0xa66   :  { %v2774_v12 = vpack.c.bf16 %v2766_v59, %v2766_v59  ;;  %v2775_v11 = vpack.c.bf16 %v2767_v49, %v2767_v49  ;;  %v2768_v10 = vcombine.low %v2749_v61, %v2765_v23  ;;  %v2769_v19 = vcombine.high %v2749_v61, %v2765_v23 }
 0xa67   :  { %v3074_v1 = vpack.c.bf16 %v3066_v31, %v3066_v31  ;;  %v3075_v32 = vpack.c.bf16 %v3067_v15, %v3067_v15  ;;  %v3076_v36 = vpack.c.bf16 %v3068_v55, %v3068_v55  ;;  %v3077_v52 = vpack.c.bf16 %v3069_v56, %v3069_v56 }
 0xa68   :  { %v2776_v50 = vpack.c.bf16 %v2768_v10, %v2768_v10  ;;  %v2777_v48 = vpack.c.bf16 %v2769_v19, %v2769_v19  ;;  %v120_v4 = vunpack.c.0.s8 %v119_v6 }
 0xa69   :  { %v3580_v38 = vsel %vm1175_vm2, %v3074_v1, 0  ;;  %v3626_v40 = vsel %vm1175_vm2, %v3075_v32, 0  ;;  %v3672_v39 = vsel %vm1175_vm2, %v3076_v36, 0  ;;  %v3718_v8 = vsel %vm1175_vm2, %v3077_v52, 0 }
 0xa6a   :  { %10079 = vmatpush3.bf16.xpose.msra.mxu0 %v3580_v38  ;;  %10085 = vmatpush3.bf16.xpose.msra.mxu1 %v3626_v40  ;;  %v123_v9 = vsub.s32 %v120_v4, %v10805_v5  ;;  %v117_v52 = vcombine.high %v9581_v41, %v9581_v41 }
 0xa6b   :  { %10090 = vmatprep.subr.bf16.mxu0 %v10735_v22  ;;  %10096 = vmatprep.subr.bf16.mxu1 %v10735_v22 }
 0xa6c   :  { %v124_v28 = vrot.slane %v9581_v41, %v123_v9 }
 0xa6e   :  { %v11600_v42 = vrot.slane %v124_v28, %v10811_v7 }
 0xa71   :  { %10081 = vmatmul.mubr.msk.bf16.vlgmr.msra.gmra.mrb[48].mxu0 %vm1175_vm2, %v2774_v12  ;;  %10087 = vmatmul.mubr.msk.bf16.vlgmr.msra.gmra.mrb[48].mxu1 %vm1175_vm2, %v2775_v11  ;;  %v131_v11 = vrot.slane %v117_v52, %v123_v9 }
 0xa72   :  { %10091 = vmatpush3.bf16.xpose.msra.mxu0 %v3672_v39  ;;  %10097 = vmatpush3.bf16.xpose.msra.mxu1 %v3718_v8 }
 0xa73   :  { %10092 = vmatprep.mubr.msk.bf16.mxu0 %vm10736_vm1, %v10735_v22  ;;  %10098 = vmatprep.mubr.msk.bf16.mxu1 %vm10736_vm1, %v10735_v22  ;;  %v11617_v61 = vrot.slane %v131_v11, %v10811_v7 }
 0xa74   :  { %10102 = vmatprep.subr.bf16.mxu0 %v10735_v22  ;;  %10108 = vmatprep.subr.bf16.mxu1 %v10735_v22 }
 0xa79   :  { %10093 = vmatmul.mubr.msk.bf16.vlgmr.msra.gmra.mrb[52].mxu0 %vm1175_vm2, %v2776_v50  ;;  %10099 = vmatmul.mubr.msk.bf16.vlgmr.msra.gmra.mrb[52].mxu1 %vm1175_vm2, %v2777_v48 }
 0xa7a   :  { %10104 = vmatprep.mubr.msk.bf16.mxu0 %vm10736_vm1, %v10735_v22  ;;  %10110 = vmatprep.mubr.msk.bf16.mxu1 %vm10736_vm1, %v10735_v22 }
 0xb2d   :  { %v3432_v47 = vpop.f32.mrb[40].mxu0  ;;  %v3478_v29 = vpop.f32.mrb[40].mxu1 }
 0xb2e   :  { %v11603_v25 = vadd.f32 %v3432_v47, %v11600_v42  ;;  %v11606_v34 = vadd.f32 %v3478_v29, %v11600_v42  ;;  %v10058_v45 = vpop.f32.mrb[41].mxu0  ;;  %v10064_v31 = vpop.f32.mrb[41].mxu1 }
 0xb2f   :  { %v3435_v15 = vpop.f32.mrb[42].mxu0  ;;  %v3481_v5 = vpop.f32.mrb[42].mxu1 }
 0xb30   :  { %v10059_v37 = vpop.f32.mrb[43].mxu0  ;;  %v10065_v2 = vpop.f32.mrb[43].mxu1  ;;  %v3760_v1 = vsel %vm1175_vm2, %v11603_v25, -inf  ;;  %v3763_v32 = vsel %vm1175_vm2, %v11606_v34, -inf }
 0xb31   :  { %3761 = vmax.xlane.f32.xlu1 %v3760_v1  ;;  %3764 = vmax.xlane.f32.xlu0 %v3763_v32 }
 0xb35   :  { %v3524_v46 = vpop.f32.mrb[44].mxu0 }
 0xb36   :  { %v3525_v17 = vadd.f32 %v3524_v46, %v11600_v42  ;;  %v3570_v38 = vpop.f32.mrb[44].mxu1  ;;  %v10070_v40 = vpop.f32.mrb[45].mxu0 }
 0xb37   :  { %v10076_v55 = vpop.f32.mrb[45].mxu1  ;;  %v3527_v56 = vpop.f32.mrb[46].mxu0  ;;  %v3571_v62 = vadd.f32 %v3570_v38, %v11600_v42 }
 0xb38   :  { %v3573_v30 = vpop.f32.mrb[46].mxu1  ;;  %v10071_v59 = vpop.f32.mrb[47].mxu0  ;;  %v3766_v49 = vsel %vm1175_vm2, %v3525_v17, -inf }
 0xb39   :  { %v10077_v36 = vpop.f32.mrb[47].mxu1  ;;  %3767 = vmax.xlane.f32.xlu0 %v3766_v49  ;;  %v3769_v12 = vsel %vm1175_vm2, %v3571_v62, -inf  ;;  %v3079_v38 = vpop.permute.xlu1 %3078 }
 0xb3d   :  { %3770 = vmax.xlane.f32.xlu0 %v3769_v12 }
 0xb44   :  { %v3616_v23 = vpop.f32.mrb[48].mxu0  ;;  %v3662_v39 = vpop.f32.mrb[48].mxu1 }
 0xb45   :  { %v3617_v8 = vadd.f32 %v3616_v23, %v11617_v61  ;;  %v3663_v10 = vadd.f32 %v3662_v39, %v11617_v61  ;;  %v10082_v19 = vpop.f32.mrb[49].mxu0  ;;  %v10088_v50 = vpop.f32.mrb[49].mxu1 }
 0xb46   :  { %v3619_v48 = vpop.f32.mrb[50].mxu0  ;;  %v3665_v21 = vpop.f32.mrb[50].mxu1 }
 0xb47   :  { %v10083_v6 = vpop.f32.mrb[51].mxu0  ;;  %v10089_v4 = vpop.f32.mrb[51].mxu1  ;;  %v3772_v41 = vsel %vm1175_vm2, %v3617_v8, -inf  ;;  %v3775_v28 = vsel %vm1175_vm2, %v3663_v10, -inf }
 0xb48   :  { %3773 = vmax.xlane.f32.xlu1 %v3772_v41  ;;  %3776 = vmax.xlane.f32.xlu0 %v3775_v28 }
 0xb4c   :  { %v3708_v9 = vpop.f32.mrb[52].mxu0  ;;  %v3754_v47 = vpop.f32.mrb[52].mxu1 }
 0xb4d   :  { %v11624_v29 = vadd.f32 %v3708_v9, %v11617_v61  ;;  %v11627_v45 = vadd.f32 %v3754_v47, %v11617_v61  ;;  %v10094_v31 = vpop.f32.mrb[53].mxu0  ;;  %v10100_v15 = vpop.f32.mrb[53].mxu1 }
 0xb4e   :  { %v3711_v5 = vpop.f32.mrb[54].mxu0  ;;  %v3757_v37 = vpop.f32.mrb[54].mxu1 }
 0xb4f   :  { %v10095_v2 = vpop.f32.mrb[55].mxu0  ;;  %v10101_v1 = vpop.f32.mrb[55].mxu1  ;;  %v3778_v32 = vsel %vm1175_vm2, %v11624_v29, -inf  ;;  %v3781_v46 = vsel %vm1175_vm2, %v11627_v45, -inf }
 0xb50   :  { %3779 = vmax.xlane.f32.xlu1 %v3778_v32  ;;  %3782 = vmax.xlane.f32.xlu0 %v3781_v46 }
 0xb61   :  { %3086 = vrot.lane.b32.xlu1 %v11432_v33, %s10734_s0 }
 0xb65   :  { %3090 = vrot.lane.b32.xlu1 %v11440_v35, %s10734_s0 }
 0xb66   :  { %3082 = vrot.lane.b32.xlu0 %v11434_v44, %s10734_s0 }
 0xb69   :  { %3080 = vrot.lane.b32.xlu1 %v11402_v43, %s10734_s0 }
 0xbbe   :  { %v3762_v40 = vpop.xlane.xlu1 %3761  ;;  %v3765_v55 = vpop.xlane.xlu0 %3764 }
 0xbbf   :  { %v3784_v56 = vsub.f32 %v11603_v25, %v3762_v40  ;;  %v3785_v30 = vsub.f32 %v11606_v34, %v3765_v55 }
 0xbc1   :  { %v3792_v59 = vmul.f32 1.442695, %v3784_v56  ;;  %v3794_v49 = vmul.f32 1.442695, %v3785_v30 }
 0xbc3   :  { %10561 = vpow2.f32 %v3792_v59 }
 0xbc4   :  { %10563 = vpow2.f32 %v3794_v49 }
 0xbc6   :  { %v3768_v36 = vpop.xlane.xlu0 %3767 }
 0xbc7   :  { %v3786_v52 = vsub.f32 %v3525_v17, %v3768_v36 }
 0xbc9   :  { %v3796_v12 = vmul.f32 1.442695, %v3786_v52 }
 0xbca   :  { %v3771_v11 = vpop.xlane.xlu0 %3770 }
 0xbcb   :  { %10565 = vpow2.f32 %v3796_v12  ;;  %v3787_v23 = vsub.f32 %v3571_v62, %v3771_v11 }
 0xbcd   :  { %v11643_v39 = vpop.eup %10561  ;;  %v3798_v43 = vmul.f32 1.442695, %v3787_v23 }
 0xbce   :  { %v11645_v19 = vpop.eup %10563  ;;  %v3808_v25 = vsel %vm1175_vm2, %v11643_v39, 0.0 }
 0xbcf   :  { %10567 = vpow2.f32 %v3798_v43  ;;  %3809 = vadd.xlane.f32.xlu1 %v3808_v25  ;;  %v3811_v34 = vsel %vm1175_vm2, %v11645_v19, 0.0 }
 0xbd0   :  { %3812 = vadd.xlane.f32.xlu0 %v3811_v34 }
 0xbd5   :  { %v11651_v50 = vpop.eup %10565  ;;  %v3774_v17 = vpop.xlane.xlu1 %3773 }
 0xbd6   :  { %v3777_v48 = vpop.xlane.xlu0 %3776  ;;  %v3814_v62 = vsel %vm1175_vm2, %v11651_v50, 0.0  ;;  %v3788_v21 = vsub.f32 %v3617_v8, %v3774_v17 }
 0xbd7   :  { %v3789_v6 = vsub.f32 %v3663_v10, %v3777_v48  ;;  %3815 = vadd.xlane.f32.xlu1 %v3814_v62 }
 0xbd8   :  { %v3800_v41 = vmul.f32 1.442695, %v3788_v21 }
 0xbd9   :  { %v11655_v4 = vpop.eup %10567  ;;  %v3802_v28 = vmul.f32 1.442695, %v3789_v6 }
 0xbda   :  { %v3817_v9 = vsel %vm1175_vm2, %v11655_v4, 0.0  ;;  %10569 = vpow2.f32 %v3800_v41 }
 0xbdb   :  { %3818 = vadd.xlane.f32.xlu0 %v3817_v9  ;;  %10571 = vpow2.f32 %v3802_v28 }
 0xbdd   :  { %v3780_v47 = vpop.xlane.xlu1 %3779  ;;  %v3783_v31 = vpop.xlane.xlu0 %3782 }
 0xbe1   :  { %v3087_v15 = vpop.permute.xlu1 %3086  ;;  %v3083_v8 = vpop.permute.xlu0 %3082 }
 0xbe2   :  { %v3102_v37 = vcombine.low %v3079_v38, %v3087_v15  ;;  %v3103_v2 = vcombine.high %v3079_v38, %v3087_v15 }
 0xbe4   :  { %v11659_v5 = vpop.eup %10569  ;;  %v3110_v55 = vrot.slane %v3102_v37, %v10939_v14  ;;  %v3117_v56 = vrot.slane %v3103_v2, %v10939_v14 }
 0xbe5   :  { %v3091_v10 = vpop.permute.xlu1 %3090  ;;  %v3820_v1 = vsel %vm1175_vm2, %v11659_v5, 0.0  ;;  %v11663_v32 = vpop.eup %10571 }
 0xbe6   :  { %v3118_v46 = vcombine.low %v3083_v8, %v3091_v10  ;;  %v3119_v40 = vcombine.high %v3083_v8, %v3091_v10  ;;  %3821 = vadd.xlane.f32.xlu0 %v3820_v1  ;;  %v3823_v59 = vsel %vm1175_vm2, %v11663_v32, 0.0 }
 0xbe8   :  { %3088 = vrot.lane.b32.xlu1 %v11499_v53, %s10734_s0  ;;  %v3126_v30 = vrot.slane %v3118_v46, %v10939_v14  ;;  %v3133_v38 = vrot.slane %v3119_v40, %v10939_v14 }
 0xbea   :  { %v3134_v49 = vcombine.low %v3110_v55, %v3126_v30  ;;  %v3135_v36 = vcombine.high %v3110_v55, %v3126_v30  ;;  %v3150_v52 = vcombine.low %v3117_v56, %v3133_v38  ;;  %v3151_v12 = vcombine.high %v3117_v56, %v3133_v38  ;;  %3824 = vadd.xlane.f32.xlu0 %v3823_v59 }
 0xbec   :  { %3092 = vrot.lane.b32.xlu1 %v11497_v13, %s10734_s0  ;;  %v3142_v11 = vrot.slane %v3134_v49, %v10951_v24  ;;  %v3149_v23 = vrot.slane %v3135_v36, %v10951_v24  ;;  %v3158_v43 = vrot.slane %v3150_v52, %v10951_v24  ;;  %v3165_v25 = vrot.slane %v3151_v12, %v10951_v24 }
 0xbed   :  { %v3790_v49 = vsub.f32 %v11624_v29, %v3780_v47 }
 0xbee   :  { %v3238_v34 = vcombine.low %v3142_v11, %v3149_v23  ;;  %v9632_v17 = vcombine.high %v3142_v11, %v3149_v23  ;;  %v3254_v48 = vcombine.low %v3158_v43, %v3165_v25  ;;  %v9633_v62 = vcombine.high %v3158_v43, %v3165_v25 }
 0xbef   :  { %v3804_v12 = vmul.f32 1.442695, %v3790_v49  ;;  %v3791_v11 = vsub.f32 %v11627_v45, %v3783_v31  ;;  %v3081_v45 = vpop.permute.xlu1 %3080 }
 0xbf0   :  { %v3245_v21 = vrot.slane %v3238_v34, %v10939_v14  ;;  %v3253_v6 = vrot.slane %v9632_v17, %v10939_v14  ;;  %v3261_v41 = vrot.slane %v3254_v48, %v10939_v14  ;;  %v3269_v28 = vrot.slane %v9633_v62, %v10939_v14 }
 0xbf1   :  { %10573 = vpow2.f32 %v3804_v12  ;;  %v3806_v29 = vmul.f32 1.442695, %v3791_v11 }
 0xbf2   :  { %v3270_v9 = vcombine.low %v3245_v21, %v3253_v6  ;;  %v3286_v15 = vcombine.low %v3261_v41, %v3269_v28  ;;  %v3271_v37 = vcombine.high %v3245_v21, %v3253_v6  ;;  %v3287_v2 = vcombine.high %v3261_v41, %v3269_v28 }
 0xbf3   :  { %10575 = vpow2.f32 %v3806_v29 }
 0xbf4   :  { %v3278_v8 = vrot.slane %v3270_v9, %v10951_v24  ;;  %v3294_v10 = vrot.slane %v3286_v15, %v10951_v24  ;;  %v3285_v1 = vrot.slane %v3271_v37, %v10951_v24  ;;  %v3301_v46 = vrot.slane %v3287_v2, %v10951_v24 }
 0xbf6   :  { %v3302_v40 = vcombine.low %v3278_v8, %v3294_v10  ;;  %v3303_v55 = vcombine.high %v3278_v8, %v3294_v10  ;;  %v3304_v56 = vcombine.low %v3285_v1, %v3301_v46  ;;  %v3305_v30 = vcombine.high %v3285_v1, %v3301_v46 }
 0xbf8   :  { %v3374_v38 = vpack.c.bf16 %v3302_v40, %v3302_v40  ;;  %v3375_v59 = vpack.c.bf16 %v3303_v55, %v3303_v55  ;;  %v3376_v6 = vpack.c.bf16 %v3304_v56, %v3304_v56 }
 0xbfa   :  { %v3860_v36 = vsel %vm1643_vm4, %v3374_v38, 0  ;;  %v3906_v52 = vsel %vm1643_vm4, %v3375_v59, 0 }
 0xbfb   :  { %10103 = vmatpush3.bf16.msra.mxu0 %v3860_v36  ;;  %10109 = vmatpush3.bf16.msra.mxu1 %v3906_v52  ;;  %v11695_v23 = vpop.eup %10573 }
 0xbfc   :  { %10114 = vmatprep.subr.bf16.mxu0 %v10735_v22  ;;  %10120 = vmatprep.subr.bf16.mxu1 %v10735_v22  ;;  %v3826_v47 = vsel %vm1175_vm2, %v11695_v23, 0.0 }
 0xbfd   :  { %v11699_v43 = vpop.eup %10575 }
 0xbfe   :  { %v3829_v25 = vsel %vm1175_vm2, %v11699_v43, 0.0 }
 0xc00   :  { %3084 = vrot.lane.b32.xlu0 %v11491_v0, %s10734_s0 }
 0xc10   :  { %3827 = vadd.xlane.f32.xlu1 %v3826_v47 }
 0xc1f   :  { %3830 = vadd.xlane.f32.xlu0 %v3829_v25 }
 0xc21   :  { %4528 = vrot.lane.b32.xlu1 %v11378_v20, %s10734_s0 }
 0xc25   :  { %4530 = vrot.lane.b32.xlu1 %v11384_v58, %s10734_s0 }
 0xc35   :  { %4526 = vrot.lane.b32.xlu0 %v11372_v51, %s10734_s0  ;;  %v3377_v51 = vpack.c.bf16 %v3305_v30, %v3305_v30 }
 0xc37   :  { %v3998_v9 = vsel %vm1643_vm4, %v3377_v51, 0 }
 0xc39   :  { %4532 = vrot.lane.b32.xlu0 %v11390_v57, %s10734_s0  ;;  %v3952_v57 = vsel %vm1643_vm4, %v3376_v6, 0 }
 0xc5c   :  { %v3810_v31 = vpop.xlane.xlu1 %3809 }
 0xc5d   :  { %10577 = vrcp.f32 %v3810_v31  ;;  %v3813_v34 = vpop.xlane.xlu0 %3812 }
 0xc5e   :  { %10579 = vrcp.f32 %v3813_v34 }
 0xc64   :  { %v3816_v17 = vpop.xlane.xlu1 %3815 }
 0xc65   :  { %10581 = vrcp.f32 %v3816_v17 }
 0xc67   :  { %v10578_v48 = vpop.eup %10577 }
 0xc68   :  { %v10580_v62 = vpop.eup %10579  ;;  %v3819_v21 = vpop.xlane.xlu0 %3818  ;;  %v3840_v20 = vmul.f32 %v10578_v48, %v11643_v39 }
 0xc69   :  { %10583 = vrcp.f32 %v3819_v21  ;;  %v3841_v58 = vmul.f32 %v10580_v62, %v11645_v19  ;;  %v3089_v10 = vpop.permute.xlu1 %3088 }
 0xc6a   :  { %v3848_v41 = vpack.c.bf16 %v3840_v20, %v3840_v20  ;;  %v3171_v40 = vcombine.high %v3081_v45, %v3089_v10 }
 0xc6b   :  { %v3849_v28 = vpack.c.bf16 %v3841_v58, %v3841_v58 }
 0xc6c   :  { %10105 = vmatmul.mubr.msk.bf16.vlgmr.msra.gmra.mrb[56].mxu0 %vm1175_vm2, %v3848_v41 }
 0xc6d   :  { %10111 = vmatmul.mubr.msk.bf16.vlgmr.msra.gmra.mrb[56].mxu1 %vm1175_vm2, %v3849_v28  ;;  %10115 = vmatpush3.bf16.msra.mxu0 %v3952_v57  ;;  %v3093_v55 = vpop.permute.xlu1 %3092 }
 0xc6e   :  { %10121 = vmatpush3.bf16.msra.mxu1 %v3998_v9  ;;  %10116 = vmatprep.mubr.msk.bf16.mxu0 %vm10736_vm1, %v10735_v22 }
 0xc6f   :  { %v10582_v39 = vpop.eup %10581  ;;  %10122 = vmatprep.mubr.msk.bf16.mxu1 %vm10736_vm1, %v10735_v22  ;;  %10126 = vmatprep.subr.bf16.mxu0 %v10735_v22 }
 0xc70   :  { %v3842_v19 = vmul.f32 %v10582_v39, %v11651_v50  ;;  %10132 = vmatprep.subr.bf16.mxu1 %v10735_v22  ;;  %v3170_v50 = vcombine.low %v3081_v45, %v3089_v10 }
 0xc72   :  { %v3850_v15 = vpack.c.bf16 %v3842_v19, %v3842_v19  ;;  %v3178_v59 = vrot.slane %v3170_v50, %v10939_v14 }
 0xc73   :  { %v10584_v37 = vpop.eup %10583  ;;  %v3822_v2 = vpop.xlane.xlu0 %3821 }
 0xc74   :  { %10117 = vmatmul.mubr.msk.bf16.vlgmr.msra.gmra.mrb[60].mxu0 %vm1175_vm2, %v3850_v15  ;;  %v3843_v8 = vmul.f32 %v10584_v37, %v11655_v4  ;;  %v3185_v4 = vrot.slane %v3171_v40, %v10939_v14  ;;  %10585 = vrcp.f32 %v3822_v2 }
 0xc75   :  { %10128 = vmatprep.mubr.msk.bf16.mxu0 %vm10736_vm1, %v10735_v22 }
 0xc76   :  { %v3851_v1 = vpack.c.bf16 %v3843_v8, %v3843_v8 }
 0xc77   :  { %v3825_v46 = vpop.xlane.xlu0 %3824 }
 0xc78   :  { %10123 = vmatmul.mubr.msk.bf16.vlgmr.msra.gmra.mrb[60].mxu1 %vm1175_vm2, %v3851_v1  ;;  %10587 = vrcp.f32 %v3825_v46 }
 0xc79   :  { %10134 = vmatprep.mubr.msk.bf16.mxu1 %vm10736_vm1, %v10735_v22 }
 0xc7b   :  { %v3085_v56 = vpop.permute.xlu0 %3084 }
 0xc7c   :  { %v3186_v30 = vcombine.low %v3085_v56, %v3093_v55  ;;  %v3187_v38 = vcombine.high %v3085_v56, %v3093_v55 }
 0xc7e   :  { %v3194_v49 = vrot.slane %v3186_v30, %v10939_v14  ;;  %v3201_v36 = vrot.slane %v3187_v38, %v10939_v14  ;;  %v10586_v9 = vpop.eup %10585 }
 0xc7f   :  { %v3844_v55 = vmul.f32 %v10586_v9, %v11659_v5 }
 0xc80   :  { %v3202_v52 = vcombine.low %v3178_v59, %v3194_v49  ;;  %v3203_v12 = vcombine.high %v3178_v59, %v3194_v49  ;;  %v3218_v11 = vcombine.low %v3185_v4, %v3201_v36  ;;  %v3219_v29 = vcombine.high %v3185_v4, %v3201_v36 }
 0xc81   :  { %v3852_v49 = vpack.c.bf16 %v3844_v55, %v3844_v55 }
 0xc82   :  { %v3210_v47 = vrot.slane %v3202_v52, %v10951_v24  ;;  %v3217_v25 = vrot.slane %v3203_v12, %v10951_v24  ;;  %v3226_v45 = vrot.slane %v3218_v11, %v10951_v24  ;;  %v3233_v31 = vrot.slane %v3219_v29, %v10951_v24  ;;  %v10588_v2 = vpop.eup %10587 }
 0xc83   :  { %v3845_v56 = vmul.f32 %v10588_v2, %v11663_v32 }
 0xc84   :  { %v3306_v34 = vcombine.low %v3210_v47, %v3217_v25  ;;  %v9634_v17 = vcombine.high %v3210_v47, %v3217_v25  ;;  %v3322_v48 = vcombine.low %v3226_v45, %v3233_v31  ;;  %v9635_v62 = vcombine.high %v3226_v45, %v3233_v31 }
 0xc85   :  { %v3853_v36 = vpack.c.bf16 %v3845_v56, %v3845_v56 }
 0xc86   :  { %v3313_v21 = vrot.slane %v3306_v34, %v10939_v14  ;;  %v3321_v20 = vrot.slane %v9634_v17, %v10939_v14  ;;  %v3329_v6 = vrot.slane %v3322_v48, %v10939_v14  ;;  %v3337_v58 = vrot.slane %v9635_v62, %v10939_v14 }
 0xc88   :  { %v3338_v51 = vcombine.low %v3313_v21, %v3321_v20  ;;  %v3354_v41 = vcombine.low %v3329_v6, %v3337_v58  ;;  %v3339_v28 = vcombine.high %v3313_v21, %v3321_v20  ;;  %v3355_v57 = vcombine.high %v3329_v6, %v3337_v58 }
 0xc8a   :  { %v3346_v39 = vrot.slane %v3338_v51, %v10951_v24  ;;  %v3362_v19 = vrot.slane %v3354_v41, %v10951_v24  ;;  %v3353_v15 = vrot.slane %v3339_v28, %v10951_v24  ;;  %v3369_v37 = vrot.slane %v3355_v57, %v10951_v24 }
 0xc8c   :  { %v3370_v8 = vcombine.low %v3346_v39, %v3362_v19  ;;  %v3371_v10 = vcombine.high %v3346_v39, %v3362_v19  ;;  %v3372_v1 = vcombine.low %v3353_v15, %v3369_v37  ;;  %v3373_v46 = vcombine.high %v3353_v15, %v3369_v37 }
 0xc8e   :  { %v3378_v50 = vpack.c.bf16 %v3370_v8, %v3370_v8  ;;  %v3379_v40 = vpack.c.bf16 %v3371_v10, %v3371_v10  ;;  %v3380_v59 = vpack.c.bf16 %v3372_v1, %v3372_v1  ;;  %v3381_v4 = vpack.c.bf16 %v3373_v46, %v3373_v46 }
 0xc90   :  { %v4044_v30 = vsel %vm1643_vm4, %v3378_v50, 0  ;;  %v4090_v38 = vsel %vm1643_vm4, %v3379_v40, 0  ;;  %v4136_v5 = vsel %vm1643_vm4, %v3380_v59, 0  ;;  %v4182_v32 = vsel %vm1643_vm4, %v3381_v4, 0 }
 0xc91   :  { %10127 = vmatpush3.bf16.msra.mxu0 %v4044_v30  ;;  %10133 = vmatpush3.bf16.msra.mxu1 %v4090_v38 }
 0xc92   :  { %10138 = vmatprep.subr.bf16.mxu0 %v10735_v22  ;;  %10144 = vmatprep.subr.bf16.mxu1 %v10735_v22 }
 0xc94   :  { %10129 = vmatmul.mubr.msk.bf16.vlgmr.msra.gmra.mrb[64].mxu0 %vm1175_vm2, %v3852_v49  ;;  %10135 = vmatmul.mubr.msk.bf16.vlgmr.msra.gmra.mrb[64].mxu1 %vm1175_vm2, %v3853_v36 }
 0xc95   :  { %10139 = vmatpush3.bf16.msra.mxu0 %v4136_v5  ;;  %10145 = vmatpush3.bf16.msra.mxu1 %v4182_v32 }
 0xc96   :  { %10140 = vmatprep.mubr.msk.bf16.mxu0 %vm10736_vm1, %v10735_v22  ;;  %10146 = vmatprep.mubr.msk.bf16.mxu1 %vm10736_vm1, %v10735_v22 }
 0xc97   :  { %10150 = vmatprep.subr.bf16.mxu0 %v10735_v22  ;;  %10158 = vmatprep.subr.bf16.mxu1 %v10735_v22 }
 0xc9d   :  { %v3828_v52 = vpop.xlane.xlu1 %3827 }
 0xc9e   :  { %10589 = vrcp.f32 %v3828_v52 }
 0xca1   :  { %v4529_v34 = vpop.permute.xlu1 %4528 }
 0xca5   :  { %v4531_v21 = vpop.permute.xlu1 %4530 }
 0xca6   :  { %v4536_v6 = vrot.slane %v4531_v21, 4 }
 0xca8   :  { %v10590_v12 = vpop.eup %10589 }
 0xca9   :  { %v3846_v11 = vmul.f32 %v10590_v12, %v11695_v23  ;;  %v4535_v23 = vrot.slane %v4529_v34, 4 }
 0xcab   :  { %v3854_v29 = vpack.c.bf16 %v3846_v11, %v3846_v11 }
 0xcac   :  { %v3831_v47 = vpop.xlane.xlu0 %3830 }
 0xcad   :  { %10141 = vmatmul.mubr.msk.bf16.vlgmr.msra.gmra.mrb[68].mxu0 %vm1175_vm2, %v3854_v29  ;;  %10591 = vrcp.f32 %v3831_v47 }
 0xcae   :  { %10154 = vmatprep.mubr.msk.bf16.mxu0 %vm10736_vm1, %v10735_v22 }
 0xcb0   :  { %v4527_v17 = vpop.permute.xlu0 %4526 }
 0xcb1   :  { %v4534_v48 = vrot.slane %v4527_v17, 4 }
 0xcb3   :  { %v9656_v62 = vcombine.low %v4534_v48, %v4535_v23 }
 0xcb4   :  { %v4533_v20 = vpop.permute.xlu0 %4532 }
 0xcb5   :  { %v4537_v58 = vrot.slane %v4533_v20, 4  ;;  %10151 = vmatpush3.bf16.msra.mxu0 %v9656_v62 }
 0xcb6   :  { %10152 = vmatprep.subr.bf16.mxu0 %v10735_v22 }
 0xcb7   :  { %v10592_v25 = vpop.eup %10591  ;;  %v9657_v51 = vcombine.low %v4536_v6, %v4537_v58 }
 0xcb8   :  { %v3847_v45 = vmul.f32 %v10592_v25, %v11699_v43 }
 0xcb9   :  { %10153 = vmatpush3.bf16.msra.mxu0 %v9657_v51 }
 0xcba   :  { %v3855_v31 = vpack.c.bf16 %v3847_v45, %v3847_v45  ;;  %10166 = vmatprep.subr.bf16.mxu0 %v10735_v22 }
 0xcbc   :  { %10147 = vmatmul.mubr.msk.bf16.vlgmr.msra.gmra.mrb[68].mxu1 %vm1175_vm2, %v3855_v31 }
 0xcbd   :  { %10162 = vmatprep.mubr.msk.bf16.mxu1 %vm10736_vm1, %v10735_v22 }
 0xd3f   :  { %v3896_v43 = vpop.f32.mrb[56].mxu0 }
 0xd40   :  { %v3942_v41 = vpop.f32.mrb[56].mxu1  ;;  %v10106_v28 = vpop.f32.mrb[57].mxu0 }
 0xd41   :  { %v10112_v57 = vpop.f32.mrb[57].mxu1  ;;  %v3899_v9 = vpop.f32.mrb[58].mxu0 }
 0xd42   :  { %v3945_v39 = vpop.f32.mrb[58].mxu1  ;;  %v10107_v19 = vpop.f32.mrb[59].mxu0 }
 0xd43   :  { %v10113_v15 = vpop.f32.mrb[59].mxu1 }
 0xd47   :  { %v3988_v37 = vpop.f32.mrb[60].mxu0 }
 0xd48   :  { %v4224_v2 = vcombine.low %v3896_v43, %v3988_v37  ;;  %v4225_v8 = vcombine.high %v3896_v43, %v3988_v37  ;;  %v10118_v10 = vpop.f32.mrb[61].mxu0 }
 0xd49   :  { %v3991_v1 = vpop.f32.mrb[62].mxu0 }
 0xd4a   :  { %v10119_v46 = vpop.f32.mrb[63].mxu0  ;;  %v4232_v38 = vrot.slane %v4224_v2, %v10939_v14  ;;  %v4239_v59 = vrot.slane %v4225_v8, %v10939_v14 }
 0xd4b   :  { %v4034_v50 = vpop.f32.mrb[60].mxu1 }
 0xd4c   :  { %v4240_v40 = vcombine.low %v3942_v41, %v4034_v50  ;;  %v4241_v55 = vcombine.high %v3942_v41, %v4034_v50  ;;  %v10124_v56 = vpop.f32.mrb[61].mxu1 }
 0xd4d   :  { %v4037_v30 = vpop.f32.mrb[62].mxu1 }
 0xd4e   :  { %v4248_v4 = vrot.slane %v4240_v40, %v10939_v14  ;;  %v4255_v49 = vrot.slane %v4241_v55, %v10939_v14  ;;  %v10125_v36 = vpop.f32.mrb[63].mxu1 }
 0xd50   :  { %v4256_v5 = vcombine.low %v4232_v38, %v4248_v4  ;;  %v4257_v32 = vcombine.high %v4232_v38, %v4248_v4  ;;  %v4272_v52 = vcombine.low %v4239_v59, %v4255_v49  ;;  %v4273_v12 = vcombine.high %v4239_v59, %v4255_v49 }
 0xd52   :  { %v4264_v11 = vrot.slane %v4256_v5, %v10951_v24  ;;  %v4271_v29 = vrot.slane %v4257_v32, %v10951_v24  ;;  %v4280_v47 = vrot.slane %v4272_v52, %v10951_v24  ;;  %v4287_v25 = vrot.slane %v4273_v12, %v10951_v24 }
 0xd54   :  { %v4360_v45 = vcombine.low %v4264_v11, %v4271_v29  ;;  %v9652_v31 = vcombine.high %v4264_v11, %v4271_v29  ;;  %v4376_v34 = vcombine.low %v4280_v47, %v4287_v25  ;;  %v9653_v17 = vcombine.high %v4280_v47, %v4287_v25 }
 0xd56   :  { %v4367_v23 = vrot.slane %v4360_v45, %v10939_v14  ;;  %v4375_v48 = vrot.slane %v9652_v31, %v10939_v14  ;;  %v4383_v62 = vrot.slane %v4376_v34, %v10939_v14  ;;  %v4391_v21 = vrot.slane %v9653_v17, %v10939_v14 }
 0xd58   :  { %v4393_v20 = vcombine.high %v4367_v23, %v4375_v48  ;;  %v4409_v6 = vcombine.high %v4383_v62, %v4391_v21  ;;  %v4392_v58 = vcombine.low %v4367_v23, %v4375_v48  ;;  %v4408_v51 = vcombine.low %v4383_v62, %v4391_v21 }
 0xd5a   :  { %v11786_v43 = vrot.slane %v4393_v20, %v10951_v24  ;;  %v4423_v41 = vrot.slane %v4409_v6, %v10951_v24  ;;  %v11790_v28 = vrot.slane %v4392_v58, %v10951_v24  ;;  %v11793_v57 = vrot.slane %v4408_v51, %v10951_v24 }
 0xd5c   :  { %v4426_v9 = vcombine.low %v11786_v43, %v4423_v41  ;;  %v4425_v39 = vcombine.high %v11790_v28, %v11793_v57  ;;  %v4427_v19 = vcombine.high %v11786_v43, %v4423_v41  ;;  %v4424_v15 = vcombine.low %v11790_v28, %v11793_v57 }
 0xd67   :  { %v4080_v37 = vpop.f32.mrb[64].mxu0  ;;  %v4126_v2 = vpop.f32.mrb[64].mxu1 }
 0xd68   :  { %v10130_v8 = vpop.f32.mrb[65].mxu0  ;;  %v10136_v10 = vpop.f32.mrb[65].mxu1 }
 0xd69   :  { %v4083_v1 = vpop.f32.mrb[66].mxu0  ;;  %v4129_v46 = vpop.f32.mrb[66].mxu1 }
 0xd6a   :  { %v10131_v50 = vpop.f32.mrb[67].mxu0  ;;  %v10137_v40 = vpop.f32.mrb[67].mxu1 }
 0xd80   :  { %v4172_v55 = vpop.f32.mrb[68].mxu0 }
 0xd81   :  { %v4292_v56 = vcombine.low %v4080_v37, %v4172_v55  ;;  %v4293_v30 = vcombine.high %v4080_v37, %v4172_v55  ;;  %v10142_v38 = vpop.f32.mrb[69].mxu0 }
 0xd82   :  { %v4175_v59 = vpop.f32.mrb[70].mxu0 }
 0xd83   :  { %v10143_v4 = vpop.f32.mrb[71].mxu0  ;;  %v4300_v12 = vrot.slane %v4292_v56, %v10939_v14  ;;  %v4307_v11 = vrot.slane %v4293_v30, %v10939_v14 }
 0xd8f   :  { %v4218_v49 = vpop.f32.mrb[68].mxu1 }
 0xd90   :  { %v4308_v36 = vcombine.low %v4126_v2, %v4218_v49  ;;  %v4309_v5 = vcombine.high %v4126_v2, %v4218_v49  ;;  %v10148_v32 = vpop.f32.mrb[69].mxu1 }
 0xd91   :  { %v4221_v52 = vpop.f32.mrb[70].mxu1  ;;  %v11823_v32 = vld [vmem:[%s12918_s5] sm:$0xf] }
 0xd92   :  { %v4316_v29 = vrot.slane %v4308_v36, %v10939_v14  ;;  %v4323_v47 = vrot.slane %v4309_v5, %v10939_v14  ;;  %v10149_v25 = vpop.f32.mrb[71].mxu1 }
 0xd94   :  { %v4324_v45 = vcombine.low %v4300_v12, %v4316_v29  ;;  %v4325_v31 = vcombine.high %v4300_v12, %v4316_v29  ;;  %v4340_v34 = vcombine.low %v4307_v11, %v4323_v47  ;;  %v4341_v17 = vcombine.high %v4307_v11, %v4323_v47 }
 0xd96   :  { %v4332_v23 = vrot.slane %v4324_v45, %v10951_v24  ;;  %v4339_v48 = vrot.slane %v4325_v31, %v10951_v24  ;;  %v4348_v62 = vrot.slane %v4340_v34, %v10951_v24  ;;  %v4355_v21 = vrot.slane %v4341_v17, %v10951_v24 }
 0xd98   :  { %v4428_v20 = vcombine.low %v4332_v23, %v4339_v48  ;;  %v9654_v6 = vcombine.high %v4332_v23, %v4339_v48  ;;  %v4444_v58 = vcombine.low %v4348_v62, %v4355_v21  ;;  %v9655_v51 = vcombine.high %v4348_v62, %v4355_v21 }
 0xd9a   :  { %v4435_v43 = vrot.slane %v4428_v20, %v10939_v14  ;;  %v4443_v41 = vrot.slane %v9654_v6, %v10939_v14  ;;  %v4451_v37 = vrot.slane %v4444_v58, %v10939_v14  ;;  %v4459_v2 = vrot.slane %v9655_v51, %v10939_v14 }
 0xd9c   :  { %v4461_v8 = vcombine.high %v4435_v43, %v4443_v41  ;;  %v4477_v10 = vcombine.high %v4451_v37, %v4459_v2  ;;  %v4460_v1 = vcombine.low %v4435_v43, %v4443_v41  ;;  %v4476_v46 = vcombine.low %v4451_v37, %v4459_v2 }
 0xd9e   :  { %v4475_v50 = vrot.slane %v4461_v8, %v10951_v24  ;;  %v4491_v40 = vrot.slane %v4477_v10, %v10951_v24  ;;  %v4468_v55 = vrot.slane %v4460_v1, %v10951_v24  ;;  %v4484_v56 = vrot.slane %v4476_v46, %v10951_v24  ;;  %v10692_v10 = vld [vmem:[%s12916_s3] sm:$0xff] }
 0xda0   :  { %v4494_v30 = vcombine.low %v4475_v50, %v4491_v40  ;;  %v4493_v38 = vcombine.high %v4468_v55, %v4484_v56  ;;  %v4495_v59 = vcombine.high %v4475_v50, %v4491_v40  ;;  %v4492_v4 = vcombine.low %v4468_v55, %v4484_v56 }
 0xda2   :  { %v10467_v49 = vpack.i.bf16 %v4494_v30, %v4426_v9  ;;  %v10462_v36 = vpack.i.bf16 %v4493_v38, %v4425_v39  ;;  %v10472_v5 = vpack.i.bf16 %v4495_v59, %v4427_v19 }
 0xda4   :  { %10468 = vrot.lane.b32.xlu0 %v10467_v49, %s10747_s17  ;;  %10463 = vrot.lane.b32.xlu1 %v10462_v36, %s10746_s16  ;;  %v10695_v49 = vld [vmem:[%s12916_s3 + $0x8] sm:$0xff] }
 0xda8   :  { %10473 = vrot.lane.b32.xlu1 %v10472_v5, %s10745_s15  ;;  %4538 = vrot.lane.b32.xlu0 %v11823_v32, %s10744_s1 }
 0xe16   :  { %v10469_v52 = vpop.permute.xlu0 %10468  ;;  %v10464_v12 = vpop.permute.xlu1 %10463 }
 0xe17   :  { %v10466_v11 = vunpack.i.h.bf16 %v10464_v12  ;;  %v10465_v9 = vunpack.i.l.bf16 %v10464_v12  ;;  %v10471_v39 = vunpack.i.h.bf16 %v10469_v52  ;;  %v10470_v19 = vunpack.i.l.bf16 %v10469_v52 }
 0xe19   :  { %v4520_v29 = vsel %vm1175_vm2, %v4424_v15, %v10465_v9  ;;  %v4521_v47 = vsel %vm1175_vm2, %v4492_v4, %v10466_v11 }
 0xe1a   :  { %v10474_v25 = vpop.permute.xlu1 %10473  ;;  %v4522_v34 = vsel %vm2307_vm5, %v4520_v29, %v10470_v19  ;;  %v4523_v17 = vsel %vm2307_vm5, %v4521_v47, %v10471_v39  ;;  %v4539_v28 = vpop.permute.xlu0 %4538 }
 0xe1b   :  { %v10476_v45 = vunpack.i.h.bf16 %v10474_v25  ;;  %v10475_v31 = vunpack.i.l.bf16 %v10474_v25  ;;  %v4540_v57 = vrot.slane %v4539_v28, 1 }
 0xe1d   :  { %v4524_v23 = vsel %vm2310_vm6, %v4522_v34, %v10475_v31  ;;  %v4525_v48 = vsel %vm2310_vm6, %v4523_v17, %v10476_v45  ;;  %v4545_v15 = vrot.slane %v4540_v57, %v10811_v7 }
 0xe1e   :  { %v4541_v62 = vpack.c.bf16 %v4525_v48, %v4524_v23  ;;  %v4601_v23 = vrot.slane %v11823_v32, 2 }
 0xe20   :  { %10155 = vmatmul.mubr.msk.bf16.vlgmr.msra.gmra.mrb[72].mxu0 %vm61_vm0, %v4541_v62  ;;  %v4632_v28 = vrot.slane %v4601_v23, %v10811_v7  ;;  %v4732_v23 = vrot.slane %v11823_v32, 3 }
 0xe21   :  { %10174 = vmatprep.mubr.msk.bf16.mxu0 %vm10736_vm1, %v10735_v22 }
 0xef3   :  { %v4592_v21 = vpop.f32.mrb[72].mxu0 }
 0xef4   :  { %v4593_v20 = vadd.f32 %v4592_v21, %v4545_v15  ;;  %v10156_v6 = vpop.f32.mrb[73].mxu0 }
 0xef5   :  { %v4595_v58 = vpop.f32.mrb[74].mxu0 }
 0xef6   :  { %v4599_v51 = vadd.f32 %v4593_v20, %v11421_v3  ;;  %v4596_v43 = vadd.f32 %v4595_v58, %v4545_v15  ;;  %v10157_v41 = vpop.f32.mrb[75].mxu0  ;;  %v10693_v3 = vld [vmem:[%s12916_s3 + $0x10] sm:$0xff]  ;;  %v4602_v15 = vrot.slane %v11395_v26, 2 }
 0xef8   :  { %v4600_v37 = vadd.f32 %v4596_v43, %v11423_v18  ;;  %v4603_v2 = vsel %vm61_vm0, %v4599_v51, 0.0  ;;  %v10694_v18 = vld [vmem:[%s12916_s3 + $0x18] sm:$0xff]  ;;  %v4639_v58 = vrot.slane %v4602_v15, %v10811_v7 }
 0xef9   :  { %4604 = vadd.xlane.f32.xlu1 %v4603_v2  ;;  %v10511_v2 = vld [vmem:[%s12917_s4] sm:$0xff]  }
 0xefa   :  { %v4606_v8 = vsel %vm61_vm0, %v4600_v37, 0.0  ;;  %10167 = vmatpush3.bf16.msra.mxu0 %v10511_v2 }
 0xefb   :  { %4607 = vadd.xlane.f32.xlu0 %v4606_v8  ;;  %10168 = vmatprep.subr.bf16.mxu0 %v10735_v22  ;;  %v10512_v8 = vld [vmem:[%s12917_s4 + $0x8] sm:$0xff]  }
 0xefe   :  { %10169 = vmatpush3.bf16.msra.mxu0 %v10512_v8 }
 0xeff   :  { %10170 = vmatprep.subr.bf16.mxu0 %v10735_v22 }
 0xf0a   :  { %4643 = vrot.lane.b32.xlu1 %v10692_v10, %s10740_s14  ;;  %v10513_v10 = vld [vmem:[%s12917_s4 + $0x10] sm:$0xff]  }
 0xf0b   :  { %10171 = vmatpush3.bf16.msra.mxu0 %v10513_v10 }
 0xf0c   :  { %10172 = vmatprep.subr.bf16.mxu0 %v10735_v22 }
 0xf0e   :  { %4647 = vrot.lane.b32.xlu1 %v10693_v3, %s10740_s14  ;;  %v10514_v3 = vld [vmem:[%s12917_s4 + $0x18] sm:$0xff]  }
 0xf0f   :  { %10173 = vmatpush3.bf16.msra.mxu0 %v10514_v3 }
 0xf10   :  { %10192 = vmatprep.subr.bf16.mxu0 %v10735_v22 }
 0xf12   :  { %4649 = vrot.lane.b32.xlu1 %v10694_v18, %s10740_s14  ;;  %v4655_v18 = vrot.slane %v11430_v60, 2 }
 0xf86   :  { %v4605_v1 = vpop.xlane.xlu1 %4604 }
 0xf87   :  { %v4609_v46 = vmul.f32 0.03125, %v4605_v1  ;;  %v4660_v1 = vrot.slane %v4655_v18, %v10811_v7 }
 0xf88   :  { %v4608_v50 = vpop.xlane.xlu0 %4607 }
 0xf89   :  { %v4611_v40 = vsub.f32 %v4599_v51, %v4609_v46  ;;  %v4610_v55 = vmul.f32 0.03125, %v4608_v50 }
 0xf8a   :  { %v4644_v36 = vpop.permute.xlu1 %4643 }
 0xf8b   :  { %v4612_v56 = vsub.f32 %v4600_v37, %v4610_v55  ;;  %v4613_v30 = vmul.f32 %v4611_v40, %v4611_v40  ;;  %v4651_v47 = vrot.slane %v4644_v36, 4 }
 0xf8d   :  { %v4615_v38 = vsel %vm61_vm0, %v4613_v30, 0.0  ;;  %v4614_v59 = vmul.f32 %v4612_v56, %v4612_v56 }
 0xf8e   :  { %4616 = vadd.xlane.f32.xlu0 %v4615_v38  ;;  %v4648_v52 = vpop.permute.xlu1 %4647 }
 0xf8f   :  { %v4618_v4 = vsel %vm61_vm0, %v4614_v59, 0.0  ;;  %v4653_v45 = vrot.slane %v4648_v52, 4 }
 0xf92   :  { %4619 = vadd.xlane.f32.xlu0 %v4618_v4  ;;  %v4650_v19 = vpop.permute.xlu1 %4649 }
 0xf93   :  { %v4654_v34 = vrot.slane %v4650_v19, 4 }
 0xf95   :  { %v9660_v48 = vcombine.low %v4653_v45, %v4654_v34 }
 0xfa8   :  { %4645 = vrot.lane.b32.xlu0 %v10695_v49, %s10740_s14 }
0x101b   :  { %v4617_v5 = vpop.xlane.xlu0 %4616 }
0x101c   :  { %v4621_v12 = vmul.f32 0.03125, %v4617_v5 }
0x101e   :  { %v4623_v11 = vadd.f32 1e-05, %v4621_v12 }
0x101f   :  { %v4620_v9 = vpop.xlane.xlu0 %4619 }
0x1020   :  { %10593 = vrsqrt.f32 %v4623_v11  ;;  %v4622_v39 = vmul.f32 0.03125, %v4620_v9 }
0x1022   :  { %v4624_v29 = vadd.f32 1e-05, %v4622_v39 }
0x1023   :  { %v4646_v25 = vpop.permute.xlu0 %4645 }
0x1024   :  { %10595 = vrsqrt.f32 %v4624_v29  ;;  %v4652_v31 = vrot.slane %v4646_v25, 4 }
0x1026   :  { %v9659_v17 = vcombine.low %v4651_v47, %v4652_v31 }
0x1028   :  { %10159 = vmatpush3.bf16.msra.mxu1 %v9659_v17 }
0x1029   :  { %10160 = vmatprep.subr.bf16.mxu1 %v10735_v22 }
0x102a   :  { %v10594_v62 = vpop.eup %10593 }
0x102b   :  { %v4627_v57 = vmul.f32 %v10594_v62, %v4611_v40 }
0x102c   :  { %10161 = vmatpush3.bf16.msra.mxu1 %v9660_v48  ;;  %v4737_v48 = vrot.slane %v4732_v23, %v10811_v7 }
0x102d   :  { %10178 = vmatprep.subr.bf16.mxu1 %v10735_v22  ;;  %v4634_v20 = vmul.f32 %v4632_v28, %v4627_v57 }
0x102e   :  { %v10596_v21 = vpop.eup %10595 }
0x102f   :  { %v4628_v6 = vmul.f32 %v10596_v21, %v4612_v56  ;;  %v4641_v43 = vadd.f32 %v4639_v58, %v4634_v20 }
0x1031   :  { %v4635_v51 = vmul.f32 %v4632_v28, %v4628_v6 }
0x1033   :  { %v4642_v41 = vadd.f32 %v4639_v58, %v4635_v51 }
0x1035   :  { %v4656_v37 = vpack.c.bf16 %v4642_v41, %v4641_v43 }
0x1037   :  { %10163 = vmatmul.mubr.msk.bf16.vlgmr.msra.gmra.mrb[72].mxu1 %vm61_vm0, %v4656_v37 }
0x1038   :  { %10182 = vmatprep.mubr.msk.bf16.mxu1 %vm10736_vm1, %v10735_v22 }
0x110a   :  { %v4707_v46 = vpop.f32.mrb[72].mxu1 }
0x110b   :  { %v4708_v50 = vadd.f32 %v4707_v46, %v4660_v1  ;;  %v10164_v40 = vpop.f32.mrb[73].mxu1 }
0x110c   :  { %v4710_v55 = vpop.f32.mrb[74].mxu1  ;;  %v33_v40 = vld [vmem:[%s12916_s3 + $0x28] sm:$0xff] }
0x110d   :  { %v4714_v56 = vmul.f32 %v4708_v50, %v4708_v50  ;;  %v4711_v30 = vadd.f32 %v4710_v55, %v4660_v1  ;;  %v10165_v38 = vpop.f32.mrb[75].mxu1  ;;  %v34_v55 = vld [vmem:[%s12916_s3 + $0x30] sm:$0xff] }
0x110f   :  { %v4716_v59 = vmul.f32 %v4714_v56, %v4708_v50  ;;  %v4715_v4 = vmul.f32 %v4711_v30, %v4711_v30 }
0x1111   :  { %v4718_v49 = vmul.f32 0.044715, %v4716_v59  ;;  %v4717_v36 = vmul.f32 %v4715_v4, %v4711_v30 }
0x1113   :  { %v4720_v5 = vadd.f32 %v4718_v49, %v4708_v50  ;;  %v4719_v52 = vmul.f32 0.044715, %v4717_v36 }
0x1115   :  { %v4722_v12 = vmul.f32 0.7978846, %v4720_v5  ;;  %v4721_v11 = vadd.f32 %v4719_v52, %v4711_v30 }
0x1117   :  { %10597 = vtanh.f32 %v4722_v12  ;;  %v4723_v9 = vmul.f32 0.7978846, %v4721_v11  ;;  %v4809_v12 = vrot.slane %v11395_v26, 3  ;;  %v57_v26 = vld [vmem:[%s12918_s5 + $0x4] sm:$0xf] }
0x1119   :  { %10599 = vtanh.f32 %v4723_v9 }
0x1121   :  { %v10598_v39 = vpop.eup %10597 }
0x1122   :  { %v4726_v19 = vadd.f32 1.0, %v10598_v39  ;;  %v4840_v39 = vrot.slane %v4809_v12, %v10811_v7 }
0x1123   :  { %v10600_v29 = vpop.eup %10599 }
0x1124   :  { %v4728_v47 = vmul.f32 0.5, %v4726_v19  ;;  %v4727_v25 = vadd.f32 1.0, %v10600_v29  ;;  %v4810_v19 = vrot.slane %v11430_v60, 3  ;;  %v11935_v60 = vrot.slane %v57_v26, %v10811_v7 }
0x1126   :  { %v4729_v45 = vmul.f32 0.5, %v4727_v25  ;;  %v4730_v31 = vmul.f32 %v4728_v47, %v4708_v50 }
0x1128   :  { %v4731_v34 = vmul.f32 %v4729_v45, %v4711_v30  ;;  %v35_v30 = vld [vmem:[%s12916_s3 + $0x38] sm:$0xff]  ;;  %v4847_v45 = vrot.slane %v4810_v19, %v10811_v7 }
0x1129   :  { %v11913_v38 = vcombine.low %v34_v55, %v35_v30 }
0x112a   :  { %v4733_v17 = vpack.c.bf16 %v4731_v34, %v4730_v31 }
0x112c   :  { %10175 = vmatmul.mubr.msk.bf16.vlgmr.msra.gmra.mrb[76].mxu0 %vm155_vm7, %v4733_v17 }
0x112d   :  { %10194 = vmatprep.mubr.msk.bf16.mxu0 %vm10736_vm1, %v10735_v22 }
0x11ff   :  { %v4800_v62 = vpop.f32.mrb[76].mxu0 }
0x1200   :  { %v4801_v28 = vadd.f32 %v4800_v62, %v4737_v48  ;;  %v10176_v57 = vpop.f32.mrb[77].mxu0 }
0x1201   :  { %v4803_v15 = vpop.f32.mrb[78].mxu0 }
0x1202   :  { %v4807_v21 = vadd.f32 %v4801_v28, %v4641_v43  ;;  %v4804_v20 = vadd.f32 %v4803_v15, %v4737_v48  ;;  %v10177_v6 = vpop.f32.mrb[79].mxu0 }
0x1204   :  { %v4808_v58 = vadd.f32 %v4804_v20, %v4642_v41  ;;  %v4811_v51 = vsel %vm61_vm0, %v4807_v21, 0.0  ;;  %v32_v41 = vld [vmem:[%s12916_s3 + $0x20] sm:$0xff] }
0x1205   :  { %4812 = vadd.xlane.f32.xlu1 %v4811_v51  ;;  %v11907_v56 = vcombine.low %v32_v41, %v33_v40 }
0x1206   :  { %v4814_v37 = vsel %vm61_vm0, %v4808_v58, 0.0 }
0x1207   :  { %4815 = vadd.xlane.f32.xlu0 %v4814_v37  ;;  %10179 = vmatpush3.bf16.msra.mxu1 %v11907_v56 }
0x1208   :  { %10180 = vmatprep.subr.bf16.mxu1 %v10735_v22 }
0x120b   :  { %10181 = vmatpush3.bf16.msra.mxu1 %v11913_v38 }
0x120c   :  { %10186 = vmatprep.subr.bf16.mxu1 %v10735_v22 }
0x1292   :  { %v4813_v2 = vpop.xlane.xlu1 %4812 }
0x1293   :  { %v4817_v8 = vmul.f32 0.03125, %v4813_v2 }
0x1294   :  { %v4816_v10 = vpop.xlane.xlu0 %4815 }
0x1295   :  { %v4819_v32 = vsub.f32 %v4807_v21, %v4817_v8  ;;  %v4818_v3 = vmul.f32 0.03125, %v4816_v10 }
0x1297   :  { %v4820_v18 = vsub.f32 %v4808_v58, %v4818_v3  ;;  %v4821_v1 = vmul.f32 %v4819_v32, %v4819_v32 }
0x1299   :  { %v4823_v46 = vsel %vm61_vm0, %v4821_v1, 0.0  ;;  %v4822_v50 = vmul.f32 %v4820_v18, %v4820_v18 }
0x129a   :  { %4824 = vadd.xlane.f32.xlu0 %v4823_v46 }
0x129b   :  { %v4826_v43 = vsel %vm61_vm0, %v4822_v50, 0.0 }
0x129e   :  { %4827 = vadd.xlane.f32.xlu0 %v4826_v43 }
0x1327   :  { %v4825_v59 = vpop.xlane.xlu0 %4824 }
0x1328   :  { %v4829_v4 = vmul.f32 0.03125, %v4825_v59 }
0x132a   :  { %v4831_v49 = vadd.f32 1e-05, %v4829_v4 }
0x132b   :  { %v4828_v36 = vpop.xlane.xlu0 %4827 }
0x132c   :  { %10601 = vrsqrt.f32 %v4831_v49  ;;  %v4830_v5 = vmul.f32 0.03125, %v4828_v36 }
0x132e   :  { %v4832_v52 = vadd.f32 1e-05, %v4830_v5 }
0x1330   :  { %10603 = vrsqrt.f32 %v4832_v52 }
0x1336   :  { %v10602_v11 = vpop.eup %10601 }
0x1337   :  { %v4835_v9 = vmul.f32 %v10602_v11, %v4819_v32 }
0x1339   :  { %v4842_v47 = vmul.f32 %v4840_v39, %v4835_v9 }
0x133a   :  { %v10604_v29 = vpop.eup %10603 }
0x133b   :  { %v4836_v25 = vmul.f32 %v10604_v29, %v4820_v18  ;;  %v11922_v34 = vadd.f32 %v4847_v45, %v4842_v47 }
0x133d   :  { %v4843_v31 = vmul.f32 %v4840_v39, %v4836_v25 }
0x133f   :  { %v11924_v17 = vadd.f32 %v4847_v45, %v4843_v31 }
0x1341   :  { %v4851_v23 = vpack.c.bf16 %v11924_v17, %v11922_v34 }
0x1343   :  { %10183 = vmatmul.mubr.msk.bf16.vlgmr.msra.gmra.mrb[76].mxu1 %vm61_vm0, %v4851_v23 }
0x1344   :  { %10188 = vmatprep.mubr.msk.bf16.mxu1 %vm10736_vm1, %v10735_v22 }
0x1416   :  { %v4907_v48 = vpop.f32.mrb[76].mxu1 }
0x1417   :  { %v11938_v62 = vadd.f32 %v4907_v48, %v11935_v60  ;;  %v10184_v28 = vpop.f32.mrb[77].mxu1 }
0x1418   :  { %v4910_v57 = vpop.f32.mrb[78].mxu1 }
0x1419   :  { %4922 = vrot.lane.b32.xlu0 %v11938_v62, %s10738_s22  ;;  %4916 = vrot.lane.b32.xlu1 %v11938_v62, %s10737_s21  ;;  %v10185_v15 = vpop.f32.mrb[79].mxu1  ;;  %v11945_v21 = vadd.f32 %v4910_v57, %v11935_v60 }
0x141d   :  { %4928 = vrot.lane.b32.xlu1 %v11938_v62, %s10739_s23  ;;  %4930 = vrot.lane.b32.xlu0 %v11945_v21, %s10739_s23 }
0x1421   :  { %4918 = vrot.lane.b32.xlu1 %v11945_v21, %s10737_s21 }
0x1425   :  { %4924 = vrot.lane.b32.xlu1 %v11945_v21, %s10738_s22 }
0x1429   :  { %5214 = vrot.lane.b32.xlu1 %v11938_v62, %s10734_s0 }
0x148b   :  { %v11957_v20 = vpop.permute.xlu0 %4922  ;;  %v11959_v6 = vpop.permute.xlu1 %4916 }
0x148c   :  { %5218 = vrot.lane.b32.xlu0 %v11959_v6, %s10734_s0  ;;  %5222 = vrot.lane.b32.xlu1 %v11957_v20, %s10734_s0  ;;  %v4934_v32 = vcombine.low %v11938_v62, %v11957_v20  ;;  %v4935_v3 = vcombine.high %v11938_v62, %v11957_v20 }
0x148e   :  { %v4942_v46 = vrot.slane %v4934_v32, %v10939_v14  ;;  %v4949_v50 = vrot.slane %v4935_v3, %v10939_v14 }
0x148f   :  { %v11965_v58 = vpop.permute.xlu1 %4928  ;;  %v11975_v37 = vpop.permute.xlu0 %4930 }
0x1490   :  { %5226 = vrot.lane.b32.xlu0 %v11965_v58, %s10734_s0  ;;  %5216 = vrot.lane.b32.xlu1 %v11945_v21, %s10734_s0  ;;  %v4950_v8 = vcombine.low %v11959_v6, %v11965_v58  ;;  %v4951_v10 = vcombine.high %v11959_v6, %v11965_v58 }
0x1492   :  { %v4958_v18 = vrot.slane %v4950_v8, %v10939_v14  ;;  %v4965_v1 = vrot.slane %v4951_v10, %v10939_v14 }
0x1493   :  { %v11971_v51 = vpop.permute.xlu1 %4918 }
0x1494   :  { %5220 = vrot.lane.b32.xlu0 %v11971_v51, %s10734_s0  ;;  %v4966_v43 = vcombine.low %v4942_v46, %v4958_v18  ;;  %v4967_v41 = vcombine.high %v4942_v46, %v4958_v18  ;;  %v4982_v40 = vcombine.low %v4949_v50, %v4965_v1  ;;  %v4983_v55 = vcombine.high %v4949_v50, %v4965_v1 }
0x1495   :  { %v5018_v29 = vcombine.low %v11971_v51, %v11975_v37  ;;  %v5019_v47 = vcombine.high %v11971_v51, %v11975_v37 }
0x1496   :  { %v4974_v30 = vrot.slane %v4966_v43, %v10951_v24  ;;  %v4981_v59 = vrot.slane %v4967_v41, %v10951_v24  ;;  %v4990_v4 = vrot.slane %v4982_v40, %v10951_v24  ;;  %v4997_v49 = vrot.slane %v4983_v55, %v10951_v24 }
0x1497   :  { %v11977_v2 = vpop.permute.xlu1 %4924  ;;  %v5026_v32 = vrot.slane %v5018_v29, %v10939_v14  ;;  %v12024_v3 = vrot.slane %v5019_v47, %v10939_v14 }
0x1498   :  { %5228 = vrot.lane.b32.xlu0 %v11975_v37, %s10734_s0  ;;  %5224 = vrot.lane.b32.xlu1 %v11977_v2, %s10734_s0  ;;  %v5070_v5 = vcombine.low %v4974_v30, %v4981_v59  ;;  %v9670_v52 = vcombine.high %v4974_v30, %v4981_v59  ;;  %v5086_v12 = vcombine.low %v4990_v4, %v4997_v49 }
0x1499   :  { %v9671_v11 = vcombine.high %v4990_v4, %v4997_v49  ;;  %v5002_v9 = vcombine.low %v11945_v21, %v11977_v2  ;;  %v5003_v25 = vcombine.high %v11945_v21, %v11977_v2 }
0x149a   :  { %v12010_v23 = vrot.slane %v5070_v5, %v10939_v14  ;;  %v12014_v28 = vrot.slane %v9670_v52, %v10939_v14  ;;  %v12017_v57 = vrot.slane %v5086_v12, %v10939_v14 }
0x149b   :  { %v5215_v36 = vpop.permute.xlu1 %5214  ;;  %v5010_v26 = vrot.slane %v5002_v9, %v10939_v14  ;;  %v12020_v15 = vrot.slane %v9671_v11, %v10939_v14  ;;  %v12027_v18 = vrot.slane %v5003_v25, %v10939_v14 }
0x149c   :  { %5518 = vrot.lane.b32.xlu1 %v11938_v62, %s10740_s14  ;;  %v5102_v30 = vcombine.low %v12010_v23, %v12014_v28  ;;  %v5103_v9 = vcombine.high %v12010_v23, %v12014_v28 }
0x149d   :  { %v5034_v41 = vcombine.low %v5010_v26, %v5026_v32  ;;  %v5035_v40 = vcombine.high %v5010_v26, %v5026_v32  ;;  %v5118_v59 = vcombine.low %v12017_v57, %v12020_v15  ;;  %v5050_v12 = vcombine.low %v12027_v18, %v12024_v3 }
0x149e   :  { %v5051_v11 = vcombine.high %v12027_v18, %v12024_v3 }
0x14fe   :  { %v5219_v39 = vpop.permute.xlu0 %5218  ;;  %v5223_v19 = vpop.permute.xlu1 %5222 }
0x14ff   :  { %v5238_v45 = vcombine.low %v5215_v36, %v5223_v19  ;;  %v5239_v31 = vcombine.high %v5215_v36, %v5223_v19 }
0x1501   :  { %v5246_v1 = vrot.slane %v5238_v45, %v10939_v14  ;;  %v5253_v46 = vrot.slane %v5239_v31, %v10939_v14  ;;  %v12050_v45 = vrot.slane %v5034_v41, %v10951_v24  ;;  %v12053_v31 = vrot.slane %v5035_v40, %v10951_v24 }
0x1502   :  { %v5227_v48 = vpop.permute.xlu0 %5226  ;;  %v5217_v52 = vpop.permute.xlu1 %5216 }
0x1503   :  { %v5254_v8 = vcombine.low %v5219_v39, %v5227_v48  ;;  %v5255_v10 = vcombine.high %v5219_v39, %v5227_v48  ;;  %v5119_v39 = vcombine.high %v12017_v57, %v12020_v15  ;;  %v5110_v48 = vrot.slane %v5102_v30, %v10951_v24 }
0x1505   :  { %v5262_v50 = vrot.slane %v5254_v8, %v10939_v14  ;;  %v5269_v43 = vrot.slane %v5255_v10, %v10939_v14  ;;  %v5126_v8 = vrot.slane %v5118_v59, %v10951_v24 }
0x1506   :  { %v5221_v55 = vpop.permute.xlu0 %5220 }
0x1507   :  { %v5270_v4 = vcombine.low %v5246_v1, %v5262_v50  ;;  %v5271_v49 = vcombine.high %v5246_v1, %v5262_v50  ;;  %v5286_v36 = vcombine.low %v5253_v46, %v5269_v43  ;;  %v5287_v5 = vcombine.high %v5253_v46, %v5269_v43 }
0x1509   :  { %v5278_v19 = vrot.slane %v5270_v4, %v10951_v24  ;;  %v5285_v29 = vrot.slane %v5271_v49, %v10951_v24  ;;  %v5294_v47 = vrot.slane %v5286_v36, %v10951_v24  ;;  %v5301_v25 = vrot.slane %v5287_v5, %v10951_v24 }
0x150a   :  { %v5229_v26 = vpop.permute.xlu0 %5228  ;;  %v5225_v1 = vpop.permute.xlu1 %5224 }
0x150b   :  { %v5374_v10 = vcombine.low %v5278_v19, %v5285_v29  ;;  %v9674_v32 = vcombine.high %v5278_v19, %v5285_v29  ;;  %v5390_v3 = vcombine.low %v5294_v47, %v5301_v25  ;;  %v9675_v18 = vcombine.high %v5294_v47, %v5301_v25 }
0x150c   :  { %v5322_v46 = vcombine.low %v5221_v55, %v5229_v26  ;;  %v5323_v50 = vcombine.high %v5221_v55, %v5229_v26  ;;  %v5306_v43 = vcombine.low %v5217_v52, %v5225_v1  ;;  %v5307_v4 = vcombine.high %v5217_v52, %v5225_v1 }
0x150d   :  { %v5381_v41 = vrot.slane %v5374_v10, %v10939_v14  ;;  %v5389_v49 = vrot.slane %v9674_v32, %v10939_v14  ;;  %v5397_v40 = vrot.slane %v5390_v3, %v10939_v14  ;;  %v5405_v36 = vrot.slane %v9675_v18, %v10939_v14 }
0x150e   :  { %v5330_v30 = vrot.slane %v5322_v46, %v10939_v14  ;;  %v5337_v59 = vrot.slane %v5323_v50, %v10939_v14  ;;  %v5314_v5 = vrot.slane %v5306_v43, %v10939_v14  ;;  %v5321_v19 = vrot.slane %v5307_v4, %v10939_v14 }
0x150f   :  { %v5406_v29 = vcombine.low %v5381_v41, %v5389_v49  ;;  %v5422_v55 = vcombine.low %v5397_v40, %v5405_v36  ;;  %v5407_v47 = vcombine.high %v5381_v41, %v5389_v49  ;;  %v5423_v52 = vcombine.high %v5397_v40, %v5405_v36 }
0x1510   :  { %v5338_v25 = vcombine.low %v5314_v5, %v5330_v30  ;;  %v5339_v26 = vcombine.high %v5314_v5, %v5330_v30  ;;  %v5354_v10 = vcombine.low %v5321_v19, %v5337_v59  ;;  %v5355_v32 = vcombine.high %v5321_v19, %v5337_v59 }
0x1511   :  { %v5414_v3 = vrot.slane %v5406_v29, %v10951_v24  ;;  %v5430_v18 = vrot.slane %v5422_v55, %v10951_v24  ;;  %v5421_v1 = vrot.slane %v5407_v47, %v10951_v24  ;;  %v5437_v46 = vrot.slane %v5423_v52, %v10951_v24 }
0x1512   :  { %v5346_v50 = vrot.slane %v5338_v25, %v10951_v24  ;;  %v5353_v43 = vrot.slane %v5339_v26, %v10951_v24  ;;  %v5362_v4 = vrot.slane %v5354_v10, %v10951_v24  ;;  %v5369_v41 = vrot.slane %v5355_v32, %v10951_v24 }
0x1513   :  { %v5058_v49 = vrot.slane %v5050_v12, %v10951_v24  ;;  %v5065_v40 = vrot.slane %v5051_v11, %v10951_v24  ;;  %v5438_v36 = vcombine.low %v5414_v3, %v5430_v18  ;;  %v5439_v30 = vcombine.high %v5414_v3, %v5430_v18 }
0x1514   :  { %v5442_v59 = vcombine.low %v5346_v50, %v5353_v43  ;;  %v9676_v5 = vcombine.high %v5346_v50, %v5353_v43  ;;  %v5458_v19 = vcombine.low %v5362_v4, %v5369_v41  ;;  %v9677_v29 = vcombine.high %v5362_v4, %v5369_v41 }
0x1515   :  { %v5510_v55 = vpack.c.bf16 %v5438_v36, %v5438_v36  ;;  %v5511_v47 = vpack.c.bf16 %v5439_v30, %v5439_v30  ;;  %v5134_v52 = vcombine.low %v5110_v48, %v5126_v8  ;;  %v5440_v25 = vcombine.low %v5421_v1, %v5437_v46 }
0x1516   :  { %v5449_v26 = vrot.slane %v5442_v59, %v10939_v14  ;;  %v5457_v10 = vrot.slane %v9676_v5, %v10939_v14  ;;  %v5465_v32 = vrot.slane %v5458_v19, %v10939_v14  ;;  %v5473_v12 = vrot.slane %v9677_v29, %v10939_v14 }
0x1517   :  { %v5826_v11 = vsel %vm1175_vm2, %v5510_v55, 0  ;;  %v5872_v3 = vsel %vm1175_vm2, %v5511_v47, 0  ;;  %v5135_v18 = vcombine.high %v5110_v48, %v5126_v8  ;;  %v5441_v50 = vcombine.high %v5421_v1, %v5437_v46 }
0x1518   :  { %v5138_v43 = vcombine.low %v12050_v45, %v12053_v31  ;;  %10187 = vmatpush3.bf16.xpose.msra.mxu1 %v5826_v11  ;;  %10193 = vmatpush3.bf16.xpose.msra.mxu0 %v5872_v3  ;;  %v5474_v4 = vcombine.low %v5449_v26, %v5457_v10  ;;  %v5490_v41 = vcombine.low %v5465_v32, %v5473_v12 }
0x1519   :  { %v9672_v36 = vcombine.high %v12050_v45, %v12053_v31  ;;  %v5154_v30 = vcombine.low %v5058_v49, %v5065_v40  ;;  %v9673_v59 = vcombine.high %v5058_v49, %v5065_v40  ;;  %10198 = vmatprep.subr.bf16.mxu1 %v10735_v22  ;;  %10204 = vmatprep.subr.bf16.mxu0 %v10735_v22 }
0x151a   :  { %v5512_v5 = vpack.c.bf16 %v5440_v25, %v5440_v25  ;;  %v5513_v19 = vpack.c.bf16 %v5441_v50, %v5441_v50  ;;  %v5482_v48 = vrot.slane %v5474_v4, %v10951_v24  ;;  %v5498_v8 = vrot.slane %v5490_v41, %v10951_v24 }
0x151b   :  { %v5206_v1 = vpack.c.bf16 %v5134_v52, %v5134_v52  ;;  %v5207_v46 = vpack.c.bf16 %v5135_v18, %v5135_v18  ;;  %v5117_v29 = vrot.slane %v5103_v9, %v10951_v24  ;;  %v5133_v45 = vrot.slane %v5119_v39, %v10951_v24 }
0x151c   :  { %v5145_v31 = vrot.slane %v5138_v43, %v10939_v14  ;;  %v5153_v49 = vrot.slane %v9672_v36, %v10939_v14  ;;  %v5161_v40 = vrot.slane %v5154_v30, %v10939_v14  ;;  %v5169_v55 = vrot.slane %v9673_v59, %v10939_v14 }
0x151d   :  { %v5918_v47 = vsel %vm1175_vm2, %v5512_v5, 0  ;;  %v5475_v52 = vcombine.high %v5449_v26, %v5457_v10  ;;  %v5964_v23 = vsel %vm1175_vm2, %v5513_v19, 0  ;;  %v5506_v28 = vcombine.low %v5482_v48, %v5498_v8 }
0x151e   :  { %v5507_v57 = vcombine.high %v5482_v48, %v5498_v8  ;;  %v5491_v15 = vcombine.high %v5465_v32, %v5473_v12  ;;  %v5136_v9 = vcombine.low %v5117_v29, %v5133_v45  ;;  %v5137_v39 = vcombine.high %v5117_v29, %v5133_v45 }
0x151f   :  { %10189 = vmatmul.mubr.msk.bf16.vlgmr.msra.gmra.mrb[80].mxu1 %vm1175_vm2, %v5206_v1  ;;  %10195 = vmatmul.mubr.msk.bf16.vlgmr.msra.gmra.mrb[80].mxu0 %vm1175_vm2, %v5207_v46  ;;  %v5170_v25 = vcombine.low %v5145_v31, %v5153_v49  ;;  %v5186_v26 = vcombine.low %v5161_v40, %v5169_v55  ;;  %v5514_v10 = vpack.c.bf16 %v5506_v28, %v5506_v28 }
0x1520   :  { %10199 = vmatpush3.bf16.xpose.msra.mxu1 %v5918_v47  ;;  %10205 = vmatpush3.bf16.xpose.msra.mxu0 %v5964_v23  ;;  %v5515_v11 = vpack.c.bf16 %v5507_v57, %v5507_v57  ;;  %v5489_v32 = vrot.slane %v5475_v52, %v10951_v24  ;;  %v5505_v12 = vrot.slane %v5491_v15, %v10951_v24 }
0x1521   :  { %10200 = vmatprep.mubr.msk.bf16.mxu1 %vm10736_vm1, %v10735_v22  ;;  %10206 = vmatprep.mubr.msk.bf16.mxu0 %vm10736_vm1, %v10735_v22  ;;  %v5208_v3 = vpack.c.bf16 %v5136_v9, %v5136_v9  ;;  %v5209_v18 = vpack.c.bf16 %v5137_v39, %v5137_v39  ;;  %v5178_v50 = vrot.slane %v5170_v25, %v10951_v24  ;;  %v6010_v4 = vsel %vm1175_vm2, %v5514_v10, 0 }
0x1522   :  { %10210 = vmatprep.subr.bf16.mxu1 %v10735_v22  ;;  %10216 = vmatprep.subr.bf16.mxu0 %v10735_v22  ;;  %v5194_v43 = vrot.slane %v5186_v26, %v10951_v24  ;;  %v6056_v41 = vsel %vm1175_vm2, %v5515_v11, 0  ;;  %v5508_v36 = vcombine.low %v5489_v32, %v5505_v12  ;;  %v5509_v30 = vcombine.high %v5489_v32, %v5505_v12 }
0x1523   :  { %v5171_v59 = vcombine.high %v5145_v31, %v5153_v49  ;;  %v5187_v48 = vcombine.high %v5161_v40, %v5169_v55 }
0x1524   :  { %v5202_v5 = vcombine.low %v5178_v50, %v5194_v43  ;;  %v5203_v19 = vcombine.high %v5178_v50, %v5194_v43  ;;  %v5516_v8 = vpack.c.bf16 %v5508_v36, %v5508_v36  ;;  %v5517_v1 = vpack.c.bf16 %v5509_v30, %v5509_v30 }
0x1525   :  { %v5185_v45 = vrot.slane %v5171_v59, %v10951_v24  ;;  %v5201_v31 = vrot.slane %v5187_v48, %v10951_v24 }
0x1526   :  { %v5210_v46 = vpack.c.bf16 %v5202_v5, %v5202_v5  ;;  %v5211_v29 = vpack.c.bf16 %v5203_v19, %v5203_v19  ;;  %v6102_v49 = vsel %vm1175_vm2, %v5516_v8, 0  ;;  %v6148_v40 = vsel %vm1175_vm2, %v5517_v1, 0 }
0x1527   :  { %10201 = vmatmul.mubr.msk.bf16.vlgmr.msra.gmra.mrb[84].mxu1 %vm1175_vm2, %v5208_v3  ;;  %10207 = vmatmul.mubr.msk.bf16.vlgmr.msra.gmra.mrb[84].mxu0 %vm1175_vm2, %v5209_v18  ;;  %v5204_v55 = vcombine.low %v5185_v45, %v5201_v31  ;;  %v5205_v47 = vcombine.high %v5185_v45, %v5201_v31 }
0x1528   :  { %10211 = vmatpush3.bf16.xpose.msra.mxu1 %v6010_v4  ;;  %10217 = vmatpush3.bf16.xpose.msra.mxu0 %v6056_v41 }
0x1529   :  { %10212 = vmatprep.mubr.msk.bf16.mxu1 %vm10736_vm1, %v10735_v22  ;;  %10218 = vmatprep.mubr.msk.bf16.mxu0 %vm10736_vm1, %v10735_v22  ;;  %v5212_v52 = vpack.c.bf16 %v5204_v55, %v5204_v55  ;;  %v5213_v23 = vpack.c.bf16 %v5205_v47, %v5205_v47 }
0x152a   :  { %10222 = vmatprep.subr.bf16.mxu1 %v10735_v22  ;;  %10228 = vmatprep.subr.bf16.mxu0 %v10735_v22 }
0x152f   :  { %10213 = vmatmul.mubr.msk.bf16.vlgmr.msra.gmra.mrb[88].mxu1 %vm1175_vm2, %v5210_v46  ;;  %10219 = vmatmul.mubr.msk.bf16.vlgmr.msra.gmra.mrb[88].mxu0 %vm1175_vm2, %v5211_v29 }
0x1530   :  { %10223 = vmatpush3.bf16.xpose.msra.mxu1 %v6102_v49  ;;  %10229 = vmatpush3.bf16.xpose.msra.mxu0 %v6148_v40 }
0x1531   :  { %10224 = vmatprep.mubr.msk.bf16.mxu1 %vm10736_vm1, %v10735_v22  ;;  %10230 = vmatprep.mubr.msk.bf16.mxu0 %vm10736_vm1, %v10735_v22 }
0x1532   :  { %10234 = vmatprep.subr.bf16.mxu1 %v10735_v22  ;;  %10240 = vmatprep.subr.bf16.mxu0 %v10735_v22 }
0x1537   :  { %10225 = vmatmul.mubr.msk.bf16.vlgmr.msra.gmra.mrb[92].mxu1 %vm1175_vm2, %v5212_v52  ;;  %10231 = vmatmul.mubr.msk.bf16.vlgmr.msra.gmra.mrb[92].mxu0 %vm1175_vm2, %v5213_v23 }
0x1538   :  { %10236 = vmatprep.mubr.msk.bf16.mxu1 %vm10736_vm1, %v10735_v22  ;;  %10242 = vmatprep.mubr.msk.bf16.mxu0 %vm10736_vm1, %v10735_v22 }
0x15f2   :  { %v5862_v28 = vpop.f32.mrb[80].mxu1  ;;  %v5908_v57 = vpop.f32.mrb[80].mxu0 }
0x15f3   :  { %v12144_v15 = vadd.f32 %v5862_v28, %v11114_v16  ;;  %v5909_v9 = vadd.f32 %v5908_v57, %v11114_v16  ;;  %v10190_v39 = vpop.f32.mrb[81].mxu1  ;;  %v10196_v25 = vpop.f32.mrb[81].mxu0 }
0x15f4   :  { %v5865_v26 = vpop.f32.mrb[82].mxu1  ;;  %v5911_v10 = vpop.f32.mrb[82].mxu0 }
0x15f5   :  { %v10191_v11 = vpop.f32.mrb[83].mxu1  ;;  %v10197_v32 = vpop.f32.mrb[83].mxu0  ;;  %v6193_v12 = vsel %vm1175_vm2, %v5909_v9, -inf  ;;  %v6190_v3 = vsel %vm1175_vm2, %v12144_v15, -inf }
0x15f6   :  { %6194 = vmax.xlane.f32.xlu0 %v6193_v12  ;;  %6191 = vmax.xlane.f32.xlu1 %v6190_v3 }
0x15fa   :  { %v5954_v18 = vpop.f32.mrb[84].mxu1  ;;  %v6000_v50 = vpop.f32.mrb[84].mxu0 }
0x15fb   :  { %v5955_v43 = vadd.f32 %v5954_v18, %v11114_v16  ;;  %v10202_v4 = vpop.f32.mrb[85].mxu1  ;;  %v10208_v41 = vpop.f32.mrb[85].mxu0  ;;  %v6001_v59 = vadd.f32 %v6000_v50, %v11114_v16 }
0x15fc   :  { %v5957_v36 = vpop.f32.mrb[86].mxu1  ;;  %v6003_v30 = vpop.f32.mrb[86].mxu0 }
0x15fd   :  { %v10203_v5 = vpop.f32.mrb[87].mxu1  ;;  %v10209_v19 = vpop.f32.mrb[87].mxu0  ;;  %v6196_v48 = vsel %vm1175_vm2, %v5955_v43, -inf  ;;  %v6199_v8 = vsel %vm1175_vm2, %v6001_v59, -inf }
0x15fe   :  { %6197 = vmax.xlane.f32.xlu0 %v6196_v48 }
0x1602   :  { %v6092_v1 = vpop.f32.mrb[88].mxu0  ;;  %6200 = vmax.xlane.f32.xlu0 %v6199_v8  ;;  %v6046_v46 = vpop.f32.mrb[88].mxu1 }
0x1603   :  { %v6093_v29 = vadd.f32 %v6092_v1, %v11114_v16  ;;  %v6047_v45 = vadd.f32 %v6046_v46, %v11114_v16  ;;  %v10214_v31 = vpop.f32.mrb[89].mxu1  ;;  %v10220_v49 = vpop.f32.mrb[89].mxu0 }
0x1604   :  { %v6049_v40 = vpop.f32.mrb[90].mxu1  ;;  %v6095_v55 = vpop.f32.mrb[90].mxu0 }
0x1605   :  { %v10215_v47 = vpop.f32.mrb[91].mxu1  ;;  %v10221_v52 = vpop.f32.mrb[91].mxu0  ;;  %v6205_v23 = vsel %vm1175_vm2, %v6093_v29, -inf  ;;  %v6202_v28 = vsel %vm1175_vm2, %v6047_v45, -inf }
0x1606   :  { %6206 = vmax.xlane.f32.xlu0 %v6205_v23  ;;  %6203 = vmax.xlane.f32.xlu1 %v6202_v28 }
0x160a   :  { %v6138_v57 = vpop.f32.mrb[92].mxu1  ;;  %v6184_v39 = vpop.f32.mrb[92].mxu0 }
0x160b   :  { %v12159_v25 = vadd.f32 %v6138_v57, %v11114_v16  ;;  %v12162_v26 = vadd.f32 %v6184_v39, %v11114_v16  ;;  %v10226_v10 = vpop.f32.mrb[93].mxu1  ;;  %v10232_v11 = vpop.f32.mrb[93].mxu0 }
0x160c   :  { %v6141_v32 = vpop.f32.mrb[94].mxu1  ;;  %v6187_v12 = vpop.f32.mrb[94].mxu0 }
0x160d   :  { %v10227_v3 = vpop.f32.mrb[95].mxu1  ;;  %v10233_v18 = vpop.f32.mrb[95].mxu0  ;;  %v6211_v50 = vsel %vm1175_vm2, %v12162_v26, -inf  ;;  %v6208_v4 = vsel %vm1175_vm2, %v12159_v25, -inf }
0x160e   :  { %6212 = vmax.xlane.f32.xlu0 %v6211_v50  ;;  %6209 = vmax.xlane.f32.xlu1 %v6208_v4  ;;  %v5519_v16 = vpop.permute.xlu1 %5518 }
0x161f   :  { %5526 = vrot.lane.b32.xlu1 %v11957_v20, %s10740_s14 }
0x1623   :  { %5530 = vrot.lane.b32.xlu1 %v11965_v58, %s10740_s14 }
0x1624   :  { %5522 = vrot.lane.b32.xlu0 %v11959_v6, %s10740_s14 }
0x1627   :  { %5520 = vrot.lane.b32.xlu1 %v11945_v21, %s10740_s14 }
0x1683   :  { %v6195_v41 = vpop.xlane.xlu0 %6194  ;;  %v6192_v36 = vpop.xlane.xlu1 %6191 }
0x1684   :  { %v6215_v30 = vsub.f32 %v5909_v9, %v6195_v41  ;;  %v6214_v5 = vsub.f32 %v12144_v15, %v6192_v36 }
0x1686   :  { %v6224_v19 = vmul.f32 1.442695, %v6215_v30  ;;  %v6222_v48 = vmul.f32 1.442695, %v6214_v5 }
0x1688   :  { %10605 = vpow2.f32 %v6224_v19 }
0x1689   :  { %10607 = vpow2.f32 %v6222_v48 }
0x168b   :  { %v6198_v20 = vpop.xlane.xlu0 %6197 }
0x168c   :  { %v6216_v8 = vsub.f32 %v5955_v43, %v6198_v20 }
0x168e   :  { %v6226_v1 = vmul.f32 1.442695, %v6216_v8 }
0x168f   :  { %v6201_v58 = vpop.xlane.xlu0 %6200 }
0x1690   :  { %10609 = vpow2.f32 %v6226_v1  ;;  %v6217_v46 = vsub.f32 %v6001_v59, %v6201_v58 }
0x1692   :  { %v12177_v6 = vpop.eup %10605  ;;  %v6228_v31 = vmul.f32 1.442695, %v6217_v46 }
0x1693   :  { %v12179_v49 = vpop.eup %10607  ;;  %v6207_v40 = vpop.xlane.xlu0 %6206  ;;  %v6241_v15 = vsel %vm1175_vm2, %v12177_v6, 0.0 }
0x1694   :  { %v6204_v55 = vpop.xlane.xlu1 %6203  ;;  %10611 = vpow2.f32 %v6228_v31  ;;  %v6219_v9 = vsub.f32 %v6093_v29, %v6207_v40  ;;  %6242 = vadd.xlane.f32.xlu0 %v6241_v15  ;;  %v6238_v43 = vsel %vm1175_vm2, %v12179_v49, 0.0 }
0x1695   :  { %v6218_v47 = vsub.f32 %v6047_v45, %v6204_v55  ;;  %6239 = vadd.xlane.f32.xlu1 %v6238_v43 }
0x1696   :  { %v6232_v52 = vmul.f32 1.442695, %v6219_v9 }
0x1697   :  { %v6230_v59 = vmul.f32 1.442695, %v6218_v47 }
0x1699   :  { %10613 = vpow2.f32 %v6230_v59 }
0x169a   :  { %v12185_v23 = vpop.eup %10609  ;;  %10615 = vpow2.f32 %v6232_v52 }
0x169b   :  { %v12187_v28 = vpop.xlane.xlu1 %6209  ;;  %v6244_v57 = vsel %vm1175_vm2, %v12185_v23, 0.0  ;;  %v12191_v39 = vpop.xlane.xlu0 %6212 }
0x169c   :  { %6245 = vadd.xlane.f32.xlu1 %v6244_v57 }
0x169e   :  { %v12193_v29 = vpop.eup %10611 }
0x169f   :  { %v5527_v45 = vpop.permute.xlu1 %5526  ;;  %v6247_v10 = vsel %vm1175_vm2, %v12193_v29, 0.0  ;;  %v5523_v3 = vpop.permute.xlu0 %5522 }
0x16a0   :  { %6248 = vadd.xlane.f32.xlu0 %v6247_v10  ;;  %v5542_v11 = vcombine.low %v5519_v16, %v5527_v45  ;;  %v5543_v32 = vcombine.high %v5519_v16, %v5527_v45 }
0x16a2   :  { %v5550_v30 = vrot.slane %v5542_v11, %v10939_v14  ;;  %v5557_v5 = vrot.slane %v5543_v32, %v10939_v14 }
0x16a3   :  { %v12197_v12 = vpop.eup %10613  ;;  %v5531_v18 = vpop.permute.xlu1 %5530 }
0x16a4   :  { %v12199_v50 = vpop.eup %10615  ;;  %v5558_v4 = vcombine.low %v5523_v3, %v5531_v18  ;;  %v5559_v41 = vcombine.high %v5523_v3, %v5531_v18  ;;  %v6250_v36 = vsel %vm1175_vm2, %v12197_v12, 0.0 }
0x16a5   :  { %6251 = vadd.xlane.f32.xlu0 %v6250_v36  ;;  %v6253_v48 = vsel %vm1175_vm2, %v12199_v50, 0.0 }
0x16a6   :  { %v5566_v19 = vrot.slane %v5558_v4, %v10939_v14  ;;  %v5573_v16 = vrot.slane %v5559_v41, %v10939_v14 }
0x16a8   :  { %v5574_v20 = vcombine.low %v5550_v30, %v5566_v19  ;;  %v5575_v8 = vcombine.high %v5550_v30, %v5566_v19  ;;  %v5590_v1 = vcombine.low %v5557_v5, %v5573_v16  ;;  %v5591_v58 = vcombine.high %v5557_v5, %v5573_v16 }
0x16a9   :  { %6254 = vadd.xlane.f32.xlu0 %v6253_v48 }
0x16aa   :  { %v5582_v46 = vrot.slane %v5574_v20, %v10951_v24  ;;  %v5589_v31 = vrot.slane %v5575_v8, %v10951_v24  ;;  %v5598_v40 = vrot.slane %v5590_v1, %v10951_v24  ;;  %v5605_v55 = vrot.slane %v5591_v58, %v10951_v24 }
0x16ab   :  { %v6221_v58 = vsub.f32 %v12162_v26, %v12191_v39 }
0x16ac   :  { %v5678_v15 = vcombine.low %v5582_v46, %v5589_v31  ;;  %v9678_v9 = vcombine.high %v5582_v46, %v5589_v31  ;;  %v5694_v47 = vcombine.low %v5598_v40, %v5605_v55  ;;  %v9679_v43 = vcombine.high %v5598_v40, %v5605_v55 }
0x16ad   :  { %5528 = vrot.lane.b32.xlu1 %v11977_v2, %s10740_s14  ;;  %v6236_v46 = vmul.f32 1.442695, %v6221_v58 }
0x16ae   :  { %v5685_v52 = vrot.slane %v5678_v15, %v10939_v14  ;;  %v5693_v59 = vrot.slane %v9678_v9, %v10939_v14  ;;  %v5701_v57 = vrot.slane %v5694_v47, %v10939_v14  ;;  %v5709_v45 = vrot.slane %v9679_v43, %v10939_v14 }
0x16b0   :  { %v5710_v10 = vcombine.low %v5685_v52, %v5693_v59  ;;  %v5726_v11 = vcombine.low %v5701_v57, %v5709_v45  ;;  %v5711_v32 = vcombine.high %v5685_v52, %v5693_v59  ;;  %v5727_v3 = vcombine.high %v5701_v57, %v5709_v45 }
0x16b1   :  { %5532 = vrot.lane.b32.xlu1 %v11975_v37, %s10740_s14  ;;  %v6220_v37 = vsub.f32 %v12159_v25, %v12187_v28 }
0x16b2   :  { %v5718_v18 = vrot.slane %v5710_v10, %v10951_v24  ;;  %v5734_v4 = vrot.slane %v5726_v11, %v10951_v24  ;;  %v5725_v2 = vrot.slane %v5711_v32, %v10951_v24  ;;  %v5741_v41 = vrot.slane %v5727_v3, %v10951_v24 }
0x16b3   :  { %v6234_v1 = vmul.f32 1.442695, %v6220_v37 }
0x16b4   :  { %v5742_v36 = vcombine.low %v5718_v18, %v5734_v4  ;;  %v5743_v30 = vcombine.high %v5718_v18, %v5734_v4  ;;  %v5744_v5 = vcombine.low %v5725_v2, %v5741_v41  ;;  %v5745_v19 = vcombine.high %v5725_v2, %v5741_v41 }
0x16b5   :  { %10617 = vpow2.f32 %v6234_v1 }
0x16b6   :  { %v5814_v16 = vpack.c.bf16 %v5742_v36, %v5742_v36  ;;  %v5815_v48 = vpack.c.bf16 %v5743_v30, %v5743_v30  ;;  %10619 = vpow2.f32 %v6236_v46  ;;  %v5817_v52 = vpack.c.bf16 %v5745_v19, %v5745_v19 }
0x16b7   :  { %v5816_v57 = vpack.c.bf16 %v5744_v5, %v5744_v5 }
0x16b8   :  { %v6290_v20 = vsel %vm1643_vm4, %v5814_v16, 0  ;;  %v6336_v8 = vsel %vm1643_vm4, %v5815_v48, 0 }
0x16b9   :  { %10235 = vmatpush3.bf16.msra.mxu1 %v6290_v20  ;;  %10241 = vmatpush3.bf16.msra.mxu0 %v6336_v8  ;;  %v6382_v32 = vsel %vm1643_vm4, %v5816_v57, 0 }
0x16ba   :  { %10246 = vmatprep.subr.bf16.mxu1 %v10735_v22  ;;  %10252 = vmatprep.subr.bf16.mxu0 %v10735_v22 }
0x16bf   :  { %5524 = vrot.lane.b32.xlu0 %v11971_v51, %s10740_s14  ;;  %v12235_v31 = vpop.eup %10617  ;;  %v5521_v51 = vpop.permute.xlu1 %5520 }
0x16c0   :  { %v6256_v40 = vsel %vm1175_vm2, %v12235_v31, 0.0  ;;  %v12239_v55 = vpop.eup %10619 }
0x16c1   :  { %v6259_v25 = vsel %vm1175_vm2, %v12239_v55, 0.0 }
0x16d5   :  { %6257 = vadd.xlane.f32.xlu1 %v6256_v40 }
0x16de   :  { %6260 = vadd.xlane.f32.xlu0 %v6259_v25 }
0x16f4   :  { %6957 = vrot.lane.b32.xlu0 %v11907_v56, %s10744_s1  ;;  %v6428_v56 = vsel %vm1643_vm4, %v5817_v52, 0 }
0x1721   :  { %v6243_v28 = vpop.xlane.xlu0 %6242 }
0x1722   :  { %10621 = vrcp.f32 %v6243_v28  ;;  %v6240_v26 = vpop.xlane.xlu1 %6239 }
0x1723   :  { %10623 = vrcp.f32 %v6240_v26 }
0x1729   :  { %v6246_v39 = vpop.xlane.xlu1 %6245 }
0x172a   :  { %10625 = vrcp.f32 %v6246_v39 }
0x172c   :  { %v10622_v15 = vpop.eup %10621 }
0x172d   :  { %v10624_v9 = vpop.eup %10623  ;;  %v6271_v47 = vmul.f32 %v10622_v15, %v12177_v6  ;;  %v6249_v43 = vpop.xlane.xlu0 %6248 }
0x172e   :  { %v6270_v59 = vmul.f32 %v10624_v9, %v12179_v49  ;;  %10627 = vrcp.f32 %v6249_v43  ;;  %v5529_v49 = vpop.permute.xlu1 %5528 }
0x172f   :  { %v6279_v45 = vpack.c.bf16 %v6271_v47, %v6271_v47  ;;  %v5610_v36 = vcombine.low %v5521_v51, %v5529_v49  ;;  %v5611_v30 = vcombine.high %v5521_v51, %v5529_v49 }
0x1730   :  { %v6278_v10 = vpack.c.bf16 %v6270_v59, %v6270_v59 }
0x1731   :  { %10243 = vmatmul.mubr.msk.bf16.vlgmr.msra.gmra.mrb[96].mxu0 %vm1175_vm2, %v6279_v45  ;;  %v5625_v8 = vrot.slane %v5611_v30, %v10939_v14 }
0x1732   :  { %v6252_v11 = vpop.xlane.xlu0 %6251  ;;  %10237 = vmatmul.mubr.msk.bf16.vlgmr.msra.gmra.mrb[96].mxu1 %vm1175_vm2, %v6278_v10  ;;  %10253 = vmatpush3.bf16.msra.mxu0 %v6428_v56  ;;  %v5533_v5 = vpop.permute.xlu1 %5532 }
0x1733   :  { %10247 = vmatpush3.bf16.msra.mxu1 %v6382_v32  ;;  %10248 = vmatprep.mubr.msk.bf16.mxu1 %vm10736_vm1, %v10735_v22  ;;  %10629 = vrcp.f32 %v6252_v11 }
0x1734   :  { %v10626_v6 = vpop.eup %10625  ;;  %10254 = vmatprep.mubr.msk.bf16.mxu0 %vm10736_vm1, %v10735_v22  ;;  %10258 = vmatprep.subr.bf16.mxu1 %v10735_v22 }
0x1735   :  { %v6272_v3 = vmul.f32 %v10626_v6, %v12185_v23  ;;  %10264 = vmatprep.subr.bf16.mxu0 %v10735_v22  ;;  %v5618_v23 = vrot.slane %v5610_v36, %v10939_v14 }
0x1736   :  { %v6255_v18 = vpop.xlane.xlu0 %6254 }
0x1737   :  { %v6280_v4 = vpack.c.bf16 %v6272_v3, %v6272_v3  ;;  %10631 = vrcp.f32 %v6255_v18 }
0x1738   :  { %v10628_v2 = vpop.eup %10627 }
0x1739   :  { %v6273_v41 = vmul.f32 %v10628_v2, %v12193_v29 }
0x173a   :  { %v5525_v19 = vpop.permute.xlu0 %5524  ;;  %10249 = vmatmul.mubr.msk.bf16.vlgmr.msra.gmra.mrb[100].mxu1 %vm1175_vm2, %v6280_v4 }
0x173b   :  { %v5626_v16 = vcombine.low %v5525_v19, %v5533_v5  ;;  %v5627_v48 = vcombine.high %v5525_v19, %v5533_v5  ;;  %v6281_v20 = vpack.c.bf16 %v6273_v41, %v6273_v41  ;;  %10260 = vmatprep.mubr.msk.bf16.mxu1 %vm10736_vm1, %v10735_v22 }
0x173d   :  { %v5634_v37 = vrot.slane %v5626_v16, %v10939_v14  ;;  %v5641_v29 = vrot.slane %v5627_v48, %v10939_v14  ;;  %10255 = vmatmul.mubr.msk.bf16.vlgmr.msra.gmra.mrb[100].mxu0 %vm1175_vm2, %v6281_v20  ;;  %v10630_v32 = vpop.eup %10629 }
0x173e   :  { %10266 = vmatprep.mubr.msk.bf16.mxu0 %vm10736_vm1, %v10735_v22  ;;  %v6274_v5 = vmul.f32 %v10630_v32, %v12197_v12 }
0x173f   :  { %v5642_v1 = vcombine.low %v5618_v23, %v5634_v37  ;;  %v5643_v58 = vcombine.high %v5618_v23, %v5634_v37  ;;  %v5658_v46 = vcombine.low %v5625_v8, %v5641_v29  ;;  %v5659_v40 = vcombine.high %v5625_v8, %v5641_v29 }
0x1740   :  { %v6282_v29 = vpack.c.bf16 %v6274_v5, %v6274_v5 }
0x1741   :  { %v5650_v25 = vrot.slane %v5642_v1, %v10951_v24  ;;  %v5657_v51 = vrot.slane %v5643_v58, %v10951_v24  ;;  %v5666_v28 = vrot.slane %v5658_v46, %v10951_v24  ;;  %v5673_v26 = vrot.slane %v5659_v40, %v10951_v24  ;;  %v10632_v4 = vpop.eup %10631 }
0x1742   :  { %v6275_v19 = vmul.f32 %v10632_v4, %v12199_v50 }
0x1743   :  { %v5746_v39 = vcombine.low %v5650_v25, %v5657_v51  ;;  %v9680_v15 = vcombine.high %v5650_v25, %v5657_v51  ;;  %v5762_v9 = vcombine.low %v5666_v28, %v5673_v26  ;;  %v9681_v47 = vcombine.high %v5666_v28, %v5673_v26 }
0x1744   :  { %v6283_v1 = vpack.c.bf16 %v6275_v19, %v6275_v19 }
0x1745   :  { %v5753_v43 = vrot.slane %v5746_v39, %v10939_v14  ;;  %v5761_v52 = vrot.slane %v9680_v15, %v10939_v14  ;;  %v5769_v59 = vrot.slane %v5762_v9, %v10939_v14  ;;  %v5777_v57 = vrot.slane %v9681_v47, %v10939_v14 }
0x1747   :  { %v5778_v45 = vcombine.low %v5753_v43, %v5761_v52  ;;  %v5794_v10 = vcombine.low %v5769_v59, %v5777_v57  ;;  %v5779_v56 = vcombine.high %v5753_v43, %v5761_v52  ;;  %v5795_v11 = vcombine.high %v5769_v59, %v5777_v57 }
0x1749   :  { %v5786_v6 = vrot.slane %v5778_v45, %v10951_v24  ;;  %v5802_v49 = vrot.slane %v5794_v10, %v10951_v24  ;;  %v5793_v3 = vrot.slane %v5779_v56, %v10951_v24  ;;  %v5809_v18 = vrot.slane %v5795_v11, %v10951_v24 }
0x174b   :  { %v5810_v2 = vcombine.low %v5786_v6, %v5802_v49  ;;  %v5811_v41 = vcombine.high %v5786_v6, %v5802_v49  ;;  %v5812_v36 = vcombine.low %v5793_v3, %v5809_v18  ;;  %v5813_v30 = vcombine.high %v5793_v3, %v5809_v18 }
0x174d   :  { %v5818_v16 = vpack.c.bf16 %v5810_v2, %v5810_v2  ;;  %v5819_v48 = vpack.c.bf16 %v5811_v41, %v5811_v41  ;;  %v5820_v8 = vpack.c.bf16 %v5812_v36, %v5812_v36  ;;  %v5821_v37 = vpack.c.bf16 %v5813_v30, %v5813_v30 }
0x174f   :  { %v6474_v20 = vsel %vm1643_vm4, %v5818_v16, 0  ;;  %v6520_v23 = vsel %vm1643_vm4, %v5819_v48, 0  ;;  %v6566_v12 = vsel %vm1643_vm4, %v5820_v8, 0  ;;  %v6612_v50 = vsel %vm1643_vm4, %v5821_v37, 0 }
0x1750   :  { %10259 = vmatpush3.bf16.msra.mxu1 %v6474_v20  ;;  %10265 = vmatpush3.bf16.msra.mxu0 %v6520_v23 }
0x1751   :  { %10270 = vmatprep.subr.bf16.mxu1 %v10735_v22  ;;  %10276 = vmatprep.subr.bf16.mxu0 %v10735_v22 }
0x1753   :  { %10261 = vmatmul.mubr.msk.bf16.vlgmr.msra.gmra.mrb[104].mxu1 %vm1175_vm2, %v6282_v29  ;;  %10267 = vmatmul.mubr.msk.bf16.vlgmr.msra.gmra.mrb[104].mxu0 %vm1175_vm2, %v6283_v1 }
0x1754   :  { %10271 = vmatpush3.bf16.msra.mxu1 %v6566_v12  ;;  %10277 = vmatpush3.bf16.msra.mxu0 %v6612_v50 }
0x1755   :  { %10272 = vmatprep.mubr.msk.bf16.mxu1 %vm10736_vm1, %v10735_v22  ;;  %10278 = vmatprep.mubr.msk.bf16.mxu0 %vm10736_vm1, %v10735_v22 }
0x1756   :  { %10282 = vmatprep.subr.bf16.mxu1 %v10735_v22  ;;  %10290 = vmatprep.subr.bf16.mxu0 %v10735_v22 }
0x1762   :  { %v6258_v58 = vpop.xlane.xlu1 %6257 }
0x1763   :  { %10633 = vrcp.f32 %v6258_v58 }
0x176b   :  { %v6261_v46 = vpop.xlane.xlu0 %6260 }
0x176c   :  { %10635 = vrcp.f32 %v6261_v46 }
0x176d   :  { %v10634_v40 = vpop.eup %10633 }
0x176e   :  { %v6276_v25 = vmul.f32 %v10634_v40, %v12235_v31 }
0x176f   :  { %v6958_v15 = vpop.permute.xlu0 %6957 }
0x1770   :  { %v6284_v51 = vpack.c.bf16 %v6276_v25, %v6276_v25 }
0x1772   :  { %10273 = vmatmul.mubr.msk.bf16.vlgmr.msra.gmra.mrb[108].mxu1 %vm1175_vm2, %v6284_v51 }
0x1773   :  { %10286 = vmatprep.mubr.msk.bf16.mxu1 %vm10736_vm1, %v10735_v22  ;;  %10283 = vmatpush3.bf16.msra.mxu1 %v6958_v15 }
0x1774   :  { %10284 = vmatprep.subr.bf16.mxu1 %v10735_v22 }
0x1776   :  { %v10636_v28 = vpop.eup %10635 }
0x1777   :  { %v6277_v26 = vmul.f32 %v10636_v28, %v12239_v55 }
0x1779   :  { %v6285_v39 = vpack.c.bf16 %v6277_v26, %v6277_v26 }
0x177b   :  { %10279 = vmatmul.mubr.msk.bf16.vlgmr.msra.gmra.mrb[108].mxu0 %vm1175_vm2, %v6285_v39 }
0x177c   :  { %10294 = vmatprep.mubr.msk.bf16.mxu0 %vm10736_vm1, %v10735_v22 }
0x1804   :  { %v6372_v31 = vpop.f32.mrb[96].mxu0 }
0x1805   :  { %v6326_v9 = vpop.f32.mrb[96].mxu1  ;;  %v10244_v47 = vpop.f32.mrb[97].mxu0 }
0x1806   :  { %v10238_v43 = vpop.f32.mrb[97].mxu1  ;;  %v6375_v52 = vpop.f32.mrb[98].mxu0 }
0x1807   :  { %v6329_v59 = vpop.f32.mrb[98].mxu1  ;;  %v10245_v57 = vpop.f32.mrb[99].mxu0 }
0x1808   :  { %v10239_v45 = vpop.f32.mrb[99].mxu1 }
0x180d   :  { %v6418_v10 = vpop.f32.mrb[100].mxu1 }
0x180e   :  { %v6654_v55 = vcombine.low %v6326_v9, %v6418_v10  ;;  %v6655_v56 = vcombine.high %v6326_v9, %v6418_v10  ;;  %v10250_v11 = vpop.f32.mrb[101].mxu1 }
0x180f   :  { %v6421_v32 = vpop.f32.mrb[102].mxu1 }
0x1810   :  { %v10251_v6 = vpop.f32.mrb[103].mxu1  ;;  %v6464_v49 = vpop.f32.mrb[100].mxu0  ;;  %v6662_v41 = vrot.slane %v6654_v55, %v10939_v14  ;;  %v6669_v36 = vrot.slane %v6655_v56, %v10939_v14 }
0x1811   :  { %v6670_v3 = vcombine.low %v6372_v31, %v6464_v49  ;;  %v6671_v18 = vcombine.high %v6372_v31, %v6464_v49  ;;  %v10256_v4 = vpop.f32.mrb[101].mxu0 }
0x1812   :  { %v6467_v2 = vpop.f32.mrb[102].mxu0 }
0x1813   :  { %v6678_v30 = vrot.slane %v6670_v3, %v10939_v14  ;;  %v6685_v5 = vrot.slane %v6671_v18, %v10939_v14  ;;  %v10257_v19 = vpop.f32.mrb[103].mxu0 }
0x1815   :  { %v6686_v16 = vcombine.low %v6662_v41, %v6678_v30  ;;  %v6687_v48 = vcombine.high %v6662_v41, %v6678_v30  ;;  %v6702_v20 = vcombine.low %v6669_v36, %v6685_v5  ;;  %v6703_v23 = vcombine.high %v6669_v36, %v6685_v5 }
0x1817   :  { %v6694_v8 = vrot.slane %v6686_v16, %v10951_v24  ;;  %v6701_v37 = vrot.slane %v6687_v48, %v10951_v24  ;;  %v6710_v29 = vrot.slane %v6702_v20, %v10951_v24  ;;  %v6717_v1 = vrot.slane %v6703_v23, %v10951_v24 }
0x1819   :  { %v6790_v12 = vcombine.low %v6694_v8, %v6701_v37  ;;  %v9698_v50 = vcombine.high %v6694_v8, %v6701_v37  ;;  %v6806_v58 = vcombine.low %v6710_v29, %v6717_v1  ;;  %v9699_v46 = vcombine.high %v6710_v29, %v6717_v1 }
0x181b   :  { %v6797_v40 = vrot.slane %v6790_v12, %v10939_v14  ;;  %v6805_v25 = vrot.slane %v9698_v50, %v10939_v14  ;;  %v6813_v51 = vrot.slane %v6806_v58, %v10939_v14  ;;  %v6821_v28 = vrot.slane %v9699_v46, %v10939_v14 }
0x181d   :  { %v6823_v26 = vcombine.high %v6797_v40, %v6805_v25  ;;  %v6839_v39 = vcombine.high %v6813_v51, %v6821_v28  ;;  %v6822_v15 = vcombine.low %v6797_v40, %v6805_v25  ;;  %v6838_v31 = vcombine.low %v6813_v51, %v6821_v28 }
0x181f   :  { %v12319_v9 = vrot.slane %v6823_v26, %v10951_v24  ;;  %v6853_v47 = vrot.slane %v6839_v39, %v10951_v24  ;;  %v12323_v43 = vrot.slane %v6822_v15, %v10951_v24  ;;  %v12326_v52 = vrot.slane %v6838_v31, %v10951_v24 }
0x1821   :  { %v6857_v59 = vcombine.high %v12319_v9, %v6853_v47  ;;  %v6855_v57 = vcombine.high %v12323_v43, %v12326_v52  ;;  %v6856_v45 = vcombine.low %v12319_v9, %v6853_v47  ;;  %v6854_v10 = vcombine.low %v12323_v43, %v12326_v52 }
0x1826   :  { %v6510_v55 = vpop.f32.mrb[104].mxu1  ;;  %v6556_v56 = vpop.f32.mrb[104].mxu0 }
0x1827   :  { %v10262_v11 = vpop.f32.mrb[105].mxu1  ;;  %v10268_v32 = vpop.f32.mrb[105].mxu0 }
0x1828   :  { %v6513_v6 = vpop.f32.mrb[106].mxu1  ;;  %v6559_v49 = vpop.f32.mrb[106].mxu0 }
0x1829   :  { %v10263_v3 = vpop.f32.mrb[107].mxu1  ;;  %v10269_v18 = vpop.f32.mrb[107].mxu0 }
0x1845   :  { %v6602_v4 = vpop.f32.mrb[108].mxu1 }
0x1846   :  { %v6722_v2 = vcombine.low %v6510_v55, %v6602_v4  ;;  %v6723_v41 = vcombine.high %v6510_v55, %v6602_v4  ;;  %v10274_v36 = vpop.f32.mrb[109].mxu1 }
0x1847   :  { %v6605_v30 = vpop.f32.mrb[110].mxu1 }
0x1848   :  { %v10275_v5 = vpop.f32.mrb[111].mxu1  ;;  %v6730_v8 = vrot.slane %v6722_v2, %v10939_v14  ;;  %v6737_v37 = vrot.slane %v6723_v41, %v10939_v14 }
0x184e   :  { %v6648_v19 = vpop.f32.mrb[108].mxu0 }
0x184f   :  { %v6738_v16 = vcombine.low %v6556_v56, %v6648_v19  ;;  %v6739_v48 = vcombine.high %v6556_v56, %v6648_v19  ;;  %v10280_v20 = vpop.f32.mrb[109].mxu0 }
0x1850   :  { %v6651_v23 = vpop.f32.mrb[110].mxu0 }
0x1851   :  { %v6746_v29 = vrot.slane %v6738_v16, %v10939_v14  ;;  %v6753_v1 = vrot.slane %v6739_v48, %v10939_v14  ;;  %v10281_v12 = vpop.f32.mrb[111].mxu0 }
0x1853   :  { %v6754_v50 = vcombine.low %v6730_v8, %v6746_v29  ;;  %v6755_v58 = vcombine.high %v6730_v8, %v6746_v29  ;;  %v6770_v46 = vcombine.low %v6737_v37, %v6753_v1  ;;  %v6771_v40 = vcombine.high %v6737_v37, %v6753_v1 }
0x1855   :  { %v6762_v25 = vrot.slane %v6754_v50, %v10951_v24  ;;  %v6769_v51 = vrot.slane %v6755_v58, %v10951_v24  ;;  %v6778_v28 = vrot.slane %v6770_v46, %v10951_v24  ;;  %v6785_v26 = vrot.slane %v6771_v40, %v10951_v24 }
0x1857   :  { %v6858_v39 = vcombine.low %v6762_v25, %v6769_v51  ;;  %v9700_v15 = vcombine.high %v6762_v25, %v6769_v51  ;;  %v6874_v31 = vcombine.low %v6778_v28, %v6785_v26  ;;  %v9701_v9 = vcombine.high %v6778_v28, %v6785_v26 }
0x1859   :  { %v6865_v47 = vrot.slane %v6858_v39, %v10939_v14  ;;  %v6873_v55 = vrot.slane %v9700_v15, %v10939_v14  ;;  %v6881_v56 = vrot.slane %v6874_v31, %v10939_v14  ;;  %v6889_v11 = vrot.slane %v9701_v9, %v10939_v14 }
0x185b   :  { %v6891_v32 = vcombine.high %v6865_v47, %v6873_v55  ;;  %v6907_v6 = vcombine.high %v6881_v56, %v6889_v11  ;;  %v6890_v49 = vcombine.low %v6865_v47, %v6873_v55  ;;  %v6906_v3 = vcombine.low %v6881_v56, %v6889_v11  ;;  %v10696_v56 = vld [vmem:[%s12918_s5 + $0x4] sm:$0xf] }
0x185d   :  { %v6905_v18 = vrot.slane %v6891_v32, %v10951_v24  ;;  %v6921_v4 = vrot.slane %v6907_v6, %v10951_v24  ;;  %v6898_v2 = vrot.slane %v6890_v49, %v10951_v24  ;;  %v6914_v41 = vrot.slane %v6906_v3, %v10951_v24 }
0x185f   :  { %v6925_v36 = vcombine.high %v6905_v18, %v6921_v4  ;;  %v6923_v30 = vcombine.high %v6898_v2, %v6914_v41  ;;  %v6924_v5 = vcombine.low %v6905_v18, %v6921_v4  ;;  %v6922_v19 = vcombine.low %v6898_v2, %v6914_v41 }
0x1861   :  { %v10487_v16 = vpack.i.bf16 %v6925_v36, %v6857_v59  ;;  %v10477_v48 = vpack.i.bf16 %v6923_v30, %v6855_v57  ;;  %v10482_v20 = vpack.i.bf16 %v6924_v5, %v6856_v45  ;;  %v12397_v36 = vld [vmem:[%s12916_s3 + $0x20] sm:$0xff]  ;;  %v12403_v5 = vld [vmem:[%s12916_s3 + $0x28] sm:$0xff] }
0x1862   :  { %v7056_v30 = vrot.slane %v12397_v36, 4 }
0x1863   :  { %10488 = vrot.lane.b32.xlu0 %v10487_v16, %s10745_s15  ;;  %10478 = vrot.lane.b32.xlu1 %v10477_v48, %s10746_s16  ;;  %v12409_v48 = vld [vmem:[%s12916_s3 + $0x30] sm:$0xff] }
0x1867   :  { %10483 = vrot.lane.b32.xlu1 %v10482_v20, %s10747_s17  ;;  %6963 = vrot.lane.b32.xlu0 %v11935_v60, %s10744_s1  ;;  %v7058_v20 = vrot.slane %v12409_v48, 4 }
0x186b   :  { %6959 = vrot.lane.b32.xlu1 %v11913_v38, %s10744_s1 }
0x18d5   :  { %v10479_v23 = vpop.permute.xlu1 %10478  ;;  %v10489_v29 = vpop.permute.xlu0 %10488 }
0x18d6   :  { %v10481_v8 = vunpack.i.h.bf16 %v10479_v23  ;;  %v10480_v37 = vunpack.i.l.bf16 %v10479_v23  ;;  %v10491_v45 = vunpack.i.h.bf16 %v10489_v29  ;;  %v10490_v12 = vunpack.i.l.bf16 %v10489_v29  ;;  %v12415_v23 = vld [vmem:[%s12916_s3 + $0x38] sm:$0xff] }
0x18d8   :  { %v6950_v50 = vsel %vm1175_vm2, %v6854_v10, %v10480_v37  ;;  %v6951_v58 = vsel %vm1175_vm2, %v6922_v19, %v10481_v8  ;;  %v7057_v19 = vrot.slane %v12403_v5, 4  ;;  %v7059_v8 = vrot.slane %v12415_v23, 4 }
0x18d9   :  { %v10484_v1 = vpop.permute.xlu1 %10483  ;;  %v6964_v43 = vpop.permute.xlu0 %6963 }
0x18da   :  { %v10486_v59 = vunpack.i.h.bf16 %v10484_v1  ;;  %v10485_v57 = vunpack.i.l.bf16 %v10484_v1  ;;  %v9703_v16 = vcombine.low %v7056_v30, %v7057_v19  ;;  %v9704_v37 = vcombine.low %v7058_v20, %v7059_v8 }
0x18dc   :  { %v6952_v60 = vsel %vm2307_vm5, %v6950_v50, %v10485_v57  ;;  %v6953_v38 = vsel %vm2307_vm5, %v6951_v58, %v10486_v59  ;;  %10291 = vmatpush3.bf16.msra.mxu0 %v9703_v16 }
0x18dd   :  { %v6954_v46 = vsel %vm2310_vm6, %v6952_v60, %v10490_v12  ;;  %v6955_v40 = vsel %vm2310_vm6, %v6953_v38, %v10491_v45  ;;  %v6960_v25 = vpop.permute.xlu1 %6959  ;;  %10292 = vmatprep.subr.bf16.mxu0 %v10735_v22 }
0x18de   :  { %v6956_v51 = vpack.c.bf16 %v6955_v40, %v6954_v46  ;;  %10285 = vmatpush3.bf16.msra.mxu1 %v6960_v25 }
0x18df   :  { %10298 = vmatprep.subr.bf16.mxu1 %v10735_v22 }
0x18e0   :  { %10293 = vmatpush3.bf16.msra.mxu0 %v9704_v37 }
0x18e1   :  { %10287 = vmatmul.mubr.msk.bf16.vlgmr.msra.gmra.mrb[112].mxu1 %vm61_vm0, %v6956_v51  ;;  %10304 = vmatprep.subr.bf16.mxu0 %v10735_v22  ;;  %v7012_v51 = vrot.slane %v10696_v56, 1 }
0x18e2   :  { %10300 = vmatprep.mubr.msk.bf16.mxu1 %vm10736_vm1, %v10735_v22 }
0x19b4   :  { %v7003_v52 = vpop.f32.mrb[112].mxu1 }
0x19b5   :  { %v7004_v10 = vadd.f32 %v7003_v52, %v6964_v43  ;;  %v10288_v28 = vpop.f32.mrb[113].mxu1 }
0x19b6   :  { %v7006_v26 = vpop.f32.mrb[114].mxu1 }
0x19b7   :  { %v7010_v39 = vadd.f32 %v7004_v10, %v11922_v34  ;;  %v7007_v15 = vadd.f32 %v7006_v26, %v6964_v43  ;;  %v10289_v31 = vpop.f32.mrb[115].mxu1  ;;  %v12381_v34 = vld [vmem:[%s12921_s8] sm:$0xff] }
0x19b9   :  { %v7011_v9 = vadd.f32 %v7007_v15, %v11924_v17  ;;  %v7016_v47 = vsel %vm61_vm0, %v7010_v39, 0.0 }
0x19ba   :  { %7017 = vadd.xlane.f32.xlu1 %v7016_v47  ;;  %v7045_v47 = vrot.slane %v7012_v51, %v10811_v7 }
0x19bb   :  { %v7019_v55 = vsel %vm61_vm0, %v7011_v9, 0.0 }
0x19bc   :  { %7020 = vadd.xlane.f32.xlu0 %v7019_v55 }
0x19cb   :  { %7013 = vrot.lane.b32.xlu1 %v10696_v56, %s10734_s0 }
0x19cf   :  { %7421 = vrot.lane.b32.xlu1 %v12381_v34, %s10740_s14 }
0x19d3   :  { %7425 = vrot.lane.b32.xlu1 %v11434_v44, %s10740_s14 }
0x19d7   :  { %7429 = vrot.lane.b32.xlu1 %v11432_v33, %s10740_s14 }
0x1a47   :  { %v7018_v17 = vpop.xlane.xlu1 %7017 }
0x1a48   :  { %v7022_v11 = vmul.f32 0.03125, %v7018_v17 }
0x1a49   :  { %v7021_v32 = vpop.xlane.xlu0 %7020 }
0x1a4a   :  { %v7024_v6 = vsub.f32 %v7010_v39, %v7022_v11  ;;  %v7023_v49 = vmul.f32 0.03125, %v7021_v32 }
0x1a4b   :  { %v12420_v29 = vpop.permute.xlu1 %7013 }
0x1a4c   :  { %v7025_v3 = vsub.f32 %v7011_v9, %v7023_v49  ;;  %v7026_v18 = vmul.f32 %v7024_v6, %v7024_v6  ;;  %v7015_v9 = vrot.slane %v12420_v29, 1 }
0x1a4e   :  { %v7028_v4 = vsel %vm61_vm0, %v7026_v18, 0.0  ;;  %v7027_v2 = vmul.f32 %v7025_v3, %v7025_v3  ;;  %v7052_v30 = vrot.slane %v7015_v9, %v10811_v7 }
0x1a4f   :  { %7029 = vadd.xlane.f32.xlu0 %v7028_v4  ;;  %v7422_v1 = vpop.permute.xlu1 %7421 }
0x1a50   :  { %v7031_v41 = vsel %vm61_vm0, %v7027_v2, 0.0 }
0x1a53   :  { %7032 = vadd.xlane.f32.xlu0 %v7031_v41  ;;  %v7426_v45 = vpop.permute.xlu1 %7425 }
0x1a57   :  { %v7430_v38 = vpop.permute.xlu1 %7429 }
0x1a58   :  { %v7445_v40 = vcombine.low %v7422_v1, %v7430_v38  ;;  %v7446_v25 = vcombine.high %v7422_v1, %v7430_v38 }
0x1a5a   :  { %v7453_v26 = vrot.slane %v7445_v40, %v10939_v14  ;;  %v7460_v39 = vrot.slane %v7446_v25, %v10939_v14 }
0x1a69   :  { %7060 = vrot.lane.b32.xlu0 %v10696_v56, %s10740_s14 }
0x1a6d   :  { %7433 = vrot.lane.b32.xlu0 %v11440_v35, %s10740_s14 }
0x1adc   :  { %v7030_v59 = vpop.xlane.xlu0 %7029 }
0x1add   :  { %v7034_v57 = vmul.f32 0.03125, %v7030_v59 }
0x1adf   :  { %v7036_v12 = vadd.f32 1e-05, %v7034_v57 }
0x1ae0   :  { %v7033_v50 = vpop.xlane.xlu0 %7032 }
0x1ae1   :  { %10637 = vrsqrt.f32 %v7036_v12  ;;  %v7035_v58 = vmul.f32 0.03125, %v7033_v50 }
0x1ae3   :  { %v7037_v60 = vadd.f32 1e-05, %v7035_v58 }
0x1ae4   :  { %v12422_v46 = vpop.permute.xlu0 %7060 }
0x1ae5   :  { %10639 = vrsqrt.f32 %v7037_v60 }
0x1ae8   :  { %v7434_v43 = vpop.permute.xlu0 %7433 }
0x1ae9   :  { %v7461_v52 = vcombine.low %v7426_v45, %v7434_v43  ;;  %v7462_v10 = vcombine.high %v7426_v45, %v7434_v43 }
0x1aeb   :  { %v10638_v28 = vpop.eup %10637  ;;  %v7469_v15 = vrot.slane %v7461_v52, %v10939_v14  ;;  %v7476_v31 = vrot.slane %v7462_v10, %v10939_v14 }
0x1aec   :  { %v7040_v55 = vmul.f32 %v10638_v28, %v7024_v6 }
0x1aed   :  { %v7477_v17 = vcombine.low %v7453_v26, %v7469_v15  ;;  %v7478_v11 = vcombine.high %v7453_v26, %v7469_v15  ;;  %v7493_v56 = vcombine.low %v7460_v39, %v7476_v31  ;;  %v7494_v32 = vcombine.high %v7460_v39, %v7476_v31 }
0x1aee   :  { %v7047_v19 = vmul.f32 %v7045_v47, %v7040_v55 }
0x1aef   :  { %v10640_v49 = vpop.eup %10639  ;;  %v7485_v18 = vrot.slane %v7477_v17, %v10951_v24  ;;  %v7492_v4 = vrot.slane %v7478_v11, %v10951_v24  ;;  %v7501_v2 = vrot.slane %v7493_v56, %v10951_v24  ;;  %v7508_v41 = vrot.slane %v7494_v32, %v10951_v24 }
0x1af0   :  { %v7041_v16 = vmul.f32 %v10640_v49, %v7025_v3  ;;  %v12439_v50 = vadd.f32 %v7052_v30, %v7047_v19  ;;  %v7062_v17 = vrot.slane %v12422_v46, 1 }
0x1af1   :  { %v7581_v20 = vcombine.low %v7485_v18, %v7492_v4  ;;  %v9710_v8 = vcombine.high %v7485_v18, %v7492_v4  ;;  %v7597_v6 = vcombine.low %v7501_v2, %v7508_v41  ;;  %v9711_v37 = vcombine.high %v7501_v2, %v7508_v41  ;;  %v12469_v41 = vld [vmem:[%s12921_s8 + $0x8] sm:$0xff] }
0x1af2   :  { %v7048_v1 = vmul.f32 %v7045_v47, %v7041_v16  ;;  %v7067_v11 = vrot.slane %v7062_v17, %v10811_v7 }
0x1af3   :  { %v7588_v59 = vrot.slane %v7581_v20, %v10939_v14  ;;  %v7596_v57 = vrot.slane %v9710_v8, %v10939_v14  ;;  %v7604_v45 = vrot.slane %v7597_v6, %v10939_v14  ;;  %v7612_v12 = vrot.slane %v9711_v37, %v10939_v14 }
0x1af4   :  { %v12441_v58 = vadd.f32 %v7052_v30, %v7048_v1 }
0x1af5   :  { %v7613_v60 = vcombine.low %v7588_v59, %v7596_v57  ;;  %v7629_v38 = vcombine.low %v7604_v45, %v7612_v12  ;;  %v7614_v3 = vcombine.high %v7588_v59, %v7596_v57  ;;  %v7630_v40 = vcombine.high %v7604_v45, %v7612_v12 }
0x1af6   :  { %v7063_v25 = vpack.c.bf16 %v12441_v58, %v12439_v50 }
0x1af7   :  { %v7621_v51 = vrot.slane %v7613_v60, %v10951_v24  ;;  %v7637_v43 = vrot.slane %v7629_v38, %v10951_v24  ;;  %v7628_v52 = vrot.slane %v7614_v3, %v10951_v24  ;;  %v7644_v10 = vrot.slane %v7630_v40, %v10951_v24 }
0x1af8   :  { %10295 = vmatmul.mubr.msk.bf16.vlgmr.msra.gmra.mrb[112].mxu0 %vm61_vm0, %v7063_v25 }
0x1af9   :  { %v7645_v28 = vcombine.low %v7621_v51, %v7637_v43  ;;  %v7646_v26 = vcombine.high %v7621_v51, %v7637_v43  ;;  %10306 = vmatprep.mubr.msk.bf16.mxu0 %vm10736_vm1, %v10735_v22  ;;  %v12452_v39 = vcombine.low %v7628_v52, %v7644_v10  ;;  %v12454_v15 = vcombine.high %v7628_v52, %v7644_v10 }
0x1afb   :  { %v7717_v31 = vpack.c.bf16 %v7645_v28, %v7645_v28  ;;  %v7718_v9 = vpack.c.bf16 %v7646_v26, %v7646_v26 }
0x1afd   :  { %v8033_v47 = vsel %vm1175_vm2, %v7717_v31, 0  ;;  %v8079_v55 = vsel %vm1175_vm2, %v7718_v9, 0 }
0x1afe   :  { %10299 = vmatpush3.bf16.xpose.msra.mxu1 %v8033_v47  ;;  %10305 = vmatpush3.bf16.xpose.msra.mxu0 %v8079_v55 }
0x1aff   :  { %10310 = vmatprep.subr.bf16.mxu1 %v10735_v22  ;;  %10316 = vmatprep.subr.bf16.mxu0 %v10735_v22 }
0x1bcb   :  { %v7114_v56 = vpop.f32.mrb[112].mxu0 }
0x1bcc   :  { %v7115_v32 = vadd.f32 %v7114_v56, %v7067_v11  ;;  %v10296_v49 = vpop.f32.mrb[113].mxu0 }
0x1bcd   :  { %v7117_v18 = vpop.f32.mrb[114].mxu0 }
0x1bce   :  { %v12462_v4 = vadd.f32 %v7117_v18, %v7067_v11  ;;  %v10297_v2 = vpop.f32.mrb[115].mxu0  ;;  %7129 = vrot.lane.b32.xlu0 %v7115_v32, %s10738_s22  ;;  %7123 = vrot.lane.b32.xlu1 %v7115_v32, %s10737_s21 }
0x1bcf   :  { %v7719_v2 = vpack.c.bf16 %v12452_v39, %v12452_v39 }
0x1bd2   :  { %7423 = vrot.lane.b32.xlu0 %v12469_v41, %s10740_s14  ;;  %7135 = vrot.lane.b32.xlu1 %v7115_v32, %s10739_s23 }
0x1bd6   :  { %7431 = vrot.lane.b32.xlu0 %v11499_v53, %s10740_s14  ;;  %7427 = vrot.lane.b32.xlu1 %v11491_v0, %s10740_s14 }
0x1bda   :  { %7125 = vrot.lane.b32.xlu0 %v12462_v4, %s10737_s21  ;;  %7435 = vrot.lane.b32.xlu1 %v11497_v13, %s10740_s14 }
0x1bde   :  { %7137 = vrot.lane.b32.xlu0 %v12462_v4, %s10739_s23  ;;  %7131 = vrot.lane.b32.xlu1 %v12462_v4, %s10738_s22 }
0x1be2   :  { %7725 = vrot.lane.b32.xlu1 %v12381_v34, %s10744_s1 }
0x1c40   :  { %v7124_v30 = vpop.permute.xlu1 %7123  ;;  %v7130_v19 = vpop.permute.xlu0 %7129 }
0x1c41   :  { %v7141_v16 = vcombine.low %v7115_v32, %v7130_v19  ;;  %v7142_v20 = vcombine.high %v7115_v32, %v7130_v19 }
0x1c43   :  { %v7149_v59 = vrot.slane %v7141_v16, %v10939_v14  ;;  %v7156_v57 = vrot.slane %v7142_v20, %v10939_v14 }
0x1c44   :  { %v7136_v8 = vpop.permute.xlu1 %7135  ;;  %v7424_v6 = vpop.permute.xlu0 %7423 }
0x1c45   :  { %v7157_v37 = vcombine.low %v7124_v30, %v7136_v8  ;;  %v7158_v1 = vcombine.high %v7124_v30, %v7136_v8  ;;  %v7720_v30 = vpack.c.bf16 %v12454_v15, %v12454_v15 }
0x1c47   :  { %v7165_v45 = vrot.slane %v7157_v37, %v10939_v14  ;;  %v7172_v12 = vrot.slane %v7158_v1, %v10939_v14 }
0x1c48   :  { %v7428_v60 = vpop.permute.xlu1 %7427  ;;  %v7432_v38 = vpop.permute.xlu0 %7431 }
0x1c49   :  { %v7173_v3 = vcombine.low %v7149_v59, %v7165_v45  ;;  %v7174_v34 = vcombine.high %v7149_v59, %v7165_v45  ;;  %v7189_v40 = vcombine.low %v7156_v57, %v7172_v12  ;;  %v7190_v25 = vcombine.high %v7156_v57, %v7172_v12 }
0x1c4a   :  { %v7513_v28 = vcombine.low %v7424_v6, %v7432_v38  ;;  %v7514_v26 = vcombine.high %v7424_v6, %v7432_v38 }
0x1c4b   :  { %v7181_v51 = vrot.slane %v7173_v3, %v10951_v24  ;;  %v7188_v43 = vrot.slane %v7174_v34, %v10951_v24  ;;  %v7197_v52 = vrot.slane %v7189_v40, %v10951_v24  ;;  %v7204_v10 = vrot.slane %v7190_v25, %v10951_v24 }
0x1c4c   :  { %v7436_v31 = vpop.permute.xlu1 %7435  ;;  %v7126_v9 = vpop.permute.xlu0 %7125  ;;  %v7521_v19 = vrot.slane %v7513_v28, %v10939_v14  ;;  %v7528_v16 = vrot.slane %v7514_v26, %v10939_v14 }
0x1c4d   :  { %v7277_v47 = vcombine.low %v7181_v51, %v7188_v43  ;;  %v9706_v55 = vcombine.high %v7181_v51, %v7188_v43  ;;  %v7293_v17 = vcombine.low %v7197_v52, %v7204_v10  ;;  %v9707_v11 = vcombine.high %v7197_v52, %v7204_v10 }
0x1c4e   :  { %v7529_v56 = vcombine.low %v7428_v60, %v7436_v31  ;;  %v7530_v32 = vcombine.high %v7428_v60, %v7436_v31 }
0x1c4f   :  { %v7284_v49 = vrot.slane %v7277_v47, %v10939_v14  ;;  %v7292_v18 = vrot.slane %v9706_v55, %v10939_v14  ;;  %v7300_v1 = vrot.slane %v7293_v17, %v10939_v14  ;;  %v7308_v59 = vrot.slane %v9707_v11, %v10939_v14 }
0x1c50   :  { %v7537_v20 = vrot.slane %v7529_v56, %v10939_v14  ;;  %v7544_v8 = vrot.slane %v7530_v32, %v10939_v14  ;;  %v7132_v6 = vpop.permute.xlu1 %7131  ;;  %v7138_v37 = vpop.permute.xlu0 %7137 }
0x1c51   :  { %v7309_v57 = vcombine.low %v7284_v49, %v7292_v18  ;;  %v7310_v45 = vcombine.high %v7284_v49, %v7292_v18  ;;  %v7209_v3 = vcombine.low %v12462_v4, %v7132_v6  ;;  %v7210_v34 = vcombine.high %v12462_v4, %v7132_v6 }
0x1c52   :  { %v7545_v39 = vcombine.low %v7521_v19, %v7537_v20  ;;  %v7546_v12 = vcombine.high %v7521_v19, %v7537_v20  ;;  %v7561_v60 = vcombine.low %v7528_v16, %v7544_v8  ;;  %v7562_v38 = vcombine.high %v7528_v16, %v7544_v8 }
0x1c53   :  { %v7225_v40 = vcombine.low %v7126_v9, %v7138_v37  ;;  %v7226_v25 = vcombine.high %v7126_v9, %v7138_v37  ;;  %v7217_v28 = vrot.slane %v7209_v3, %v10939_v14  ;;  %v7224_v26 = vrot.slane %v7210_v34, %v10939_v14 }
0x1c54   :  { %v7553_v51 = vrot.slane %v7545_v39, %v10951_v24  ;;  %v7560_v43 = vrot.slane %v7546_v12, %v10951_v24  ;;  %v7569_v52 = vrot.slane %v7561_v60, %v10951_v24  ;;  %v7576_v10 = vrot.slane %v7562_v38, %v10951_v24 }
0x1c55   :  { %v7233_v31 = vrot.slane %v7225_v40, %v10939_v14  ;;  %v7240_v47 = vrot.slane %v7226_v25, %v10939_v14  ;;  %v7325_v55 = vcombine.low %v7300_v1, %v7308_v59  ;;  %v7326_v4 = vcombine.high %v7300_v1, %v7308_v59 }
0x1c56   :  { %v7649_v17 = vcombine.low %v7553_v51, %v7560_v43  ;;  %v9712_v9 = vcombine.high %v7553_v51, %v7560_v43  ;;  %v7665_v16 = vcombine.low %v7569_v52, %v7576_v10  ;;  %v9713_v20 = vcombine.high %v7569_v52, %v7576_v10 }
0x1c57   :  { %v7241_v11 = vcombine.low %v7217_v28, %v7233_v31  ;;  %v7242_v56 = vcombine.high %v7217_v28, %v7233_v31  ;;  %v7257_v32 = vcombine.low %v7224_v26, %v7240_v47  ;;  %v7258_v49 = vcombine.high %v7224_v26, %v7240_v47 }
0x1c58   :  { %v7656_v18 = vrot.slane %v7649_v17, %v10939_v14  ;;  %v7664_v19 = vrot.slane %v9712_v9, %v10939_v14  ;;  %v7317_v59 = vrot.slane %v7309_v57, %v10951_v24  ;;  %v7333_v39 = vrot.slane %v7325_v55, %v10951_v24 }
0x1c59   :  { %v7249_v8 = vrot.slane %v7241_v11, %v10951_v24  ;;  %v7256_v6 = vrot.slane %v7242_v56, %v10951_v24  ;;  %v7265_v37 = vrot.slane %v7257_v32, %v10951_v24  ;;  %v7272_v1 = vrot.slane %v7258_v49, %v10951_v24 }
0x1c5a   :  { %v7324_v12 = vrot.slane %v7310_v45, %v10951_v24  ;;  %v7340_v60 = vrot.slane %v7326_v4, %v10951_v24  ;;  %v7672_v25 = vrot.slane %v7665_v16, %v10939_v14  ;;  %v7680_v51 = vrot.slane %v9713_v20, %v10939_v14 }
0x1c5b   :  { %v7345_v38 = vcombine.low %v7249_v8, %v7256_v6  ;;  %v9708_v3 = vcombine.high %v7249_v8, %v7256_v6  ;;  %v7361_v34 = vcombine.low %v7265_v37, %v7272_v1  ;;  %v9709_v40 = vcombine.high %v7265_v37, %v7272_v1 }
0x1c5c   :  { %v7341_v43 = vcombine.low %v7317_v59, %v7333_v39  ;;  %v7342_v52 = vcombine.high %v7317_v59, %v7333_v39  ;;  %v8125_v47 = vsel %vm1175_vm2, %v7719_v2, 0  ;;  %v7343_v55 = vcombine.low %v7324_v12, %v7340_v60 }
0x1c5d   :  { %v7352_v10 = vrot.slane %v7345_v38, %v10939_v14  ;;  %v7360_v57 = vrot.slane %v9708_v3, %v10939_v14  ;;  %v7368_v28 = vrot.slane %v7361_v34, %v10939_v14  ;;  %v7376_v45 = vrot.slane %v9709_v40, %v10939_v14 }
0x1c5e   :  { %v7413_v26 = vpack.c.bf16 %v7341_v43, %v7341_v43  ;;  %v7414_v31 = vpack.c.bf16 %v7342_v52, %v7342_v52  ;;  %v8171_v4 = vsel %vm1175_vm2, %v7720_v30, 0  ;;  %v7681_v17 = vcombine.low %v7656_v18, %v7664_v19 }
0x1c5f   :  { %v7697_v9 = vcombine.low %v7672_v25, %v7680_v51  ;;  %v7682_v11 = vcombine.high %v7656_v18, %v7664_v19  ;;  %v7377_v56 = vcombine.low %v7352_v10, %v7360_v57  ;;  %v7344_v32 = vcombine.high %v7324_v12, %v7340_v60 }
0x1c60   :  { %10301 = vmatmul.mubr.msk.bf16.vlgmr.msra.gmra.mrb[116].mxu1 %vm1175_vm2, %v7413_v26  ;;  %10307 = vmatmul.mubr.msk.bf16.vlgmr.msra.gmra.mrb[116].mxu0 %vm1175_vm2, %v7414_v31  ;;  %v7698_v49 = vcombine.high %v7672_v25, %v7680_v51  ;;  %v7393_v16 = vcombine.low %v7368_v28, %v7376_v45  ;;  %v7689_v2 = vrot.slane %v7681_v17, %v10951_v24 }
0x1c61   :  { %10311 = vmatpush3.bf16.xpose.msra.mxu1 %v8125_v47  ;;  %10317 = vmatpush3.bf16.xpose.msra.mxu0 %v8171_v4  ;;  %v7705_v15 = vrot.slane %v7697_v9, %v10951_v24  ;;  %v7696_v19 = vrot.slane %v7682_v11, %v10951_v24  ;;  %v7415_v8 = vpack.c.bf16 %v7343_v55, %v7343_v55 }
0x1c62   :  { %10312 = vmatprep.mubr.msk.bf16.mxu1 %vm10736_vm1, %v10735_v22  ;;  %10318 = vmatprep.mubr.msk.bf16.mxu0 %vm10736_vm1, %v10735_v22  ;;  %v7712_v20 = vrot.slane %v7698_v49, %v10951_v24  ;;  %v7416_v6 = vpack.c.bf16 %v7344_v32, %v7344_v32  ;;  %v7385_v59 = vrot.slane %v7377_v56, %v10951_v24 }
0x1c63   :  { %10322 = vmatprep.subr.bf16.mxu1 %v10735_v22  ;;  %10328 = vmatprep.subr.bf16.mxu0 %v10735_v22  ;;  %v7713_v30 = vcombine.low %v7689_v2, %v7705_v15  ;;  %v7714_v18 = vcombine.high %v7689_v2, %v7705_v15  ;;  %v7401_v39 = vrot.slane %v7393_v16, %v10951_v24 }
0x1c64   :  { %v7715_v38 = vcombine.low %v7696_v19, %v7712_v20  ;;  %v7716_v3 = vcombine.high %v7696_v19, %v7712_v20  ;;  %v7378_v34 = vcombine.high %v7352_v10, %v7360_v57  ;;  %v7394_v40 = vcombine.high %v7368_v28, %v7376_v45 }
0x1c65   :  { %v7721_v37 = vpack.c.bf16 %v7713_v30, %v7713_v30  ;;  %v7722_v1 = vpack.c.bf16 %v7714_v18, %v7714_v18  ;;  %v7409_v25 = vcombine.low %v7385_v59, %v7401_v39  ;;  %v7410_v51 = vcombine.high %v7385_v59, %v7401_v39 }
0x1c66   :  { %v7723_v43 = vpack.c.bf16 %v7715_v38, %v7715_v38  ;;  %v7724_v52 = vpack.c.bf16 %v7716_v3, %v7716_v3  ;;  %v7392_v10 = vrot.slane %v7378_v34, %v10951_v24  ;;  %v7408_v57 = vrot.slane %v7394_v40, %v10951_v24 }
0x1c67   :  { %v8217_v12 = vsel %vm1175_vm2, %v7721_v37, 0  ;;  %v8263_v60 = vsel %vm1175_vm2, %v7722_v1, 0  ;;  %v7417_v26 = vpack.c.bf16 %v7409_v25, %v7409_v25  ;;  %v7418_v31 = vpack.c.bf16 %v7410_v51, %v7410_v51 }
0x1c68   :  { %10313 = vmatmul.mubr.msk.bf16.vlgmr.msra.gmra.mrb[120].mxu1 %vm1175_vm2, %v7415_v8  ;;  %10319 = vmatmul.mubr.msk.bf16.vlgmr.msra.gmra.mrb[120].mxu0 %vm1175_vm2, %v7416_v6  ;;  %v8309_v28 = vsel %vm1175_vm2, %v7723_v43, 0  ;;  %v8355_v45 = vsel %vm1175_vm2, %v7724_v52, 0  ;;  %v7411_v47 = vcombine.low %v7392_v10, %v7408_v57  ;;  %v7412_v55 = vcombine.high %v7392_v10, %v7408_v57 }
0x1c69   :  { %10323 = vmatpush3.bf16.xpose.msra.mxu1 %v8217_v12  ;;  %10329 = vmatpush3.bf16.xpose.msra.mxu0 %v8263_v60 }
0x1c6a   :  { %10324 = vmatprep.mubr.msk.bf16.mxu1 %vm10736_vm1, %v10735_v22  ;;  %10330 = vmatprep.mubr.msk.bf16.mxu0 %vm10736_vm1, %v10735_v22  ;;  %v7419_v4 = vpack.c.bf16 %v7411_v47, %v7411_v47  ;;  %v7420_v17 = vpack.c.bf16 %v7412_v55, %v7412_v55 }
0x1c6b   :  { %10334 = vmatprep.subr.bf16.mxu1 %v10735_v22  ;;  %10340 = vmatprep.subr.bf16.mxu0 %v10735_v22 }
0x1c70   :  { %10325 = vmatmul.mubr.msk.bf16.vlgmr.msra.gmra.mrb[124].mxu1 %vm1175_vm2, %v7417_v26  ;;  %10331 = vmatmul.mubr.msk.bf16.vlgmr.msra.gmra.mrb[124].mxu0 %vm1175_vm2, %v7418_v31 }
0x1c71   :  { %10335 = vmatpush3.bf16.xpose.msra.mxu1 %v8309_v28  ;;  %10341 = vmatpush3.bf16.xpose.msra.mxu0 %v8355_v45 }
0x1c72   :  { %10336 = vmatprep.mubr.msk.bf16.mxu1 %vm10736_vm1, %v10735_v22  ;;  %10342 = vmatprep.mubr.msk.bf16.mxu0 %vm10736_vm1, %v10735_v22 }
0x1c73   :  { %10346 = vmatprep.subr.bf16.mxu1 %v10735_v22  ;;  %10352 = vmatprep.subr.bf16.mxu0 %v10735_v22 }
0x1c78   :  { %10337 = vmatmul.mubr.msk.bf16.vlgmr.msra.gmra.mrb[128].mxu1 %vm1175_vm2, %v7419_v4  ;;  %10343 = vmatmul.mubr.msk.bf16.vlgmr.msra.gmra.mrb[128].mxu0 %vm1175_vm2, %v7420_v17 }
0x1c79   :  { %10348 = vmatprep.mubr.msk.bf16.mxu1 %vm10736_vm1, %v10735_v22  ;;  %10354 = vmatprep.mubr.msk.bf16.mxu0 %vm10736_vm1, %v10735_v22 }
0x1d33   :  { %v8069_v9 = vpop.f32.mrb[116].mxu1  ;;  %v8115_v11 = vpop.f32.mrb[116].mxu0 }
0x1d34   :  { %v12582_v56 = vadd.f32 %v8069_v9, %v11600_v42  ;;  %v8116_v32 = vadd.f32 %v8115_v11, %v11600_v42  ;;  %v10302_v49 = vpop.f32.mrb[117].mxu1  ;;  %v10308_v16 = vpop.f32.mrb[117].mxu0 }
0x1d35   :  { %v8072_v2 = vpop.f32.mrb[118].mxu1  ;;  %v8118_v15 = vpop.f32.mrb[118].mxu0 }
0x1d36   :  { %v10303_v30 = vpop.f32.mrb[119].mxu1  ;;  %v10309_v18 = vpop.f32.mrb[119].mxu0  ;;  %v8400_v19 = vsel %vm1175_vm2, %v8116_v32, -inf  ;;  %v8397_v20 = vsel %vm1175_vm2, %v12582_v56, -inf }
0x1d37   :  { %8401 = vmax.xlane.f32.xlu0 %v8400_v19  ;;  %8398 = vmax.xlane.f32.xlu1 %v8397_v20 }
0x1d3b   :  { %v8161_v8 = vpop.f32.mrb[120].mxu1  ;;  %v8207_v6 = vpop.f32.mrb[120].mxu0 }
0x1d3c   :  { %v8162_v37 = vadd.f32 %v8161_v8, %v11600_v42  ;;  %v10314_v1 = vpop.f32.mrb[121].mxu1  ;;  %v10320_v59 = vpop.f32.mrb[121].mxu0  ;;  %v8208_v60 = vadd.f32 %v8207_v6, %v11600_v42 }
0x1d3d   :  { %v8164_v39 = vpop.f32.mrb[122].mxu1  ;;  %v8210_v12 = vpop.f32.mrb[122].mxu0 }
0x1d3e   :  { %v10315_v38 = vpop.f32.mrb[123].mxu1  ;;  %v10321_v3 = vpop.f32.mrb[123].mxu0  ;;  %v8403_v34 = vsel %vm1175_vm2, %v8162_v37, -inf  ;;  %v8406_v40 = vsel %vm1175_vm2, %v8208_v60, -inf }
0x1d3f   :  { %8404 = vmax.xlane.f32.xlu0 %v8403_v34 }
0x1d43   :  { %v8299_v25 = vpop.f32.mrb[124].mxu0  ;;  %8407 = vmax.xlane.f32.xlu0 %v8406_v40  ;;  %v8253_v51 = vpop.f32.mrb[124].mxu1 }
0x1d44   :  { %v8300_v43 = vadd.f32 %v8299_v25, %v11617_v61  ;;  %v8254_v52 = vadd.f32 %v8253_v51, %v11617_v61  ;;  %v10326_v26 = vpop.f32.mrb[125].mxu1  ;;  %v10332_v31 = vpop.f32.mrb[125].mxu0 }
0x1d45   :  { %v8256_v10 = vpop.f32.mrb[126].mxu1  ;;  %v8302_v57 = vpop.f32.mrb[126].mxu0 }
0x1d46   :  { %v10327_v28 = vpop.f32.mrb[127].mxu1  ;;  %v10333_v42 = vpop.f32.mrb[127].mxu0  ;;  %v8412_v45 = vsel %vm1175_vm2, %v8300_v43, -inf  ;;  %v8409_v47 = vsel %vm1175_vm2, %v8254_v52, -inf }
0x1d47   :  { %8413 = vmax.xlane.f32.xlu0 %v8412_v45  ;;  %8410 = vmax.xlane.f32.xlu1 %v8409_v47 }
0x1d4b   :  { %v8345_v55 = vpop.f32.mrb[128].mxu1  ;;  %v8391_v4 = vpop.f32.mrb[128].mxu0 }
0x1d4c   :  { %v12597_v17 = vadd.f32 %v8345_v55, %v11617_v61  ;;  %v12600_v9 = vadd.f32 %v8391_v4, %v11617_v61  ;;  %v10338_v11 = vpop.f32.mrb[129].mxu1  ;;  %v10344_v49 = vpop.f32.mrb[129].mxu0 }
0x1d4d   :  { %v8348_v16 = vpop.f32.mrb[130].mxu1  ;;  %v8394_v2 = vpop.f32.mrb[130].mxu0 }
0x1d4e   :  { %v10339_v15 = vpop.f32.mrb[131].mxu1  ;;  %v10345_v30 = vpop.f32.mrb[131].mxu0  ;;  %v8418_v18 = vsel %vm1175_vm2, %v12600_v9, -inf  ;;  %v8415_v19 = vsel %vm1175_vm2, %v12597_v17, -inf }
0x1d4f   :  { %8419 = vmax.xlane.f32.xlu0 %v8418_v18  ;;  %8416 = vmax.xlane.f32.xlu1 %v8415_v19  ;;  %v7726_v61 = vpop.permute.xlu1 %7725 }
0x1d60   :  { %7733 = vrot.lane.b32.xlu1 %v11432_v33, %s10744_s1 }
0x1d64   :  { %7737 = vrot.lane.b32.xlu1 %v11440_v35, %s10744_s1 }
0x1d65   :  { %7729 = vrot.lane.b32.xlu0 %v11434_v44, %s10744_s1 }
0x1d68   :  { %7727 = vrot.lane.b32.xlu1 %v12469_v41, %s10744_s1 }
0x1dc4   :  { %v8402_v20 = vpop.xlane.xlu0 %8401  ;;  %v8399_v8 = vpop.xlane.xlu1 %8398 }
0x1dc5   :  { %v8422_v6 = vsub.f32 %v8116_v32, %v8402_v20  ;;  %v8421_v1 = vsub.f32 %v12582_v56, %v8399_v8 }
0x1dc7   :  { %v8431_v59 = vmul.f32 1.442695, %v8422_v6  ;;  %v8429_v39 = vmul.f32 1.442695, %v8421_v1 }
0x1dc9   :  { %10641 = vpow2.f32 %v8431_v59 }
0x1dca   :  { %10643 = vpow2.f32 %v8429_v39 }
0x1dcc   :  { %v8405_v33 = vpop.xlane.xlu0 %8404 }
0x1dcd   :  { %v8423_v12 = vsub.f32 %v8162_v37, %v8405_v33 }
0x1dcf   :  { %v8433_v38 = vmul.f32 1.442695, %v8423_v12 }
0x1dd0   :  { %v8408_v35 = vpop.xlane.xlu0 %8407 }
0x1dd1   :  { %10645 = vpow2.f32 %v8433_v38  ;;  %v8424_v3 = vsub.f32 %v8208_v60, %v8408_v35 }
0x1dd3   :  { %v12615_v44 = vpop.eup %10641  ;;  %v8435_v34 = vmul.f32 1.442695, %v8424_v3 }
0x1dd4   :  { %v12617_v41 = vpop.eup %10643  ;;  %v8414_v40 = vpop.xlane.xlu0 %8413  ;;  %v8448_v56 = vsel %vm1175_vm2, %v12615_v44, 0.0 }
0x1dd5   :  { %v8411_v25 = vpop.xlane.xlu1 %8410  ;;  %10647 = vpow2.f32 %v8435_v34  ;;  %v8426_v32 = vsub.f32 %v8300_v43, %v8414_v40  ;;  %8449 = vadd.xlane.f32.xlu0 %v8448_v56  ;;  %v8445_v37 = vsel %vm1175_vm2, %v12617_v41, 0.0 }
0x1dd6   :  { %v8425_v51 = vsub.f32 %v8254_v52, %v8411_v25  ;;  %8446 = vadd.xlane.f32.xlu1 %v8445_v37 }
0x1dd7   :  { %v8439_v26 = vmul.f32 1.442695, %v8426_v32 }
0x1dd8   :  { %v8437_v60 = vmul.f32 1.442695, %v8425_v51 }
0x1dda   :  { %10649 = vpow2.f32 %v8437_v60 }
0x1ddb   :  { %v12623_v31 = vpop.eup %10645  ;;  %10651 = vpow2.f32 %v8439_v26 }
0x1ddc   :  { %v12625_v10 = vpop.xlane.xlu1 %8416  ;;  %v8451_v57 = vsel %vm1175_vm2, %v12623_v31, 0.0  ;;  %v12629_v28 = vpop.xlane.xlu0 %8419 }
0x1ddd   :  { %8452 = vadd.xlane.f32.xlu1 %v8451_v57 }
0x1ddf   :  { %v12631_v43 = vpop.eup %10647 }
0x1de0   :  { %v7734_v52 = vpop.permute.xlu1 %7733  ;;  %v8454_v42 = vsel %vm1175_vm2, %v12631_v43, 0.0  ;;  %v7730_v4 = vpop.permute.xlu0 %7729 }
0x1de1   :  { %8455 = vadd.xlane.f32.xlu0 %v8454_v42  ;;  %v7749_v45 = vcombine.low %v7726_v61, %v7734_v52  ;;  %v7750_v47 = vcombine.high %v7726_v61, %v7734_v52 }
0x1de3   :  { %v7757_v30 = vrot.slane %v7749_v45, %v10939_v14  ;;  %v7764_v18 = vrot.slane %v7750_v47, %v10939_v14 }
0x1de4   :  { %v12635_v55 = vpop.eup %10649  ;;  %v7738_v11 = vpop.permute.xlu1 %7737 }
0x1de5   :  { %v12637_v49 = vpop.eup %10651  ;;  %v7765_v16 = vcombine.low %v7730_v4, %v7738_v11  ;;  %v7766_v2 = vcombine.high %v7730_v4, %v7738_v11  ;;  %v8457_v15 = vsel %vm1175_vm2, %v12635_v55, 0.0 }
0x1de6   :  { %8458 = vadd.xlane.f32.xlu0 %v8457_v15  ;;  %v8460_v20 = vsel %vm1175_vm2, %v12637_v49, 0.0 }
0x1de7   :  { %v7773_v19 = vrot.slane %v7765_v16, %v10939_v14  ;;  %v7780_v61 = vrot.slane %v7766_v2, %v10939_v14 }
0x1de9   :  { %v7781_v8 = vcombine.low %v7757_v30, %v7773_v19  ;;  %v7782_v6 = vcombine.high %v7757_v30, %v7773_v19  ;;  %v7797_v1 = vcombine.low %v7764_v18, %v7780_v61  ;;  %v7798_v59 = vcombine.high %v7764_v18, %v7780_v61 }
0x1dea   :  { %8461 = vadd.xlane.f32.xlu0 %v8460_v20  ;;  %v8428_v61 = vsub.f32 %v12600_v9, %v12629_v28 }
0x1deb   :  { %v7789_v39 = vrot.slane %v7781_v8, %v10951_v24  ;;  %v7796_v33 = vrot.slane %v7782_v6, %v10951_v24  ;;  %v7805_v12 = vrot.slane %v7797_v1, %v10951_v24  ;;  %v7812_v38 = vrot.slane %v7798_v59, %v10951_v24 }
0x1dec   :  { %v8443_v20 = vmul.f32 1.442695, %v8428_v61 }
0x1ded   :  { %v7885_v35 = vcombine.low %v7789_v39, %v7796_v33  ;;  %v9714_v3 = vcombine.high %v7789_v39, %v7796_v33  ;;  %v7901_v34 = vcombine.low %v7805_v12, %v7812_v38  ;;  %v9715_v40 = vcombine.high %v7805_v12, %v7812_v38 }
0x1dee   :  { %7735 = vrot.lane.b32.xlu1 %v11499_v53, %s10744_s1 }
0x1def   :  { %v7892_v25 = vrot.slane %v7885_v35, %v10939_v14  ;;  %v7900_v56 = vrot.slane %v9714_v3, %v10939_v14  ;;  %v7908_v32 = vrot.slane %v7901_v34, %v10939_v14  ;;  %v7916_v51 = vrot.slane %v9715_v40, %v10939_v14 }
0x1df1   :  { %v7917_v37 = vcombine.low %v7892_v25, %v7900_v56  ;;  %v7933_v26 = vcombine.low %v7908_v32, %v7916_v51  ;;  %v7918_v60 = vcombine.high %v7892_v25, %v7900_v56  ;;  %v7934_v57 = vcombine.high %v7908_v32, %v7916_v51 }
0x1df2   :  { %7739 = vrot.lane.b32.xlu1 %v11497_v13, %s10744_s1  ;;  %v8427_v13 = vsub.f32 %v12597_v17, %v12625_v10 }
0x1df3   :  { %v7925_v52 = vrot.slane %v7917_v37, %v10951_v24  ;;  %v7941_v42 = vrot.slane %v7933_v26, %v10951_v24  ;;  %v7932_v53 = vrot.slane %v7918_v60, %v10951_v24  ;;  %v7948_v45 = vrot.slane %v7934_v57, %v10951_v24 }
0x1df4   :  { %v8441_v19 = vmul.f32 1.442695, %v8427_v13 }
0x1df5   :  { %v7949_v47 = vcombine.low %v7925_v52, %v7941_v42  ;;  %v7950_v4 = vcombine.high %v7925_v52, %v7941_v42  ;;  %v7951_v11 = vcombine.low %v7932_v53, %v7948_v45  ;;  %v7952_v16 = vcombine.high %v7932_v53, %v7948_v45 }
0x1df6   :  { %10653 = vpow2.f32 %v8441_v19 }
0x1df7   :  { %v8021_v2 = vpack.c.bf16 %v7949_v47, %v7949_v47  ;;  %v8022_v15 = vpack.c.bf16 %v7950_v4, %v7950_v4  ;;  %10655 = vpow2.f32 %v8443_v20  ;;  %v8024_v12 = vpack.c.bf16 %v7952_v16, %v7952_v16 }
0x1df9   :  { %v8497_v30 = vsel %vm1643_vm4, %v8021_v2, 0  ;;  %v8543_v18 = vsel %vm1643_vm4, %v8022_v15, 0 }
0x1dfa   :  { %10347 = vmatpush3.bf16.msra.mxu1 %v8497_v30  ;;  %10353 = vmatpush3.bf16.msra.mxu0 %v8543_v18 }
0x1dfb   :  { %10358 = vmatprep.subr.bf16.mxu1 %v10735_v22  ;;  %10364 = vmatprep.subr.bf16.mxu0 %v10735_v22 }
0x1e00   :  { %7731 = vrot.lane.b32.xlu0 %v11491_v0, %s10744_s1  ;;  %v12673_v8 = vpop.eup %10653  ;;  %v7728_v0 = vpop.permute.xlu1 %7727 }
0x1e01   :  { %v8463_v6 = vsel %vm1175_vm2, %v12673_v8, 0.0  ;;  %v12677_v1 = vpop.eup %10655 }
0x1e02   :  { %v8466_v17 = vsel %vm1175_vm2, %v12677_v1, 0.0 }
0x1e16   :  { %8464 = vadd.xlane.f32.xlu1 %v8463_v6 }
0x1e1f   :  { %8467 = vadd.xlane.f32.xlu0 %v8466_v17 }
0x1e27   :  { %9165 = vrot.lane.b32.xlu1 %v12403_v5, %s10734_s0 }
0x1e2b   :  { %9167 = vrot.lane.b32.xlu1 %v12409_v48, %s10734_s0 }
0x1e35   :  { %9163 = vrot.lane.b32.xlu0 %v12397_v36, %s10734_s0  ;;  %v8023_v36 = vpack.c.bf16 %v7951_v11, %v7951_v11 }
0x1e37   :  { %v8589_v34 = vsel %vm1643_vm4, %v8023_v36, 0 }
0x1e39   :  { %9169 = vrot.lane.b32.xlu0 %v12415_v23, %s10734_s0  ;;  %v8635_v23 = vsel %vm1643_vm4, %v8024_v12, 0 }
0x1e62   :  { %v8450_v9 = vpop.xlane.xlu0 %8449 }
0x1e63   :  { %10657 = vrcp.f32 %v8450_v9  ;;  %v8447_v10 = vpop.xlane.xlu1 %8446 }
0x1e64   :  { %10659 = vrcp.f32 %v8447_v10 }
0x1e6a   :  { %v8453_v28 = vpop.xlane.xlu1 %8452 }
0x1e6b   :  { %10661 = vrcp.f32 %v8453_v28 }
0x1e6d   :  { %v10658_v59 = vpop.eup %10657 }
0x1e6e   :  { %v10660_v39 = vpop.eup %10659  ;;  %v8478_v5 = vmul.f32 %v10658_v59, %v12615_v44  ;;  %v8456_v33 = vpop.xlane.xlu0 %8455 }
0x1e6f   :  { %v8477_v48 = vmul.f32 %v10660_v39, %v12617_v41  ;;  %10663 = vrcp.f32 %v8456_v33  ;;  %v7736_v41 = vpop.permute.xlu1 %7735 }
0x1e70   :  { %v8486_v38 = vpack.c.bf16 %v8478_v5, %v8478_v5  ;;  %v7817_v37 = vcombine.low %v7728_v0, %v7736_v41  ;;  %v7818_v26 = vcombine.high %v7728_v0, %v7736_v41 }
0x1e71   :  { %v8485_v35 = vpack.c.bf16 %v8477_v48, %v8477_v48 }
0x1e72   :  { %10355 = vmatmul.mubr.msk.bf16.vlgmr.msra.gmra.mrb[132].mxu0 %vm1175_vm2, %v8486_v38  ;;  %v7832_v45 = vrot.slane %v7818_v26, %v10939_v14 }
0x1e73   :  { %v8459_v3 = vpop.xlane.xlu0 %8458  ;;  %10349 = vmatmul.mubr.msk.bf16.vlgmr.msra.gmra.mrb[132].mxu1 %vm1175_vm2, %v8485_v35  ;;  %10365 = vmatpush3.bf16.msra.mxu0 %v8635_v23  ;;  %v7740_v60 = vpop.permute.xlu1 %7739 }
0x1e74   :  { %10359 = vmatpush3.bf16.msra.mxu1 %v8589_v34  ;;  %10360 = vmatprep.mubr.msk.bf16.mxu1 %vm10736_vm1, %v10735_v22  ;;  %10665 = vrcp.f32 %v8459_v3 }
0x1e75   :  { %v10662_v44 = vpop.eup %10661  ;;  %10366 = vmatprep.mubr.msk.bf16.mxu0 %vm10736_vm1, %v10735_v22  ;;  %10370 = vmatprep.subr.bf16.mxu1 %v10735_v22 }
0x1e76   :  { %v8479_v40 = vmul.f32 %v10662_v44, %v12623_v31  ;;  %10376 = vmatprep.subr.bf16.mxu0 %v10735_v22  ;;  %v7825_v31 = vrot.slane %v7817_v37, %v10939_v14 }
0x1e77   :  { %v8462_v25 = vpop.xlane.xlu0 %8461 }
0x1e78   :  { %v8487_v56 = vpack.c.bf16 %v8479_v40, %v8479_v40  ;;  %10667 = vrcp.f32 %v8462_v25 }
0x1e79   :  { %v10664_v32 = vpop.eup %10663 }
0x1e7a   :  { %v8480_v51 = vmul.f32 %v10664_v32, %v12631_v43 }
0x1e7b   :  { %v7732_v57 = vpop.permute.xlu0 %7731  ;;  %10361 = vmatmul.mubr.msk.bf16.vlgmr.msra.gmra.mrb[136].mxu1 %vm1175_vm2, %v8487_v56 }
0x1e7c   :  { %v7833_v52 = vcombine.low %v7732_v57, %v7740_v60  ;;  %v7834_v42 = vcombine.high %v7732_v57, %v7740_v60  ;;  %v8488_v53 = vpack.c.bf16 %v8480_v51, %v8480_v51  ;;  %10372 = vmatprep.mubr.msk.bf16.mxu1 %vm10736_vm1, %v10735_v22 }
0x1e7e   :  { %v7841_v47 = vrot.slane %v7833_v52, %v10939_v14  ;;  %v7848_v43 = vrot.slane %v7834_v42, %v10939_v14  ;;  %10367 = vmatmul.mubr.msk.bf16.vlgmr.msra.gmra.mrb[136].mxu0 %vm1175_vm2, %v8488_v53  ;;  %v10666_v33 = vpop.eup %10665 }
0x1e7f   :  { %10378 = vmatprep.mubr.msk.bf16.mxu0 %vm10736_vm1, %v10735_v22  ;;  %v8481_v41 = vmul.f32 %v10666_v33, %v12635_v55 }
0x1e80   :  { %v7849_v4 = vcombine.low %v7825_v31, %v7841_v47  ;;  %v7850_v11 = vcombine.high %v7825_v31, %v7841_v47  ;;  %v7865_v16 = vcombine.low %v7832_v45, %v7848_v43  ;;  %v7866_v2 = vcombine.high %v7832_v45, %v7848_v43 }
0x1e81   :  { %v8489_v60 = vpack.c.bf16 %v8481_v41, %v8481_v41 }
0x1e82   :  { %v7857_v15 = vrot.slane %v7849_v4, %v10951_v24  ;;  %v7864_v30 = vrot.slane %v7850_v11, %v10951_v24  ;;  %v7873_v18 = vrot.slane %v7865_v16, %v10951_v24  ;;  %v7880_v13 = vrot.slane %v7866_v2, %v10951_v24  ;;  %v10668_v35 = vpop.eup %10667 }
0x1e83   :  { %v8482_v40 = vmul.f32 %v10668_v35, %v12637_v49 }
0x1e84   :  { %v7953_v19 = vcombine.low %v7857_v15, %v7864_v30  ;;  %v9716_v61 = vcombine.high %v7857_v15, %v7864_v30  ;;  %v7969_v20 = vcombine.low %v7873_v18, %v7880_v13  ;;  %v9717_v6 = vcombine.high %v7873_v18, %v7880_v13 }
0x1e85   :  { %v8490_v57 = vpack.c.bf16 %v8482_v40, %v8482_v40 }
0x1e86   :  { %v7960_v17 = vrot.slane %v7953_v19, %v10939_v14  ;;  %v7968_v0 = vrot.slane %v9716_v61, %v10939_v14  ;;  %v7976_v9 = vrot.slane %v7969_v20, %v10939_v14  ;;  %v7984_v10 = vrot.slane %v9717_v6, %v10939_v14 }
0x1e88   :  { %v7985_v28 = vcombine.low %v7960_v17, %v7968_v0  ;;  %v8001_v59 = vcombine.low %v7976_v9, %v7984_v10  ;;  %v7986_v39 = vcombine.high %v7960_v17, %v7968_v0  ;;  %v8002_v5 = vcombine.high %v7976_v9, %v7984_v10 }
0x1e8a   :  { %v7993_v12 = vrot.slane %v7985_v28, %v10951_v24  ;;  %v8009_v48 = vrot.slane %v8001_v59, %v10951_v24  ;;  %v8000_v36 = vrot.slane %v7986_v39, %v10951_v24  ;;  %v8016_v38 = vrot.slane %v8002_v5, %v10951_v24 }
0x1e8c   :  { %v8017_v23 = vcombine.low %v7993_v12, %v8009_v48  ;;  %v8018_v3 = vcombine.high %v7993_v12, %v8009_v48  ;;  %v8019_v34 = vcombine.low %v8000_v36, %v8016_v38  ;;  %v8020_v44 = vcombine.high %v8000_v36, %v8016_v38 }
0x1e8e   :  { %v8025_v25 = vpack.c.bf16 %v8017_v23, %v8017_v23  ;;  %v8026_v56 = vpack.c.bf16 %v8018_v3, %v8018_v3  ;;  %v8027_v37 = vpack.c.bf16 %v8019_v34, %v8019_v34  ;;  %v8028_v26 = vpack.c.bf16 %v8020_v44, %v8020_v44 }
0x1e90   :  { %v8681_v32 = vsel %vm1643_vm4, %v8025_v25, 0  ;;  %v8727_v51 = vsel %vm1643_vm4, %v8026_v56, 0  ;;  %v8773_v55 = vsel %vm1643_vm4, %v8027_v37, 0  ;;  %v8819_v49 = vsel %vm1643_vm4, %v8028_v26, 0 }
0x1e91   :  { %10371 = vmatpush3.bf16.msra.mxu1 %v8681_v32  ;;  %10377 = vmatpush3.bf16.msra.mxu0 %v8727_v51 }
0x1e92   :  { %10382 = vmatprep.subr.bf16.mxu1 %v10735_v22  ;;  %10388 = vmatprep.subr.bf16.mxu0 %v10735_v22 }
0x1e94   :  { %10373 = vmatmul.mubr.msk.bf16.vlgmr.msra.gmra.mrb[140].mxu1 %vm1175_vm2, %v8489_v60  ;;  %10379 = vmatmul.mubr.msk.bf16.vlgmr.msra.gmra.mrb[140].mxu0 %vm1175_vm2, %v8490_v57 }
0x1e95   :  { %10383 = vmatpush3.bf16.msra.mxu1 %v8773_v55  ;;  %10389 = vmatpush3.bf16.msra.mxu0 %v8819_v49 }
0x1e96   :  { %10384 = vmatprep.mubr.msk.bf16.mxu1 %vm10736_vm1, %v10735_v22  ;;  %10390 = vmatprep.mubr.msk.bf16.mxu0 %vm10736_vm1, %v10735_v22 }
0x1e97   :  { %10394 = vmatprep.subr.bf16.mxu1 %v10735_v22  ;;  %10402 = vmatprep.subr.bf16.mxu0 %v10735_v22 }
0x1ea3   :  { %v8465_v52 = vpop.xlane.xlu1 %8464 }
0x1ea4   :  { %10669 = vrcp.f32 %v8465_v52 }
0x1ea7   :  { %v9166_v16 = vpop.permute.xlu1 %9165 }
0x1ea8   :  { %v9172_v15 = vrot.slane %v9166_v16, 4 }
0x1eab   :  { %v9168_v18 = vpop.permute.xlu1 %9167 }
0x1eac   :  { %v8468_v42 = vpop.xlane.xlu0 %8467  ;;  %v9173_v19 = vrot.slane %v9168_v18, 4 }
0x1ead   :  { %10671 = vrcp.f32 %v8468_v42 }
0x1eae   :  { %v10670_v53 = vpop.eup %10669 }
0x1eaf   :  { %v8483_v31 = vmul.f32 %v10670_v53, %v12673_v8 }
0x1eb0   :  { %v9164_v11 = vpop.permute.xlu0 %9163 }
0x1eb1   :  { %v8491_v45 = vpack.c.bf16 %v8483_v31, %v8483_v31  ;;  %v9171_v2 = vrot.slane %v9164_v11, 4 }
0x1eb3   :  { %10385 = vmatmul.mubr.msk.bf16.vlgmr.msra.gmra.mrb[144].mxu1 %vm1175_vm2, %v8491_v45  ;;  %v9738_v8 = vcombine.low %v9171_v2, %v9172_v15 }
0x1eb4   :  { %10398 = vmatprep.mubr.msk.bf16.mxu1 %vm10736_vm1, %v10735_v22  ;;  %v9170_v30 = vpop.permute.xlu0 %9169 }
0x1eb5   :  { %v9174_v13 = vrot.slane %v9170_v30, 4  ;;  %10395 = vmatpush3.bf16.msra.mxu1 %v9738_v8 }
0x1eb6   :  { %10396 = vmatprep.subr.bf16.mxu1 %v10735_v22 }
0x1eb7   :  { %v10672_v47 = vpop.eup %10671  ;;  %v9739_v61 = vcombine.low %v9173_v19, %v9174_v13 }
0x1eb8   :  { %v8484_v43 = vmul.f32 %v10672_v47, %v12677_v1 }
0x1eb9   :  { %10397 = vmatpush3.bf16.msra.mxu1 %v9739_v61 }
0x1eba   :  { %v8492_v4 = vpack.c.bf16 %v8484_v43, %v8484_v43  ;;  %10410 = vmatprep.subr.bf16.mxu1 %v10735_v22 }
0x1ebc   :  { %10391 = vmatmul.mubr.msk.bf16.vlgmr.msra.gmra.mrb[144].mxu0 %vm1175_vm2, %v8492_v4 }
0x1ebd   :  { %10406 = vmatprep.mubr.msk.bf16.mxu0 %vm10736_vm1, %v10735_v22 }
0x1f45   :  { %v8579_v1 = vpop.f32.mrb[132].mxu0 }
0x1f46   :  { %v8533_v20 = vpop.f32.mrb[132].mxu1  ;;  %v10356_v6 = vpop.f32.mrb[133].mxu0 }
0x1f47   :  { %v10350_v17 = vpop.f32.mrb[133].mxu1  ;;  %v8582_v0 = vpop.f32.mrb[134].mxu0 }
0x1f48   :  { %v8536_v9 = vpop.f32.mrb[134].mxu1  ;;  %v10357_v10 = vpop.f32.mrb[135].mxu0 }
0x1f49   :  { %v10351_v28 = vpop.f32.mrb[135].mxu1 }
0x1f4e   :  { %v8625_v59 = vpop.f32.mrb[136].mxu1 }
0x1f4f   :  { %v8861_v39 = vcombine.low %v8533_v20, %v8625_v59  ;;  %v8862_v5 = vcombine.high %v8533_v20, %v8625_v59  ;;  %v10362_v33 = vpop.f32.mrb[137].mxu1 }
0x1f50   :  { %v8628_v12 = vpop.f32.mrb[138].mxu1 }
0x1f51   :  { %v10363_v48 = vpop.f32.mrb[139].mxu1  ;;  %v8671_v36 = vpop.f32.mrb[136].mxu0  ;;  %v8869_v34 = vrot.slane %v8861_v39, %v10939_v14  ;;  %v8876_v44 = vrot.slane %v8862_v5, %v10939_v14 }
0x1f52   :  { %v8877_v38 = vcombine.low %v8579_v1, %v8671_v36  ;;  %v8878_v35 = vcombine.high %v8579_v1, %v8671_v36  ;;  %v10368_v23 = vpop.f32.mrb[137].mxu0 }
0x1f53   :  { %v8674_v3 = vpop.f32.mrb[138].mxu0 }
0x1f54   :  { %v8885_v41 = vrot.slane %v8877_v38, %v10939_v14  ;;  %v8892_v40 = vrot.slane %v8878_v35, %v10939_v14  ;;  %v10369_v25 = vpop.f32.mrb[139].mxu0 }
0x1f56   :  { %v8893_v56 = vcombine.low %v8869_v34, %v8885_v41  ;;  %v8894_v32 = vcombine.high %v8869_v34, %v8885_v41  ;;  %v8909_v51 = vcombine.low %v8876_v44, %v8892_v40  ;;  %v8910_v37 = vcombine.high %v8876_v44, %v8892_v40 }
0x1f58   :  { %v8901_v26 = vrot.slane %v8893_v56, %v10951_v24  ;;  %v8908_v60 = vrot.slane %v8894_v32, %v10951_v24  ;;  %v8917_v57 = vrot.slane %v8909_v51, %v10951_v24  ;;  %v8924_v55 = vrot.slane %v8910_v37, %v10951_v24 }
0x1f5a   :  { %v8997_v49 = vcombine.low %v8901_v26, %v8908_v60  ;;  %v9734_v52 = vcombine.high %v8901_v26, %v8908_v60  ;;  %v9013_v42 = vcombine.low %v8917_v57, %v8924_v55  ;;  %v9735_v53 = vcombine.high %v8917_v57, %v8924_v55 }
0x1f5c   :  { %v9004_v31 = vrot.slane %v8997_v49, %v10939_v14  ;;  %v9012_v45 = vrot.slane %v9734_v52, %v10939_v14  ;;  %v9020_v47 = vrot.slane %v9013_v42, %v10939_v14  ;;  %v9028_v43 = vrot.slane %v9735_v53, %v10939_v14 }
0x1f5e   :  { %v9030_v4 = vcombine.high %v9004_v31, %v9012_v45  ;;  %v9046_v11 = vcombine.high %v9020_v47, %v9028_v43  ;;  %v9029_v16 = vcombine.low %v9004_v31, %v9012_v45  ;;  %v9045_v2 = vcombine.low %v9020_v47, %v9028_v43 }
0x1f60   :  { %v12764_v15 = vrot.slane %v9030_v4, %v10951_v24  ;;  %v9060_v8 = vrot.slane %v9046_v11, %v10951_v24  ;;  %v12768_v30 = vrot.slane %v9029_v16, %v10951_v24  ;;  %v12771_v18 = vrot.slane %v9045_v2, %v10951_v24 }
0x1f62   :  { %v9063_v13 = vcombine.low %v12764_v15, %v9060_v8  ;;  %v9062_v19 = vcombine.high %v12768_v30, %v12771_v18  ;;  %v9064_v61 = vcombine.high %v12764_v15, %v9060_v8  ;;  %v9061_v1 = vcombine.low %v12768_v30, %v12771_v18 }
0x1f67   :  { %v8717_v20 = vpop.f32.mrb[140].mxu1  ;;  %v8763_v6 = vpop.f32.mrb[140].mxu0 }
0x1f68   :  { %v10374_v17 = vpop.f32.mrb[141].mxu1  ;;  %v10380_v0 = vpop.f32.mrb[141].mxu0 }
0x1f69   :  { %v8720_v9 = vpop.f32.mrb[142].mxu1  ;;  %v8766_v10 = vpop.f32.mrb[142].mxu0 }
0x1f6a   :  { %v10375_v28 = vpop.f32.mrb[143].mxu1  ;;  %v10381_v59 = vpop.f32.mrb[143].mxu0 }
0x1f86   :  { %v8809_v39 = vpop.f32.mrb[144].mxu1 }
0x1f87   :  { %v8929_v5 = vcombine.low %v8717_v20, %v8809_v39  ;;  %v8930_v33 = vcombine.high %v8717_v20, %v8809_v39  ;;  %v10386_v12 = vpop.f32.mrb[145].mxu1 }
0x1f88   :  { %v8812_v48 = vpop.f32.mrb[146].mxu1 }
0x1f89   :  { %v10387_v36 = vpop.f32.mrb[147].mxu1  ;;  %v8937_v44 = vrot.slane %v8929_v5, %v10939_v14  ;;  %v8944_v41 = vrot.slane %v8930_v33, %v10939_v14 }
0x1f8f   :  { %v8855_v38 = vpop.f32.mrb[144].mxu0 }
0x1f90   :  { %v8945_v35 = vcombine.low %v8763_v6, %v8855_v38  ;;  %v8946_v23 = vcombine.high %v8763_v6, %v8855_v38  ;;  %v10392_v3 = vpop.f32.mrb[145].mxu0 }
0x1f91   :  { %v8858_v34 = vpop.f32.mrb[146].mxu0 }
0x1f92   :  { %v8953_v40 = vrot.slane %v8945_v35, %v10939_v14  ;;  %v8960_v25 = vrot.slane %v8946_v23, %v10939_v14  ;;  %v10393_v56 = vpop.f32.mrb[147].mxu0 }
0x1f94   :  { %v8961_v32 = vcombine.low %v8937_v44, %v8953_v40  ;;  %v8962_v51 = vcombine.high %v8937_v44, %v8953_v40  ;;  %v8977_v37 = vcombine.low %v8944_v41, %v8960_v25  ;;  %v8978_v26 = vcombine.high %v8944_v41, %v8960_v25 }
0x1f96   :  { %v8969_v60 = vrot.slane %v8961_v32, %v10951_v24  ;;  %v8976_v57 = vrot.slane %v8962_v51, %v10951_v24  ;;  %v8985_v55 = vrot.slane %v8977_v37, %v10951_v24  ;;  %v8992_v49 = vrot.slane %v8978_v26, %v10951_v24 }
0x1f98   :  { %v9065_v52 = vcombine.low %v8969_v60, %v8976_v57  ;;  %v9736_v42 = vcombine.high %v8969_v60, %v8976_v57  ;;  %v9081_v53 = vcombine.low %v8985_v55, %v8992_v49  ;;  %v9737_v31 = vcombine.high %v8985_v55, %v8992_v49 }
0x1f9a   :  { %v9072_v45 = vrot.slane %v9065_v52, %v10939_v14  ;;  %v9080_v47 = vrot.slane %v9736_v42, %v10939_v14  ;;  %v9088_v43 = vrot.slane %v9081_v53, %v10939_v14  ;;  %v9096_v4 = vrot.slane %v9737_v31, %v10939_v14  ;;  %v12801_v14 = vld [vmem:[%s12918_s5 + $0x4] sm:$0xf] }
0x1f9b   :  { %v10704_v52 = vld [vmem:[%s12916_s3 + $0x20] sm:$0xff] }
0x1f9c   :  { %v9098_v11 = vcombine.high %v9072_v45, %v9080_v47  ;;  %v9114_v16 = vcombine.high %v9088_v43, %v9096_v4  ;;  %v9097_v2 = vcombine.low %v9072_v45, %v9080_v47  ;;  %v9113_v15 = vcombine.low %v9088_v43, %v9096_v4 }
0x1f9e   :  { %v9112_v8 = vrot.slane %v9098_v11, %v10951_v24  ;;  %v9128_v20 = vrot.slane %v9114_v16, %v10951_v24  ;;  %v9105_v6 = vrot.slane %v9097_v2, %v10951_v24  ;;  %v9121_v17 = vrot.slane %v9113_v15, %v10951_v24  ;;  %v10707_v15 = vld [vmem:[%s12916_s3 + $0x28] sm:$0xff] }
0x1fa0   :  { %v9131_v0 = vcombine.low %v9112_v8, %v9128_v20  ;;  %v9130_v9 = vcombine.high %v9105_v6, %v9121_v17  ;;  %v9132_v10 = vcombine.high %v9112_v8, %v9128_v20  ;;  %v9129_v28 = vcombine.low %v9105_v6, %v9121_v17 }
0x1fa2   :  { %v10497_v59 = vpack.i.bf16 %v9131_v0, %v9063_v13  ;;  %v10492_v39 = vpack.i.bf16 %v9130_v9, %v9062_v19  ;;  %v10502_v5 = vpack.i.bf16 %v9132_v10, %v9064_v61 }
0x1fa4   :  { %10498 = vrot.lane.b32.xlu0 %v10497_v59, %s10747_s17  ;;  %10493 = vrot.lane.b32.xlu1 %v10492_v39, %s10746_s16 }
0x1fa8   :  { %10503 = vrot.lane.b32.xlu1 %v10502_v5, %s10745_s15  ;;  %9175 = vrot.lane.b32.xlu0 %v12801_v14, %s10744_s1 }
0x2016   :  { %v10499_v24 = vpop.permute.xlu0 %10498  ;;  %v10494_v33 = vpop.permute.xlu1 %10493 }
0x2017   :  { %v10496_v12 = vunpack.i.h.bf16 %v10494_v33  ;;  %v10495_v13 = vunpack.i.l.bf16 %v10494_v33  ;;  %v10501_v19 = vunpack.i.h.bf16 %v10499_v24  ;;  %v10500_v61 = vunpack.i.l.bf16 %v10499_v24 }
0x2019   :  { %v9157_v48 = vsel %vm1175_vm2, %v9061_v1, %v10495_v13  ;;  %v9158_v36 = vsel %vm1175_vm2, %v9129_v28, %v10496_v12 }
0x201a   :  { %v10504_v38 = vpop.permute.xlu1 %10503  ;;  %v9159_v3 = vsel %vm2307_vm5, %v9157_v48, %v10500_v61  ;;  %v9160_v34 = vsel %vm2307_vm5, %v9158_v36, %v10501_v19  ;;  %v9176_v30 = vpop.permute.xlu0 %9175  ;;  %v9238_v19 = vrot.slane %v12801_v14, 2 }
0x201b   :  { %v10506_v35 = vunpack.i.h.bf16 %v10504_v38  ;;  %v10505_v23 = vunpack.i.l.bf16 %v10504_v38  ;;  %v9177_v18 = vrot.slane %v9176_v30, 1 }
0x201c   :  { %v9269_v36 = vrot.slane %v9238_v19, %v10811_v7 }
0x201d   :  { %v9161_v44 = vsel %vm2310_vm6, %v9159_v3, %v10505_v23  ;;  %v9162_v41 = vsel %vm2310_vm6, %v9160_v34, %v10506_v35  ;;  %v9182_v1 = vrot.slane %v9177_v18, %v10811_v7  ;;  %v9239_v35 = vrot.slane %v12420_v29, 2 }
0x201e   :  { %v9178_v40 = vpack.c.bf16 %v9162_v41, %v9161_v44 }
0x201f   :  { %v9276_v44 = vrot.slane %v9239_v35, %v10811_v7 }
0x2020   :  { %10399 = vmatmul.mubr.msk.bf16.vlgmr.msra.gmra.mrb[148].mxu1 %vm61_vm0, %v9178_v40 }
0x2021   :  { %10418 = vmatprep.mubr.msk.bf16.mxu1 %vm10736_vm1, %v10735_v22 }
0x20f3   :  { %v9229_v25 = vpop.f32.mrb[148].mxu1 }
0x20f4   :  { %v9230_v56 = vadd.f32 %v9229_v25, %v9182_v1  ;;  %v10400_v32 = vpop.f32.mrb[149].mxu1  ;;  %v10518_v25 = vld [vmem:[%s12917_s4 + $0x28] sm:$0xff]  }
0x20f5   :  { %v9232_v51 = vpop.f32.mrb[150].mxu1  ;;  %v9292_v32 = vrot.slane %v12422_v46, 2 }
0x20f6   :  { %v9236_v37 = vadd.f32 %v9230_v56, %v12439_v50  ;;  %v9233_v26 = vadd.f32 %v9232_v51, %v9182_v1  ;;  %v10401_v60 = vpop.f32.mrb[151].mxu1  ;;  %v10705_v50 = vld [vmem:[%s12916_s3 + $0x30] sm:$0xff]  ;;  %v10517_v1 = vld [vmem:[%s12917_s4 + $0x20] sm:$0xff]   ;;  %v10520_v56 = vld [vmem:[%s12917_s4 + $0x38] sm:$0xff]  }
0x20f7   :  { %10411 = vmatpush3.bf16.msra.mxu1 %v10517_v1  ;;  %v9297_v51 = vrot.slane %v9292_v32, %v10811_v7 }
0x20f8   :  { %v9237_v57 = vadd.f32 %v9233_v26, %v12441_v58  ;;  %v9240_v55 = vsel %vm61_vm0, %v9236_v37, 0.0  ;;  %v10706_v58 = vld [vmem:[%s12916_s3 + $0x38] sm:$0xff]  ;;  %10412 = vmatprep.subr.bf16.mxu1 %v10735_v22 }
0x20f9   :  { %9241 = vadd.xlane.f32.xlu1 %v9240_v55 }
0x20fa   :  { %v9243_v49 = vsel %vm61_vm0, %v9237_v57, 0.0 }
0x20fb   :  { %9244 = vadd.xlane.f32.xlu0 %v9243_v49  ;;  %10413 = vmatpush3.bf16.msra.mxu1 %v10518_v25 }
0x20fc   :  { %10414 = vmatprep.subr.bf16.mxu1 %v10735_v22 }
0x210a   :  { %9280 = vrot.lane.b32.xlu1 %v10704_v52, %s10740_s14 }
0x210e   :  { %9284 = vrot.lane.b32.xlu1 %v10705_v50, %s10740_s14 }
0x2112   :  { %9286 = vrot.lane.b32.xlu1 %v10706_v58, %s10740_s14 }
0x2186   :  { %v9242_v42 = vpop.xlane.xlu1 %9241 }
0x2187   :  { %v9246_v53 = vmul.f32 0.03125, %v9242_v42 }
0x2188   :  { %v9245_v31 = vpop.xlane.xlu0 %9244 }
0x2189   :  { %v9248_v45 = vsub.f32 %v9236_v37, %v9246_v53  ;;  %v9247_v47 = vmul.f32 0.03125, %v9245_v31 }
0x218a   :  { %v9281_v8 = vpop.permute.xlu1 %9280 }
0x218b   :  { %v9249_v43 = vsub.f32 %v9237_v57, %v9247_v47  ;;  %v9250_v4 = vmul.f32 %v9248_v45, %v9248_v45  ;;  %v9288_v39 = vrot.slane %v9281_v8, 4 }
0x218d   :  { %v9252_v11 = vsel %vm61_vm0, %v9250_v4, 0.0  ;;  %v9251_v16 = vmul.f32 %v9249_v43, %v9249_v43 }
0x218e   :  { %9253 = vadd.xlane.f32.xlu0 %v9252_v11  ;;  %v9285_v6 = vpop.permute.xlu1 %9284 }
0x218f   :  { %v9255_v2 = vsel %vm61_vm0, %v9251_v16, 0.0  ;;  %v9290_v24 = vrot.slane %v9285_v6, 4 }
0x2192   :  { %9256 = vadd.xlane.f32.xlu0 %v9255_v2  ;;  %v9287_v28 = vpop.permute.xlu1 %9286 }
0x2193   :  { %v9291_v12 = vrot.slane %v9287_v28, 4 }
0x2195   :  { %v9742_v61 = vcombine.low %v9290_v24, %v9291_v12 }
0x21a8   :  { %9282 = vrot.lane.b32.xlu0 %v10707_v15, %s10740_s14 }
0x221b   :  { %v9254_v20 = vpop.xlane.xlu0 %9253 }
0x221c   :  { %v9258_v17 = vmul.f32 0.03125, %v9254_v20 }
0x221e   :  { %v9260_v0 = vadd.f32 1e-05, %v9258_v17 }
0x221f   :  { %v9257_v9 = vpop.xlane.xlu0 %9256 }
0x2220   :  { %10673 = vrsqrt.f32 %v9260_v0  ;;  %v9259_v10 = vmul.f32 0.03125, %v9257_v9  ;;  %v9369_v0 = vrot.slane %v12801_v14, 3 }
0x2222   :  { %v9261_v59 = vadd.f32 1e-05, %v9259_v10  ;;  %v9374_v9 = vrot.slane %v9369_v0, %v10811_v7 }
0x2223   :  { %v9283_v5 = vpop.permute.xlu0 %9282 }
0x2224   :  { %10675 = vrsqrt.f32 %v9261_v59  ;;  %v9289_v33 = vrot.slane %v9283_v5, 4 }
0x2226   :  { %v9741_v13 = vcombine.low %v9288_v39, %v9289_v33 }
0x2228   :  { %10403 = vmatpush3.bf16.msra.mxu0 %v9741_v13 }
0x2229   :  { %10404 = vmatprep.subr.bf16.mxu0 %v10735_v22 }
0x222a   :  { %v10674_v48 = vpop.eup %10673 }
0x222b   :  { %v9264_v38 = vmul.f32 %v10674_v48, %v9248_v45 }
0x222c   :  { %10405 = vmatpush3.bf16.msra.mxu0 %v9742_v61 }
0x222d   :  { %10422 = vmatprep.subr.bf16.mxu0 %v10735_v22  ;;  %v9271_v3 = vmul.f32 %v9269_v36, %v9264_v38 }
0x222e   :  { %v10676_v23 = vpop.eup %10675 }
0x222f   :  { %v9265_v34 = vmul.f32 %v10676_v23, %v9249_v43  ;;  %v9278_v40 = vadd.f32 %v9276_v44, %v9271_v3 }
0x2231   :  { %v9272_v41 = vmul.f32 %v9269_v36, %v9265_v34 }
0x2233   :  { %v9279_v30 = vadd.f32 %v9276_v44, %v9272_v41 }
0x2235   :  { %v9293_v18 = vpack.c.bf16 %v9279_v30, %v9278_v40 }
0x2237   :  { %10407 = vmatmul.mubr.msk.bf16.vlgmr.msra.gmra.mrb[148].mxu0 %vm61_vm0, %v9293_v18 }
0x2238   :  { %10423 = vmatpush3.bf16.msra.mxu0 %v10919_v63  ;;  %10426 = vmatprep.mubr.msk.bf16.mxu0 %vm10736_vm1, %v10735_v22  ;;  %v10519_v63 = vld [vmem:[%s12917_s4 + $0x30] sm:$0xff]  }
0x2239   :  { %10424 = vmatprep.subr.bf16.mxu0 %v10735_v22  ;;  %10415 = vmatpush3.bf16.msra.mxu1 %v10519_v63 }
0x223a   :  { %10416 = vmatprep.subr.bf16.mxu1 %v10735_v22 }
0x223d   :  { %10417 = vmatpush3.bf16.msra.mxu1 %v10520_v56 }
0x230a   :  { %v9344_v37 = vpop.f32.mrb[148].mxu0 }
0x230b   :  { %v9345_v26 = vadd.f32 %v9344_v37, %v9297_v51  ;;  %v10408_v60 = vpop.f32.mrb[149].mxu0 }
0x230c   :  { %v9347_v57 = vpop.f32.mrb[150].mxu0  ;;  %v9446_v60 = vrot.slane %v12420_v29, 3 }
0x230d   :  { %v9351_v55 = vmul.f32 %v9345_v26, %v9345_v26  ;;  %v9348_v49 = vadd.f32 %v9347_v57, %v9297_v51  ;;  %v10409_v52 = vpop.f32.mrb[151].mxu0  ;;  %v9447_v57 = vrot.slane %v12422_v46, 3 }
0x230f   :  { %v9353_v50 = vmul.f32 %v9351_v55, %v9345_v26  ;;  %v9352_v58 = vmul.f32 %v9348_v49, %v9348_v49 }
0x2311   :  { %v9355_v42 = vmul.f32 0.044715, %v9353_v50  ;;  %v9354_v22 = vmul.f32 %v9352_v58, %v9348_v49  ;;  %v9484_v50 = vrot.slane %v9447_v57, %v10811_v7 }
0x2313   :  { %v9357_v53 = vadd.f32 %v9355_v42, %v9345_v26  ;;  %v9356_v31 = vmul.f32 0.044715, %v9354_v22 }
0x2315   :  { %v9359_v45 = vmul.f32 0.7978846, %v9357_v53  ;;  %v9358_v47 = vadd.f32 %v9356_v31, %v9348_v49 }
0x2317   :  { %10677 = vtanh.f32 %v9359_v45  ;;  %v9360_v43 = vmul.f32 0.7978846, %v9358_v47 }
0x2319   :  { %10679 = vtanh.f32 %v9360_v43 }
0x2321   :  { %v10678_v4 = vpop.eup %10677 }
0x2322   :  { %v9363_v11 = vadd.f32 1.0, %v10678_v4 }
0x2323   :  { %v10680_v16 = vpop.eup %10679 }
0x2324   :  { %v9365_v2 = vmul.f32 0.5, %v9363_v11  ;;  %v9364_v15 = vadd.f32 1.0, %v10680_v16 }
0x2326   :  { %v9366_v8 = vmul.f32 0.5, %v9364_v15  ;;  %v9367_v20 = vmul.f32 %v9365_v2, %v9345_v26 }
0x2328   :  { %v9368_v6 = vmul.f32 %v9366_v8, %v9348_v49  ;;  %v9477_v49 = vrot.slane %v9446_v60, %v10811_v7 }
0x232a   :  { %v9370_v17 = vpack.c.bf16 %v9368_v6, %v9367_v20 }
0x232c   :  { %10419 = vmatmul.mubr.msk.bf16.vlgmr.msra.gmra.mrb[152].mxu1 %vm155_vm7, %v9370_v17 }
0x23ff   :  { %v9437_v10 = vpop.f32.mrb[152].mxu1 }
0x2400   :  { %v9438_v28 = vadd.f32 %v9437_v10, %v9374_v9  ;;  %v10420_v59 = vpop.f32.mrb[153].mxu1 }
0x2401   :  { %v9440_v39 = vpop.f32.mrb[154].mxu1 }
0x2402   :  { %v9444_v5 = vadd.f32 %v9438_v28, %v9278_v40  ;;  %v9441_v24 = vadd.f32 %v9440_v39, %v9374_v9  ;;  %v10421_v33 = vpop.f32.mrb[155].mxu1  ;;  %v10708_v40 = vld [vmem:[%s12916_s3 + $0x50] sm:$0xff] }
0x2404   :  { %v9445_v12 = vadd.f32 %v9441_v24, %v9279_v30  ;;  %v9448_v13 = vsel %vm61_vm0, %v9444_v5, 0.0  ;;  %v10709_v30 = vld [vmem:[%s12916_s3 + $0x58] sm:$0xff]  ;;  %s10749_s3 = smov [#allocation2]  }
0x2405   :  { %9449 = vadd.xlane.f32.xlu1 %v9448_v13  ;;  %v9501_v18 = vrot.slane %v10709_v30, 4 }
0x2406   :  { %v9451_v19 = vsel %vm61_vm0, %v9445_v12, 0.0 }
0x2407   :  { %9452 = vadd.xlane.f32.xlu0 %v9451_v19 }
0x2416   :  { %9488 = vrot.lane.b32.xlu1 %v11938_v62, %s10744_s1 }
0x2492   :  { %v9450_v14 = vpop.xlane.xlu1 %9449 }
0x2493   :  { %v9454_v61 = vmul.f32 0.03125, %v9450_v14 }
0x2494   :  { %v9453_v48 = vpop.xlane.xlu0 %9452 }
0x2495   :  { %v9456_v36 = vsub.f32 %v9444_v5, %v9454_v61  ;;  %v9455_v38 = vmul.f32 0.03125, %v9453_v48 }
0x2496   :  { %v9489_v35 = vpop.permute.xlu1 %9488 }
0x2497   :  { %v9457_v23 = vsub.f32 %v9445_v12, %v9455_v38  ;;  %v9494_v3 = vsel %vm155_vm7, %v10954_v27, %v9489_v35  ;;  %v9458_v34 = vmul.f32 %v9456_v36, %v9456_v36  ;;  %v9500_v27 = vrot.slane %v10708_v40, 4 }
0x2498   :  { %9496 = vst [vmem:[%s12920_s7] sm:$0xff] %v9494_v3 }
0x2499   :  { %v9460_v44 = vsel %vm61_vm0, %v9458_v34, 0.0  ;;  %v9459_v41 = vmul.f32 %v9457_v23, %v9457_v23  ;;  %v9750_v1 = vcombine.low %v9500_v27, %v9501_v18 }
0x249a   :  { %9461 = vadd.xlane.f32.xlu0 %v9460_v44 }
0x249b   :  { %v9463_v62 = vsel %vm61_vm0, %v9459_v41, 0.0  ;;  %10425 = vmatpush3.bf16.msra.mxu0 %v9750_v1 }
0x249e   :  { %9464 = vadd.xlane.f32.xlu0 %v9463_v62 }
0x24b4   :  { %9490 = vrot.lane.b32.xlu0 %v11945_v21, %s10744_s1 }
0x2527   :  { %v9462_v25 = vpop.xlane.xlu0 %9461 }
0x2528   :  { %v9466_v63 = vmul.f32 0.03125, %v9462_v25 }
0x252a   :  { %v9468_v56 = vadd.f32 1e-05, %v9466_v63 }
0x252b   :  { %v9465_v32 = vpop.xlane.xlu0 %9464 }
0x252c   :  { %10681 = vrsqrt.f32 %v9468_v56  ;;  %v9467_v51 = vmul.f32 0.03125, %v9465_v32 }
0x252e   :  { %v9469_v37 = vadd.f32 1e-05, %v9467_v51 }
0x252f   :  { %v9491_v21 = vpop.permute.xlu0 %9490 }
0x2530   :  { %10683 = vrsqrt.f32 %v9469_v37  ;;  %v9495_v26 = vsel %vm155_vm7, %v10974_v54, %v9491_v21 }
0x2531   :  { %9497 = vst [vmem:[%s12920_s7 + $0x8] sm:$0xff] %v9495_v26  ;;  %s9562_s7 = sshll.u32 %s10749_s3, 4  ;;  %s9563_s7 = int_to_ptr.vmem [resolvable:$true] %s9562_s7 }
0x2532   :  { %s10710_s10 = scalar_lea.vmem %s9563_s7, 256  ;;  %p10715_p1 = scmp.lt.s32.totalorder %s9563_s7, %s9563_s7 }
0x2533   :  { %p10711_p0 = scmp.ne.s32.totalorder %s9563_s7, %s10710_s10  ;;  %p10716_p2 = scmp.lt.s32.totalorder %s10710_s10, %s10710_s10 }
0x2535   :  { %p10717_p3 = por %p10716_p2, %p10715_p1 }
0x2536   :  { %v10682_v55 = vpop.eup %10681 }
0x2537   :  { %v9472_v52 = vmul.f32 %v10682_v55, %v9456_v36  ;;  %p10718_p4 = pnand %p10717_p3, %p10711_p0 }
0x2539   :  { %v9479_v58 = vmul.f32 %v9477_v49, %v9472_v52 }
0x253a   :  { %v10684_v42 = vpop.eup %10683 }
0x253b   :  { %v9473_v22 = vmul.f32 %v10684_v42, %v9457_v23  ;;  %v9486_v53 = vadd.f32 %v9484_v50, %v9479_v58 }
0x253d   :  { %v9480_v31 = vmul.f32 %v9477_v49, %v9473_v22 }
0x253f   :  { %v9487_v54 = vadd.f32 %v9484_v50, %v9480_v31 }
0x2541   :  { %v9502_v45 = vpack.c.bf16 %v9487_v54, %v9486_v53 }
0x2543   :  { %10427 = vmatmul.mubr.msk.bf16.vlgmr.msra.gmra.mrb[152].mxu0 %vm61_vm0, %v9502_v45 }
0x2616   :  { %v9548_v29 = vpop.f32.mrb[152].mxu0 }
0x2617   :  { %9555 = vst [vmem:[#allocation2] sm:$0xff] %v9548_v29  ;;  %v10428_v46 = vpop.f32.mrb[153].mxu0 }
0x2618   :  { %v9551_v47 = vpop.f32.mrb[154].mxu0 }
0x2619   :  { %9556 = vst [vmem:[#allocation2 + $0x8] sm:$0xff] %v9551_v47  ;;  %v10429_v43 = vpop.f32.mrb[155].mxu0 }
0x261a   :  { %10721 = shalt.err (!%p10718_p4)
}
0x261b   :  { %s10722_s5 = scalar_lea.hbm %s12919_s6, 256 }
0x261c   :  { %p10723_p5 = scmp.ne.s32.totalorder %s12919_s6, %s10722_s5  ;;  %p10726_p6 = scmp.lt.u32.totalorder %s10722_s5, %s12919_s6 }
0x261e   :  { %p10728_p7 = pnand %p10726_p6, %p10723_p5 }
0x2620   :  { %10731 = shalt.err (!%p10728_p7)
}
0x2621   :  { %s10750_s17 = smov 128  }
0x2622   :  { %9568 = dma.vmem_to_hbm [thread:$0]  %s9563_s7, 256, %s12919_s6, [#allocation3], %s10750_s17, %s10750_s17, %s10746_s16  }
0x2623   :  { %10732 = dma.done.wait [#allocation3], 256  }
0x2624   :  { %10733 = vsyncadd [#allocation3], 4294967040 }
0x2625   :  { %9580 = vsyncpa [#allocation3], 1 }

</bundles_post_ra>
